<compile_context>
chip_gen: v7x
topology: tpu7x:2x2x1
jax: 0.10.0
libtpu: 0.0.40
codegen_flags: <defaults>
</compile_context>

<pallas_src>
import functools

import jax
import jax.numpy as jnp
from jax.experimental import pallas as pl
from jax.experimental.pallas import tpu as pltpu


# ---------------------------------------------------------------------------
# Per-generation VMEM / tile selection.
# ---------------------------------------------------------------------------
def _tpu_vmem_capacity_bytes():
    try:
        info = pltpu.get_tpu_info()
        cap = getattr(info, "vmem_capacity_bytes", None)
        if cap:
            return int(cap)
    except Exception:
        pass
    return 64 * 1024 * 1024  # conservative (v7x-sized) default


_VMEM_CAP = _tpu_vmem_capacity_bytes()
_BIG_VMEM = _VMEM_CAP >= 100 * 1024 * 1024          # v5e / v6e: 128 MiB physical
_VMEM_LIMIT_BYTES = (96 if _BIG_VMEM else 48) * 1024 * 1024
_MM_TM, _MM_TN, _MM_TK = (512, 512, 1024) if _BIG_VMEM else (256, 256, 512)


def _cparams(*sem):
    return pltpu.CompilerParams(dimension_semantics=tuple(sem),
                                vmem_limit_bytes=_VMEM_LIMIT_BYTES)


def _pick_tile(dim, target, quantum):
    # Largest tile <= target that divides dim on the given quantum; else the
    # full dim (always a legal BlockSpec).
    if dim <= target:
        return dim
    t = (target // quantum) * quantum
    while t >= quantum:
        if dim % t == 0:
            return t
        t -= quantum
    return dim


# ---------------------------------------------------------------------------
# 1) Tiled bf16 MXU matmul + per-column affine (+ optional ReLU), f32 scratch.
# ---------------------------------------------------------------------------
def _matmul_affine_kernel(x_ref, w_ref, scale_ref, shift_ref, o_ref, acc_ref,
                          *, apply_relu):
    @pl.when(pl.program_id(2) == 0)
    def _():
        acc_ref[...] = jnp.zeros_like(acc_ref)

    acc_ref[...] += jnp.dot(x_ref[...], w_ref[...],
                            preferred_element_type=jnp.float32)

    @pl.when(pl.program_id(2) == pl.num_programs(2) - 1)
    def _():
        y = acc_ref[...] * scale_ref[...] + shift_ref[...]
        if apply_relu:
            y = jnp.maximum(y, 0.0)
        o_ref[...] = y.astype(o_ref.dtype)


def matmul_affine(x, w, scale, shift, relu=False):
    M, K = x.shape
    N = w.shape[1]
    tm = _pick_tile(M, _MM_TM, 16)      # 16: bf16 sublane packing quantum
    tn = _pick_tile(N, _MM_TN, 128)
    tk = _pick_tile(K, _MM_TK, 128)
    return pl.pallas_call(
        functools.partial(_matmul_affine_kernel, apply_relu=relu),
        grid=(M // tm, N // tn, K // tk),
        in_specs=[
            pl.BlockSpec((tm, tk), lambda i, j, k: (i, k)),
            pl.BlockSpec((tk, tn), lambda i, j, k: (k, j)),
            pl.BlockSpec((1, tn), lambda i, j, k: (0, j)),
            pl.BlockSpec((1, tn), lambda i, j, k: (0, j)),
        ],
        out_specs=pl.BlockSpec((tm, tn), lambda i, j, k: (i, j)),
        out_shape=jax.ShapeDtypeStruct((M, N), jnp.bfloat16),
        scratch_shapes=[pltpu.VMEM((tm, tn), jnp.float32)],
        compiler_params=_cparams("parallel", "parallel", "arbitrary"),
    )(x.astype(jnp.bfloat16), w.astype(jnp.bfloat16),
      scale.reshape(1, N).astype(jnp.float32),
      shift.reshape(1, N).astype(jnp.float32))


# ---------------------------------------------------------------------------
# 2) Depthwise kxk Conv2d (channels-last VPU tap-sum) + per-channel affine.
# ---------------------------------------------------------------------------
def _dwconv2d_kernel(xp_ref, w_ref, scale_ref, shift_ref, o_ref, *, k, apply_relu):
    _, H, W, tc = o_ref.shape
    acc = jnp.zeros((H, W, tc), jnp.float32)
    for t in range(k * k):
        i, j = divmod(t, k)
        acc = acc + xp_ref[0, i:i + H, j:j + W, :].astype(jnp.float32) * w_ref[t]
    y = acc * scale_ref[...] + shift_ref[...]
    if apply_relu:
        y = jnp.maximum(y, 0.0)
    o_ref[0] = y.astype(o_ref.dtype)


def dwconv2d(xp_cl, w_taps, scale, shift, k, relu=False):
    # xp_cl: (bs, H+2p, W+2p, C) channels-last, already spatially padded.
    bs, Hp, Wp, C = xp_cl.shape
    pad = k // 2
    H, W = Hp - 2 * pad, Wp - 2 * pad
    tc = _pick_tile(C, 512, 128)
    return pl.pallas_call(
        functools.partial(_dwconv2d_kernel, k=k, apply_relu=relu),
        grid=(bs, C // tc),
        in_specs=[
            pl.BlockSpec((1, Hp, Wp, tc), lambda b, j: (b, 0, 0, j)),
            pl.BlockSpec((k * k, 1, tc), lambda b, j: (0, 0, j)),
            pl.BlockSpec((1, tc), lambda b, j: (0, j)),
            pl.BlockSpec((1, tc), lambda b, j: (0, j)),
        ],
        out_specs=pl.BlockSpec((1, H, W, tc), lambda b, j: (b, 0, 0, j)),
        out_shape=jax.ShapeDtypeStruct((bs, H, W, C), jnp.bfloat16),
        compiler_params=_cparams("parallel", "parallel"),
    )(xp_cl.astype(jnp.bfloat16), w_taps.astype(jnp.float32),
      scale.reshape(1, C).astype(jnp.float32),
      shift.reshape(1, C).astype(jnp.float32))


# ---------------------------------------------------------------------------
# 3) SeMCA convd_key: depthwise Conv1d over the channel axis, HW on lanes.
# ---------------------------------------------------------------------------
def _convd_key_kernel(xp_ref, w_ref, b_ref, o_ref, *, d):
    _, C, L = o_ref.shape
    acc = jnp.zeros((C, L), jnp.float32) + b_ref[...]
    for t in range(d):
        acc = acc + xp_ref[0, t:t + C, :].astype(jnp.float32) * w_ref[t:t + 1, :]
    o_ref[0] = acc.astype(o_ref.dtype)


def convd_key(x_chw, w_dp, bias, d):
    # x_chw: (bs, C, HW); w_dp: (d, HW); bias: (HW,)
    bs, C, HW = x_chw.shape
    pad1 = d // 2
    xp = jnp.pad(x_chw.astype(jnp.bfloat16), ((0, 0), (pad1, pad1), (0, 0)))
    Cp = C + 2 * pad1
    thw = _pick_tile(HW, 1024, 128)
    return pl.pallas_call(
        functools.partial(_convd_key_kernel, d=d),
        grid=(bs, HW // thw),
        in_specs=[
            pl.BlockSpec((1, Cp, thw), lambda b, j: (b, 0, j)),
            pl.BlockSpec((d, thw), lambda b, j: (0, j)),
            pl.BlockSpec((1, thw), lambda b, j: (0, j)),
        ],
        out_specs=pl.BlockSpec((1, C, thw), lambda b, j: (b, 0, j)),
        out_shape=jax.ShapeDtypeStruct((bs, C, HW), jnp.bfloat16),
        compiler_params=_cparams("parallel", "parallel"),
    )(xp, w_dp.astype(jnp.float32), bias.reshape(1, HW).astype(jnp.float32))


# ---------------------------------------------------------------------------
# 4) SeMCA attention_embed: two grouped 1x1 convs fused, LANE-DENSE layout:
#    x_g (G, K1, M), a1 = (N1, M) = W1 @ x, a2 = (d, M) = W2 @ a1.
# ---------------------------------------------------------------------------
def _grouped_mlp_kernel(x_ref, w1_ref, s1_ref, t1_ref, w2_ref, b2_ref, o_ref):
    a1 = jnp.dot(w1_ref[0], x_ref[0], preferred_element_type=jnp.float32)
    a1 = jnp.maximum(a1 * s1_ref[0] + t1_ref[0], 0.0)
    a2 = jnp.dot(w2_ref[0], a1, preferred_element_type=jnp.float32)
    o_ref[0] = (a2 + b2_ref[0]).astype(o_ref.dtype)


def grouped_mlp(x_g, w1_g, s1_g, t1_g, w2_g, b2_g):
    # x_g: (G, K1, M); w1_g: (G, N1, K1); w2_g: (G, N2, N1) -> out (G, N2, M)
    G, K1, M = x_g.shape
    N1 = w1_g.shape[1]
    N2 = w2_g.shape[1]
    return pl.pallas_call(
        _grouped_mlp_kernel,
        grid=(G,),
        in_specs=[
            pl.BlockSpec((1, K1, M), lambda g: (g, 0, 0)),
            pl.BlockSpec((1, N1, K1), lambda g: (g, 0, 0)),
            pl.BlockSpec((1, N1, 1), lambda g: (g, 0, 0)),
            pl.BlockSpec((1, N1, 1), lambda g: (g, 0, 0)),
            pl.BlockSpec((1, N2, N1), lambda g: (g, 0, 0)),
            pl.BlockSpec((1, N2, 1), lambda g: (g, 0, 0)),
        ],
        out_specs=pl.BlockSpec((1, N2, M), lambda g: (g, 0, 0)),
        out_shape=jax.ShapeDtypeStruct((G, N2, M), jnp.float32),
        compiler_params=_cparams("parallel"),
    )(x_g.astype(jnp.bfloat16), w1_g.astype(jnp.bfloat16),
      s1_g.astype(jnp.float32), t1_g.astype(jnp.float32),
      w2_g.astype(jnp.float32), b2_g.astype(jnp.float32))


# ---------------------------------------------------------------------------
# 5) SeMCA tail: softmax over d taps (on the small sL x sL logit planes),
#    in-kernel ku x ku spatial spread (pure concats), d-tap value sum + k1_pad.
# ---------------------------------------------------------------------------
def _semca_tail_kernel(att_ref, vp_ref, k1p_ref, o_ref, *, d, ku):
    _, C, PS, _ = o_ref.shape
    logits = [att_ref[0, t * C:(t + 1) * C] for t in range(d)]  # (C, sL, sL) f32
    m = logits[0]
    for t in range(1, d):
        m = jnp.maximum(m, logits[t])
    es = [jnp.exp(l - m) for l in logits]
    ssum = es[0]
    for t in range(1, d):
        ssum = ssum + es[t]
    inv = pl.reciprocal(ssum, approx=True)
    acc = jnp.zeros((C, PS, PS), jnp.float32)
    for t in range(d):
        p_small = es[t] * inv                                   # (C, sL, sL)
        row = jnp.concatenate([p_small] * ku, axis=-1)          # (C, sL, PS)
        p_full = jnp.concatenate([row] * ku, axis=-2)           # (C, PS, PS)
        acc = acc + p_full * vp_ref[0, t:t + C].astype(jnp.float32)
    o_ref[0] = (k1p_ref[0].astype(jnp.float32) + acc).astype(o_ref.dtype)


def semca_tail(att4, v_pad4, k1_pad4, d, ku):
    # att4: (bs, d*C, sL, sL); v_pad4: (bs, C+2*(d//2), PS, PS); k1_pad4: (bs, C, PS, PS)
    bs, dC, sL, _ = att4.shape
    C = dC // d
    Cp = v_pad4.shape[1]
    PS = v_pad4.shape[2]
    return pl.pallas_call(
        functools.partial(_semca_tail_kernel, d=d, ku=ku),
        grid=(bs,),
        in_specs=[
            pl.BlockSpec((1, dC, sL, sL), lambda b: (b, 0, 0, 0)),
            pl.BlockSpec((1, Cp, PS, PS), lambda b: (b, 0, 0, 0)),
            pl.BlockSpec((1, C, PS, PS), lambda b: (b, 0, 0, 0)),
        ],
        out_specs=pl.BlockSpec((1, C, PS, PS), lambda b: (b, 0, 0, 0)),
        out_shape=jax.ShapeDtypeStruct((bs, C, PS, PS), jnp.bfloat16),
        compiler_params=_cparams("parallel"),
    )(att4.astype(jnp.float32), v_pad4.astype(jnp.bfloat16),
      k1_pad4.astype(jnp.bfloat16))


# ---------------------------------------------------------------------------
# 6) SaMCA attention (grouped 1x1 x2 on the MXU) + softmax over HW +
#    head->channel repeat + (k1 + att*x) + DMuCA alpha-mix + BN + residual +
#    ReLU, fully fused, single full-tile (C, HW) store.
# ---------------------------------------------------------------------------
def _samca_combine_kernel(k1_ref, x_ref, o1_ref, res_ref, w1k_ref, w1x_ref,
                          s1_ref, t1_ref, w2_ref, b2_ref, scale_ref, shift_ref,
                          alpha_ref, o_ref, *, groups, rep):
    _, C, HW = o_ref.shape
    k1 = k1_ref[0]                                             # (C, HW) bf16
    x = x_ref[0]
    logit_rows = []
    for g in range(groups):
        c0 = g * rep
        mid = (jnp.dot(w1k_ref[g], k1[c0:c0 + rep, :],
                       preferred_element_type=jnp.float32) +
               jnp.dot(w1x_ref[g], x[c0:c0 + rep, :],
                       preferred_element_type=jnp.float32))    # (n_mid, HW)
        mid = jnp.maximum(mid * s1_ref[g] + t1_ref[g], 0.0)
        logit_rows.append(jnp.dot(w2_ref[g], mid,
                                  preferred_element_type=jnp.float32)
                          + b2_ref[g])                         # (1, HW)
    logit = jnp.concatenate(logit_rows, axis=0)                # (G, HW)
    mx = jnp.max(logit, axis=-1, keepdims=True)
    e = jnp.exp(logit - mx)
    att = e * pl.reciprocal(jnp.sum(e, axis=-1, keepdims=True), approx=True)
    att_c = jnp.concatenate(
        [jnp.broadcast_to(att[g:g + 1, :], (rep, HW)) for g in range(groups)],
        axis=0)                                                # (C, HW)
    out2 = k1.astype(jnp.float32) + att_c * x.astype(jnp.float32)
    # DMuCA mix + BN + residual + ReLU epilogue (single unmasked store)
    alpha = alpha_ref[...]                                     # (1, 1)
    y = alpha * o1_ref[0].astype(jnp.float32) + (1.0 - alpha) * out2
    y = y * scale_ref[...] + shift_ref[...] + res_ref[0]
    o_ref[0] = jnp.maximum(y, 0.0).astype(o_ref.dtype)


def samca_combine(k1s, x1, out1, res, w1k, w1x, s1, t1, w2, b2,
                  scale_c, shift_c, alpha, spa_head):
    bs, C, HW = x1.shape
    rep = C // spa_head
    n_mid = C // spa_head
    return pl.pallas_call(
        functools.partial(_samca_combine_kernel, groups=spa_head, rep=rep),
        grid=(bs,),
        in_specs=[
            pl.BlockSpec((1, C, HW), lambda b: (b, 0, 0)),
            pl.BlockSpec((1, C, HW), lambda b: (b, 0, 0)),
            pl.BlockSpec((1, C, HW), lambda b: (b, 0, 0)),
            pl.BlockSpec((1, C, HW), lambda b: (b, 0, 0)),
            pl.BlockSpec((spa_head, n_mid, rep), lambda b: (0, 0, 0)),
            pl.BlockSpec((spa_head, n_mid, rep), lambda b: (0, 0, 0)),
            pl.BlockSpec((spa_head, n_mid, 1), lambda b: (0, 0, 0)),
            pl.BlockSpec((spa_head, n_mid, 1), lambda b: (0, 0, 0)),
            pl.BlockSpec((spa_head, 1, n_mid), lambda b: (0, 0, 0)),
            pl.BlockSpec((spa_head, 1, 1), lambda b: (0, 0, 0)),
            pl.BlockSpec((C, 1), lambda b: (0, 0)),
            pl.BlockSpec((C, 1), lambda b: (0, 0)),
            pl.BlockSpec((1, 1), lambda b: (0, 0)),
        ],
        out_specs=pl.BlockSpec((1, C, HW), lambda b: (b, 0, 0)),
        out_shape=jax.ShapeDtypeStruct((bs, C, HW), jnp.float32),
        input_output_aliases={3: 0},        # residual buffer -> output
        compiler_params=_cparams("parallel"),
    )(k1s.astype(jnp.bfloat16), x1.astype(jnp.bfloat16),
      out1.astype(jnp.bfloat16), res.astype(jnp.float32),
      w1k.astype(jnp.bfloat16), w1x.astype(jnp.bfloat16),
      s1.astype(jnp.float32), t1.astype(jnp.float32),
      w2.astype(jnp.float32), b2.astype(jnp.float32),
      scale_c.reshape(C, 1).astype(jnp.float32),
      shift_c.reshape(C, 1).astype(jnp.float32),
      jnp.asarray(alpha, jnp.float32).reshape(1, 1))


# ---------------------------------------------------------------------------
# Plain-JAX glue: BN folding, im2col (dense conv only), dilated unfold.
# ---------------------------------------------------------------------------
def bn_fold(bnp, eps=1e-5):
    scale = bnp['gamma'] / jnp.sqrt(bnp['var'] + eps)
    shift = bnp['beta'] - bnp['mean'] * scale
    return scale, shift


def im2col(x, k):
    # x: (B, C, H, W) -> (B*H*W, C*k*k), column index = ci*k*k + kh*k + kw
    bs, C, H, W = x.shape
    pad = k // 2
    xp = jnp.pad(x, ((0, 0), (0, 0), (pad, pad), (pad, pad)))
    pats = [xp[:, :, i:i + H, j:j + W] for i in range(k) for j in range(k)]
    p = jnp.stack(pats, axis=2)            # (B, C, k*k, H, W)
    p = p.transpose(0, 3, 4, 1, 2)         # (B, H, W, C, k*k)
    return p.reshape(bs * H * W, C * k * k)


def unfold_dil(y, ku, dil):
    # torch.nn.Unfold(kernel=(ku,ku), dilation=dil, stride=1, padding=0)
    bs, C, P, _ = y.shape
    L = P - dil * (ku - 1)
    cols = [y[:, :, dil * a:dil * a + L, dil * b:dil * b + L].reshape(bs, C, L * L)
            for a in range(ku) for b in range(ku)]
    return jnp.stack(cols, axis=2).reshape(bs, C * ku * ku, L * L)


# ---------------------------------------------------------------------------
# Parameter init (deterministic, synthetic)
# ---------------------------------------------------------------------------
def init_params(key, cfg):
    C = cfg['planes']; Cin = cfg['inplanes']
    H = cfg['img_size']; HW = H * H
    d = cfg['spe_kerner']
    spe_head = cfg['spe_head']; sL = int(spe_head ** 0.5)
    padsize = ((H - 1) // sL + 1) * sL
    share_head = padsize * padsize // spe_head
    spa_head = cfg['spa_head']; ks = cfg['spa_kerner']

    it = iter(jax.random.split(key, 64))

    def nrm(shape, s=0.2):
        return (s * jax.random.normal(next(it), shape)).astype(jnp.float32)

    def bn(n):
        return dict(
            gamma=(1.0 + 0.1 * jax.random.normal(next(it), (n,))).astype(jnp.float32),
            beta=(0.1 * jax.random.normal(next(it), (n,))).astype(jnp.float32),
            mean=(0.1 * jax.random.normal(next(it), (n,))).astype(jnp.float32),
            var=(1.0 + 0.1 * jnp.abs(jax.random.normal(next(it), (n,)))).astype(jnp.float32),
        )

    p = {}
    p['conv_w'] = nrm((C, Cin, 3, 3))
    p['conv_bn'] = bn(C)
    # SeMCA
    p['se_key_w'] = nrm((HW, 1, d)); p['se_key_b'] = nrm((HW,))
    p['se_att1_w'] = nrm((spe_head * share_head, 2 * share_head, 1, 1))
    p['se_att1_bn'] = bn(spe_head * share_head)
    p['se_att2_w'] = nrm((spe_head * d, share_head, 1, 1)); p['se_att2_b'] = nrm((spe_head * d,))
    p['se_val_w'] = nrm((C, 1, 3, 3)); p['se_val_b'] = nrm((C,))
    # SaMCA
    p['sa_key_w'] = nrm((C, 1, ks, ks)); p['sa_key_bn'] = bn(C)
    p['sa_att1_w'] = nrm((C, 2 * C // spa_head, 1, 1)); p['sa_att1_bn'] = bn(C)
    p['sa_att2_w'] = nrm((spa_head, C // spa_head, 1, 1)); p['sa_att2_b'] = nrm((spa_head,))
    # DMuCA
    p['alpha'] = jnp.float32(0.5)
    p['dmuca_bn'] = bn(C)
    return p


# ---------------------------------------------------------------------------
# BasicBlock forward
# ---------------------------------------------------------------------------
def basic_block_forward(x, p, cfg):
    bs, Cin, H, W = x.shape
    C = cfg['planes']
    assert Cin == C, "residual add requires inplanes == planes"
    HW = H * W
    d = cfg['spe_kerner']; pad1 = d // 2
    spe_head = cfg['spe_head']; sL = int(spe_head ** 0.5)
    padsize = ((cfg['img_size'] - 1) // sL + 1) * sL
    share_head = padsize * padsize // spe_head
    ku = int(share_head ** 0.5)
    pad_space = padsize - cfg['img_size']
    pad_spe_start = pad_space // 2
    spa_head = cfg['spa_head']; ks = cfg['spa_kerner']

    residual = x.reshape(bs, C, HW)

    # ------------- BasicBlock.conv : dense 3x3 + BN + ReLU (MXU) -------------
    patches = im2col(x.astype(jnp.bfloat16), 3)               # (bs*HW, Cin*9) bf16
    Wd = p['conv_w'].transpose(1, 2, 3, 0).reshape(Cin * 9, C)
    sc, sh = bn_fold(p['conv_bn'])
    x1_cl = matmul_affine(patches, Wd, sc, sh, relu=True).reshape(bs, H, W, C)
    x1_chw = x1_cl.transpose(0, 3, 1, 2)                      # (bs, C, H, W) bf16
    x1_flat = x1_chw.reshape(bs, C, HW)

    # ================================ SeMCA =================================
    wk = p['se_key_w'][:, 0, :].T                             # (d, HW)
    k1_flat = convd_key(x1_flat, wk, p['se_key_b'], d)        # (bs, C, HW) bf16
    k1 = k1_flat.reshape(bs, C, H, W)

    k1_pad = jnp.pad(k1, ((0, 0), (0, 0), (0, pad_space), (0, pad_space)))
    q_pad = jnp.pad(x1_chw, ((0, 0), (0, 0), (0, pad_space), (0, pad_space)))

    key_unf = unfold_dil(k1_pad, ku, sL).transpose(0, 2, 1)   # (bs, spe_head, C*ku*ku)
    q_unf = unfold_dil(q_pad, ku, sL).transpose(0, 2, 1)
    key_q = jnp.stack((q_unf, key_unf), axis=2)               # (bs, spe_head, 2, C*ku*ku)
    key_q = key_q.reshape(bs, 2 * spe_head * share_head, C)   # reference reshape
    X = key_q.transpose(0, 2, 1).reshape(bs * C, 2 * spe_head * share_head)
    Xg = X.reshape(bs * C, spe_head, 2 * share_head).transpose(1, 2, 0)  # (G, K1, M)

    W1g = p['se_att1_w'][:, :, 0, 0].reshape(spe_head, share_head, 2 * share_head)
    sc1, sh1 = bn_fold(p['se_att1_bn'])
    W2g = p['se_att2_w'][:, :, 0, 0].reshape(spe_head, d, share_head)
    att_g = grouped_mlp(Xg, W1g,
                        sc1.reshape(spe_head, share_head, 1),
                        sh1.reshape(spe_head, share_head, 1),
                        W2g, p['se_att2_b'].reshape(spe_head, d, 1))  # (G, d, bs*C)

    # logits laid out for the in-kernel ku x ku spread: (bs, d*C, sL, sL)
    att_small = (att_g.reshape(spe_head, d, bs, C)
                 .transpose(2, 1, 3, 0)
                 .reshape(bs, d * C, sL, sL))

    # convd_value: depthwise 3x3 + bias (channels-last VPU tap-sum)
    x1_pad_cl = jnp.pad(x1_cl, ((0, 0), (1, 1), (1, 1), (0, 0)))
    wv = p['se_val_w'][:, 0].reshape(C, 9).T.reshape(9, 1, C)
    v_cl = dwconv2d(x1_pad_cl, wv, jnp.ones((C,), jnp.float32), p['se_val_b'],
                    3, relu=False)                            # (bs, H, W, C) bf16
    v_pad4 = jnp.pad(v_cl.transpose(0, 3, 1, 2),
                     ((0, 0), (pad1, pad1), (pad_space, 0), (pad_space, 0)))

    out1_4d = semca_tail(att_small, v_pad4, k1_pad, d, ku)    # (bs, C, PS, PS) bf16
    out1 = out1_4d[:, :, pad_spe_start:H + pad_spe_start,
                   pad_spe_start:W + pad_spe_start].reshape(bs, C, HW)

    # ============ SaMCA + DMuCA mix + BN + residual + ReLU (fused) ==========
    pad_s = ks // 2
    xs_pad_cl = (x1_pad_cl if ks == 3 else
                 jnp.pad(x1_cl, ((0, 0), (pad_s, pad_s), (pad_s, pad_s), (0, 0))))
    wks = p['sa_key_w'][:, 0].reshape(C, ks * ks).T.reshape(ks * ks, 1, C)
    sck, shk = bn_fold(p['sa_key_bn'])
    k1s_cl = dwconv2d(xs_pad_cl, wks, sck, shk, ks, relu=True)   # (bs, H, W, C)
    k1s_flat = k1s_cl.transpose(0, 3, 1, 2).reshape(bs, C, HW)

    # NOTE: SaMCA.value_embed output is discarded in the reference forward
    # (v is overwritten by x.view(...)), so it is skipped.
    sca1, sha1 = bn_fold(p['sa_att1_bn'])
    rep = C // spa_head
    w1g = p['sa_att1_w'][:, :, 0, 0].reshape(spa_head, rep, 2 * rep)
    w1k = w1g[:, :, 0::2]                      # taps on k1 channels
    w1x = w1g[:, :, 1::2]                      # taps on x channels
    w2 = p['sa_att2_w'][:, :, 0, 0].reshape(spa_head, 1, rep)
    b2 = p['sa_att2_b'].reshape(spa_head, 1, 1)

    scd, shd = bn_fold(p['dmuca_bn'])
    out = samca_combine(k1s_flat, x1_flat, out1, residual,
                        w1k, w1x,
                        sca1.reshape(spa_head, rep, 1),
                        sha1.reshape(spa_head, rep, 1),
                        w2, b2, scd, shd, p['alpha'], spa_head)
    return out.reshape(bs, C, H, W)


# ---------------------------------------------------------------------------
if __name__ == "__main__":
    cfg = dict(spe_head=4, spa_head=4, spa_kerner=3, spe_kerner=3,
               img_size=5, inplanes=8, planes=8)
    bs = 2

    key = jax.random.PRNGKey(0)
    kx, kp = jax.random.split(key)
    x = jax.random.normal(kx, (bs, cfg['inplanes'], cfg['img_size'], cfg['img_size']),
                          dtype=jnp.float32)
    params = init_params(kp, cfg)

    fwd = jax.jit(lambda xx, pp: basic_block_forward(xx, pp, cfg))
    out = fwd(x, params)
    jax.block_until_ready(out)

    assert out.shape == x.shape, out.shape
    assert bool(jnp.all(jnp.isfinite(out))), "non-finite output"
    assert bool(jnp.all(out >= 0.0)), "final ReLU violated"
    print("KERNEL_OK")
</pallas_src>

<mosaic_0001>
module attributes {stable_mosaic.version = 11 : i64} {
  func.func @_matmul_affine_kernel(%arg0: i32, %arg1: i32, %arg2: i32, %arg3: memref<50x72xbf16, #tpu.memory_space<vmem>>, %arg4: memref<72x8xbf16, #tpu.memory_space<vmem>>, %arg5: memref<1x8xf32, #tpu.memory_space<vmem>>, %arg6: memref<1x8xf32, #tpu.memory_space<vmem>>, %arg7: memref<50x8xbf16, #tpu.memory_space<vmem>>, %arg8: memref<50x8xf32, #tpu.memory_space<vmem>>) attributes {dimension_semantics = [#tpu.dimension_semantics<parallel>, #tpu.dimension_semantics<parallel>, #tpu.dimension_semantics<arbitrary>], iteration_bounds = array<i64: 1, 1, 1>, scalar_prefetch = 0 : i64, scratch_operands = 1 : i64, tpu.core_type = #tpu.core_type<tc>, window_params = [{transform_indices = @transform_0, window_bounds = array<i64: 50, 72>}, {transform_indices = @transform_1, window_bounds = array<i64: 72, 8>}, {transform_indices = @transform_2, window_bounds = array<i64: 1, 8>}, {transform_indices = @transform_3, window_bounds = array<i64: 1, 8>}, {transform_indices = @transform_4, window_bounds = array<i64: 50, 8>}]} {
    %c0_i32 = arith.constant 0 : i32
    %0 = arith.cmpi eq, %arg2, %c0_i32 : i32
    %1 = arith.extui %0 : i1 to i32
    %c0_i32_0 = arith.constant 0 : i32
    %2 = arith.cmpi ne, %1, %c0_i32_0 : i32
    scf.if %2 {
      %cst_10 = arith.constant 0.000000e+00 : f32
      %12 = vector.broadcast %cst_10 : f32 to vector<50x8xf32>
      %c0_11 = arith.constant 0 : index
      %c0_12 = arith.constant 0 : index
      %13 = vector.load %arg8[%c0_11, %c0_12] : memref<50x8xf32, #tpu.memory_space<vmem>>, vector<50x8xf32>
      tpu.vector_store %arg8[%c0_11, %c0_12], %12 {strides = array<i32>} : memref<50x8xf32, #tpu.memory_space<vmem>>, vector<50x8xf32>,
    } else {
    }
    %c0 = arith.constant 0 : index
    %c0_1 = arith.constant 0 : index
    %3 = vector.load %arg8[%c0, %c0_1] : memref<50x8xf32, #tpu.memory_space<vmem>>, vector<50x8xf32>
    %c0_2 = arith.constant 0 : index
    %c0_3 = arith.constant 0 : index
    %4 = vector.load %arg3[%c0_2, %c0_3] : memref<50x72xbf16, #tpu.memory_space<vmem>>, vector<50x72xbf16>
    %c0_4 = arith.constant 0 : index
    %c0_5 = arith.constant 0 : index
    %5 = vector.load %arg4[%c0_4, %c0_5] : memref<72x8xbf16, #tpu.memory_space<vmem>>, vector<72x8xbf16>
    %cst = arith.constant dense<0.000000e+00> : vector<50x8xf32>
    %6 = tpu.matmul %4, %5, %cst {dimension_numbers = #tpu.dot_dimension_numbers<[1], [0], [0], [1], [0, 0, 1, 1], [], []>} : vector<50x72xbf16>, vector<72x8xbf16>, vector<50x8xf32> -> vector<50x8xf32>
    %7 = arith.addf %3, %6 : vector<50x8xf32>
    %c0_6 = arith.constant 0 : index
    %c0_7 = arith.constant 0 : index
    %8 = vector.load %arg8[%c0_6, %c0_7] : memref<50x8xf32, #tpu.memory_space<vmem>>, vector<50x8xf32>
    tpu.vector_store %arg8[%c0_6, %c0_7], %7 {strides = array<i32>} : memref<50x8xf32, #tpu.memory_space<vmem>>, vector<50x8xf32>,
    %c0_i32_8 = arith.constant 0 : i32
    %9 = arith.cmpi eq, %arg2, %c0_i32_8 : i32
    %10 = arith.extui %9 : i1 to i32
    %c0_i32_9 = arith.constant 0 : i32
    %11 = arith.cmpi ne, %10, %c0_i32_9 : i32
    scf.if %11 {
      %c0_10 = arith.constant 0 : index
      %c0_11 = arith.constant 0 : index
      %12 = vector.load %arg8[%c0_10, %c0_11] : memref<50x8xf32, #tpu.memory_space<vmem>>, vector<50x8xf32>
      %c0_12 = arith.constant 0 : index
      %c0_13 = arith.constant 0 : index
      %13 = vector.load %arg5[%c0_12, %c0_13] : memref<1x8xf32, #tpu.memory_space<vmem>>, vector<1x8xf32>
      %14 = vector.broadcast %13 : vector<1x8xf32> to vector<50x8xf32>
      %15 = arith.mulf %12, %14 : vector<50x8xf32>
      %c0_14 = arith.constant 0 : index
      %c0_15 = arith.constant 0 : index
      %16 = vector.load %arg6[%c0_14, %c0_15] : memref<1x8xf32, #tpu.memory_space<vmem>>, vector<1x8xf32>
      %17 = vector.broadcast %16 : vector<1x8xf32> to vector<50x8xf32>
      %18 = arith.addf %15, %17 : vector<50x8xf32>
      %cst_16 = arith.constant 0.000000e+00 : f32
      %19 = vector.broadcast %cst_16 : f32 to vector<50x8xf32>
      %20 = arith.maximumf %18, %19 : vector<50x8xf32>
      %21 = arith.truncf %20 : vector<50x8xf32> to vector<50x8xbf16>
      %c0_17 = arith.constant 0 : index
      %c0_18 = arith.constant 0 : index
      %22 = vector.load %arg7[%c0_17, %c0_18] : memref<50x8xbf16, #tpu.memory_space<vmem>>, vector<50x8xbf16>
      tpu.vector_store %arg7[%c0_17, %c0_18], %21 {strides = array<i32>} : memref<50x8xbf16, #tpu.memory_space<vmem>>, vector<50x8xbf16>,
    } else {
    }
    return
  }
  func.func @transform_0(%arg0: i32, %arg1: i32, %arg2: i32) -> (i32, i32) {
    %c0_i32 = arith.constant 0 : i32
    return %arg0, %arg2 : i32, i32
  }
  func.func @transform_1(%arg0: i32, %arg1: i32, %arg2: i32) -> (i32, i32) {
    %c0_i32 = arith.constant 0 : i32
    return %arg2, %arg1 : i32, i32
  }
  func.func @transform_2(%arg0: i32, %arg1: i32, %arg2: i32) -> (i32, i32) {
    %c0_i32 = arith.constant 0 : i32
    %c0_i32_0 = arith.constant 0 : i32
    return %c0_i32, %arg1 : i32, i32
  }
  func.func @transform_3(%arg0: i32, %arg1: i32, %arg2: i32) -> (i32, i32) {
    %c0_i32 = arith.constant 0 : i32
    %c0_i32_0 = arith.constant 0 : i32
    return %c0_i32, %arg1 : i32, i32
  }
  func.func @transform_4(%arg0: i32, %arg1: i32, %arg2: i32) -> (i32, i32) {
    %c0_i32 = arith.constant 0 : i32
    return %arg0, %arg1 : i32, i32
  }
}

module attributes {stable_mosaic.version = 11 : i64} {
  func.func @_convd_key_kernel(%arg0: i32, %arg1: i32, %arg2: memref<1x10x25xbf16, #tpu.memory_space<vmem>>, %arg3: memref<3x25xf32, #tpu.memory_space<vmem>>, %arg4: memref<1x25xf32, #tpu.memory_space<vmem>>, %arg5: memref<1x8x25xbf16, #tpu.memory_space<vmem>>) attributes {dimension_semantics = [#tpu.dimension_semantics<parallel>, #tpu.dimension_semantics<parallel>], iteration_bounds = array<i64: 2, 1>, scalar_prefetch = 0 : i64, scratch_operands = 0 : i64, tpu.core_type = #tpu.core_type<tc>, window_params = [{transform_indices = @transform_0, window_bounds = array<i64: 1, 10, 25>}, {transform_indices = @transform_1, window_bounds = array<i64: 3, 25>}, {transform_indices = @transform_2, window_bounds = array<i64: 1, 25>}, {transform_indices = @transform_3, window_bounds = array<i64: 1, 8, 25>}]} {
    %cst = arith.constant 0.000000e+00 : f32
    %0 = vector.broadcast %cst : f32 to vector<8x25xf32>
    %c0 = arith.constant 0 : index
    %c0_0 = arith.constant 0 : index
    %1 = vector.load %arg4[%c0, %c0_0] : memref<1x25xf32, #tpu.memory_space<vmem>>, vector<1x25xf32>
    %2 = vector.broadcast %1 : vector<1x25xf32> to vector<8x25xf32>
    %3 = arith.addf %0, %2 : vector<8x25xf32>
    %c0_1 = arith.constant 0 : index
    %c0_2 = arith.constant 0 : index
    %c0_3 = arith.constant 0 : index
    %4 = vector.load %arg2[%c0_1, %c0_2, %c0_3] : memref<1x10x25xbf16, #tpu.memory_space<vmem>>, vector<1x8x25xbf16>
    %5 = vector.shape_cast %4 : vector<1x8x25xbf16> to vector<8x25xbf16>
    %6 = arith.extf %5 : vector<8x25xbf16> to vector<8x25xf32>
    %c0_4 = arith.constant 0 : index
    %c0_5 = arith.constant 0 : index
    %7 = vector.load %arg3[%c0_4, %c0_5] : memref<3x25xf32, #tpu.memory_space<vmem>>, vector<1x25xf32>
    %8 = vector.broadcast %7 : vector<1x25xf32> to vector<8x25xf32>
    %9 = arith.mulf %6, %8 : vector<8x25xf32>
    %10 = arith.addf %3, %9 : vector<8x25xf32>
    %c0_6 = arith.constant 0 : index
    %c1 = arith.constant 1 : index
    %c0_7 = arith.constant 0 : index
    %11 = vector.load %arg2[%c0_6, %c1, %c0_7] : memref<1x10x25xbf16, #tpu.memory_space<vmem>>, vector<1x8x25xbf16>
    %12 = vector.shape_cast %11 : vector<1x8x25xbf16> to vector<8x25xbf16>
    %13 = arith.extf %12 : vector<8x25xbf16> to vector<8x25xf32>
    %c1_8 = arith.constant 1 : index
    %c0_9 = arith.constant 0 : index
    %14 = vector.load %arg3[%c1_8, %c0_9] : memref<3x25xf32, #tpu.memory_space<vmem>>, vector<1x25xf32>
    %15 = vector.broadcast %14 : vector<1x25xf32> to vector<8x25xf32>
    %16 = arith.mulf %13, %15 : vector<8x25xf32>
    %17 = arith.addf %10, %16 : vector<8x25xf32>
    %c0_10 = arith.constant 0 : index
    %c2 = arith.constant 2 : index
    %c0_11 = arith.constant 0 : index
    %18 = vector.load %arg2[%c0_10, %c2, %c0_11] : memref<1x10x25xbf16, #tpu.memory_space<vmem>>, vector<1x8x25xbf16>
    %19 = vector.shape_cast %18 : vector<1x8x25xbf16> to vector<8x25xbf16>
    %20 = arith.extf %19 : vector<8x25xbf16> to vector<8x25xf32>
    %c2_12 = arith.constant 2 : index
    %c0_13 = arith.constant 0 : index
    %21 = vector.load %arg3[%c2_12, %c0_13] : memref<3x25xf32, #tpu.memory_space<vmem>>, vector<1x25xf32>
    %22 = vector.broadcast %21 : vector<1x25xf32> to vector<8x25xf32>
    %23 = arith.mulf %20, %22 : vector<8x25xf32>
    %24 = arith.addf %17, %23 : vector<8x25xf32>
    %25 = arith.truncf %24 : vector<8x25xf32> to vector<8x25xbf16>
    %c0_14 = arith.constant 0 : index
    %c0_15 = arith.constant 0 : index
    %c0_16 = arith.constant 0 : index
    %26 = vector.load %arg5[%c0_14, %c0_15, %c0_16] : memref<1x8x25xbf16, #tpu.memory_space<vmem>>, vector<1x8x25xbf16>
    %27 = vector.shape_cast %26 : vector<1x8x25xbf16> to vector<8x25xbf16>
    %28 = vector.shape_cast %25 : vector<8x25xbf16> to vector<1x8x25xbf16>
    tpu.vector_store %arg5[%c0_14, %c0_15, %c0_16], %28 {strides = array<i32>} : memref<1x8x25xbf16, #tpu.memory_space<vmem>>, vector<1x8x25xbf16>,
    return
  }
  func.func @transform_0(%arg0: i32, %arg1: i32) -> (i32, i32, i32) {
    %c0_i32 = arith.constant 0 : i32
    %c0_i32_0 = arith.constant 0 : i32
    return %arg0, %c0_i32, %arg1 : i32, i32, i32
  }
  func.func @transform_1(%arg0: i32, %arg1: i32) -> (i32, i32) {
    %c0_i32 = arith.constant 0 : i32
    %c0_i32_0 = arith.constant 0 : i32
    return %c0_i32, %arg1 : i32, i32
  }
  func.func @transform_2(%arg0: i32, %arg1: i32) -> (i32, i32) {
    %c0_i32 = arith.constant 0 : i32
    %c0_i32_0 = arith.constant 0 : i32
    return %c0_i32, %arg1 : i32, i32
  }
  func.func @transform_3(%arg0: i32, %arg1: i32) -> (i32, i32, i32) {
    %c0_i32 = arith.constant 0 : i32
    %c0_i32_0 = arith.constant 0 : i32
    return %arg0, %c0_i32, %arg1 : i32, i32, i32
  }
}

module attributes {stable_mosaic.version = 11 : i64} {
  func.func @_grouped_mlp_kernel(%arg0: i32, %arg1: memref<1x18x16xbf16, #tpu.memory_space<vmem>>, %arg2: memref<1x9x18xbf16, #tpu.memory_space<vmem>>, %arg3: memref<1x9x1xf32, #tpu.memory_space<vmem>>, %arg4: memref<1x9x1xf32, #tpu.memory_space<vmem>>, %arg5: memref<1x3x9xf32, #tpu.memory_space<vmem>>, %arg6: memref<1x3x1xf32, #tpu.memory_space<vmem>>, %arg7: memref<1x3x16xf32, #tpu.memory_space<vmem>>) attributes {dimension_semantics = [#tpu.dimension_semantics<parallel>], iteration_bounds = array<i64: 4>, scalar_prefetch = 0 : i64, scratch_operands = 0 : i64, tpu.core_type = #tpu.core_type<tc>, window_params = [{transform_indices = @transform_0, window_bounds = array<i64: 1, 18, 16>}, {transform_indices = @transform_1, window_bounds = array<i64: 1, 9, 18>}, {transform_indices = @transform_2, window_bounds = array<i64: 1, 9, 1>}, {transform_indices = @transform_3, window_bounds = array<i64: 1, 9, 1>}, {transform_indices = @transform_4, window_bounds = array<i64: 1, 3, 9>}, {transform_indices = @transform_5, window_bounds = array<i64: 1, 3, 1>}, {transform_indices = @transform_6, window_bounds = array<i64: 1, 3, 16>}]} {
    %c0 = arith.constant 0 : index
    %c0_0 = arith.constant 0 : index
    %c0_1 = arith.constant 0 : index
    %0 = vector.load %arg2[%c0, %c0_0, %c0_1] : memref<1x9x18xbf16, #tpu.memory_space<vmem>>, vector<1x9x18xbf16>
    %1 = vector.shape_cast %0 : vector<1x9x18xbf16> to vector<9x18xbf16>
    %c0_2 = arith.constant 0 : index
    %c0_3 = arith.constant 0 : index
    %c0_4 = arith.constant 0 : index
    %2 = vector.load %arg1[%c0_2, %c0_3, %c0_4] : memref<1x18x16xbf16, #tpu.memory_space<vmem>>, vector<1x18x16xbf16>
    %3 = vector.shape_cast %2 : vector<1x18x16xbf16> to vector<18x16xbf16>
    %cst = arith.constant dense<0.000000e+00> : vector<9x16xf32>
    %4 = tpu.matmul %1, %3, %cst {dimension_numbers = #tpu.dot_dimension_numbers<[1], [0], [0], [1], [0, 0, 1, 1], [], []>} : vector<9x18xbf16>, vector<18x16xbf16>, vector<9x16xf32> -> vector<9x16xf32>
    %c0_5 = arith.constant 0 : index
    %c0_6 = arith.constant 0 : index
    %c0_7 = arith.constant 0 : index
    %5 = vector.load %arg3[%c0_5, %c0_6, %c0_7] : memref<1x9x1xf32, #tpu.memory_space<vmem>>, vector<1x9x1xf32>
    %6 = vector.shape_cast %5 : vector<1x9x1xf32> to vector<9x1xf32>
    %7 = vector.broadcast %6 : vector<9x1xf32> to vector<9x16xf32>
    %8 = arith.mulf %4, %7 : vector<9x16xf32>
    %c0_8 = arith.constant 0 : index
    %c0_9 = arith.constant 0 : index
    %c0_10 = arith.constant 0 : index
    %9 = vector.load %arg4[%c0_8, %c0_9, %c0_10] : memref<1x9x1xf32, #tpu.memory_space<vmem>>, vector<1x9x1xf32>
    %10 = vector.shape_cast %9 : vector<1x9x1xf32> to vector<9x1xf32>
    %11 = vector.broadcast %10 : vector<9x1xf32> to vector<9x16xf32>
    %12 = arith.addf %8, %11 : vector<9x16xf32>
    %cst_11 = arith.constant 0.000000e+00 : f32
    %13 = vector.broadcast %cst_11 : f32 to vector<9x16xf32>
    %14 = arith.maximumf %12, %13 : vector<9x16xf32>
    %c0_12 = arith.constant 0 : index
    %c0_13 = arith.constant 0 : index
    %c0_14 = arith.constant 0 : index
    %15 = vector.load %arg5[%c0_12, %c0_13, %c0_14] : memref<1x3x9xf32, #tpu.memory_space<vmem>>, vector<1x3x9xf32>
    %16 = vector.shape_cast %15 : vector<1x3x9xf32> to vector<3x9xf32>
    %cst_15 = arith.constant dense<0.000000e+00> : vector<3x16xf32>
    %17 = tpu.matmul %16, %14, %cst_15 {dimension_numbers = #tpu.dot_dimension_numbers<[1], [0], [0], [1], [0, 0, 1, 1], [], []>} : vector<3x9xf32>, vector<9x16xf32>, vector<3x16xf32> -> vector<3x16xf32>
    %c0_16 = arith.constant 0 : index
    %c0_17 = arith.constant 0 : index
    %c0_18 = arith.constant 0 : index
    %18 = vector.load %arg6[%c0_16, %c0_17, %c0_18] : memref<1x3x1xf32, #tpu.memory_space<vmem>>, vector<1x3x1xf32>
    %19 = vector.shape_cast %18 : vector<1x3x1xf32> to vector<3x1xf32>
    %20 = vector.broadcast %19 : vector<3x1xf32> to vector<3x16xf32>
    %21 = arith.addf %17, %20 : vector<3x16xf32>
    %c0_19 = arith.constant 0 : index
    %c0_20 = arith.constant 0 : index
    %c0_21 = arith.constant 0 : index
    %22 = vector.load %arg7[%c0_19, %c0_20, %c0_21] : memref<1x3x16xf32, #tpu.memory_space<vmem>>, vector<1x3x16xf32>
    %23 = vector.shape_cast %22 : vector<1x3x16xf32> to vector<3x16xf32>
    %24 = vector.shape_cast %21 : vector<3x16xf32> to vector<1x3x16xf32>
    tpu.vector_store %arg7[%c0_19, %c0_20, %c0_21], %24 {strides = array<i32>} : memref<1x3x16xf32, #tpu.memory_space<vmem>>, vector<1x3x16xf32>,
    return
  }
  func.func @transform_0(%arg0: i32) -> (i32, i32, i32) {
    %c0_i32 = arith.constant 0 : i32
    %c0_i32_0 = arith.constant 0 : i32
    %c0_i32_1 = arith.constant 0 : i32
    return %arg0, %c0_i32, %c0_i32_0 : i32, i32, i32
  }
  func.func @transform_1(%arg0: i32) -> (i32, i32, i32) {
    %c0_i32 = arith.constant 0 : i32
    %c0_i32_0 = arith.constant 0 : i32
    %c0_i32_1 = arith.constant 0 : i32
    return %arg0, %c0_i32, %c0_i32_0 : i32, i32, i32
  }
  func.func @transform_2(%arg0: i32) -> (i32, i32, i32) {
    %c0_i32 = arith.constant 0 : i32
    %c0_i32_0 = arith.constant 0 : i32
    %c0_i32_1 = arith.constant 0 : i32
    return %arg0, %c0_i32, %c0_i32_0 : i32, i32, i32
  }
  func.func @transform_3(%arg0: i32) -> (i32, i32, i32) {
    %c0_i32 = arith.constant 0 : i32
    %c0_i32_0 = arith.constant 0 : i32
    %c0_i32_1 = arith.constant 0 : i32
    return %arg0, %c0_i32, %c0_i32_0 : i32, i32, i32
  }
  func.func @transform_4(%arg0: i32) -> (i32, i32, i32) {
    %c0_i32 = arith.constant 0 : i32
    %c0_i32_0 = arith.constant 0 : i32
    %c0_i32_1 = arith.constant 0 : i32
    return %arg0, %c0_i32, %c0_i32_0 : i32, i32, i32
  }
  func.func @transform_5(%arg0: i32) -> (i32, i32, i32) {
    %c0_i32 = arith.constant 0 : i32
    %c0_i32_0 = arith.constant 0 : i32
    %c0_i32_1 = arith.constant 0 : i32
    return %arg0, %c0_i32, %c0_i32_0 : i32, i32, i32
  }
  func.func @transform_6(%arg0: i32) -> (i32, i32, i32) {
    %c0_i32 = arith.constant 0 : i32
    %c0_i32_0 = arith.constant 0 : i32
    %c0_i32_1 = arith.constant 0 : i32
    return %arg0, %c0_i32, %c0_i32_0 : i32, i32, i32
  }
}

module attributes {stable_mosaic.version = 11 : i64} {
  func.func @_dwconv2d_kernel(%arg0: i32, %arg1: i32, %arg2: memref<1x7x7x8xbf16, #tpu.memory_space<vmem>>, %arg3: memref<9x1x8xf32, #tpu.memory_space<vmem>>, %arg4: memref<1x8xf32, #tpu.memory_space<vmem>>, %arg5: memref<1x8xf32, #tpu.memory_space<vmem>>, %arg6: memref<1x5x5x8xbf16, #tpu.memory_space<vmem>>) attributes {dimension_semantics = [#tpu.dimension_semantics<parallel>, #tpu.dimension_semantics<parallel>], iteration_bounds = array<i64: 2, 1>, scalar_prefetch = 0 : i64, scratch_operands = 0 : i64, tpu.core_type = #tpu.core_type<tc>, window_params = [{transform_indices = @transform_0, window_bounds = array<i64: 1, 7, 7, 8>}, {transform_indices = @transform_1, window_bounds = array<i64: 9, 1, 8>}, {transform_indices = @transform_2, window_bounds = array<i64: 1, 8>}, {transform_indices = @transform_3, window_bounds = array<i64: 1, 8>}, {transform_indices = @transform_4, window_bounds = array<i64: 1, 5, 5, 8>}]} {
    %cst = arith.constant 0.000000e+00 : f32
    %0 = vector.broadcast %cst : f32 to vector<5x5x8xf32>
    %c0 = arith.constant 0 : index
    %c0_0 = arith.constant 0 : index
    %c0_1 = arith.constant 0 : index
    %c0_2 = arith.constant 0 : index
    %1 = vector.load %arg2[%c0, %c0_0, %c0_1, %c0_2] : memref<1x7x7x8xbf16, #tpu.memory_space<vmem>>, vector<1x5x5x8xbf16>
    %2 = vector.shape_cast %1 : vector<1x5x5x8xbf16> to vector<5x5x8xbf16>
    %3 = arith.extf %2 : vector<5x5x8xbf16> to vector<5x5x8xf32>
    %c0_3 = arith.constant 0 : index
    %c0_4 = arith.constant 0 : index
    %c0_5 = arith.constant 0 : index
    %4 = vector.load %arg3[%c0_3, %c0_4, %c0_5] : memref<9x1x8xf32, #tpu.memory_space<vmem>>, vector<1x1x8xf32>
    %5 = vector.shape_cast %4 : vector<1x1x8xf32> to vector<1x8xf32>
    %6 = vector.shape_cast %5 : vector<1x8xf32> to vector<1x1x8xf32>
    %7 = vector.broadcast %6 : vector<1x1x8xf32> to vector<5x5x8xf32>
    %8 = arith.mulf %3, %7 : vector<5x5x8xf32>
    %9 = arith.addf %0, %8 : vector<5x5x8xf32>
    %c0_6 = arith.constant 0 : index
    %c0_7 = arith.constant 0 : index
    %c1 = arith.constant 1 : index
    %c0_8 = arith.constant 0 : index
    %10 = vector.load %arg2[%c0_6, %c0_7, %c1, %c0_8] : memref<1x7x7x8xbf16, #tpu.memory_space<vmem>>, vector<1x5x5x8xbf16>
    %11 = vector.shape_cast %10 : vector<1x5x5x8xbf16> to vector<5x5x8xbf16>
    %12 = arith.extf %11 : vector<5x5x8xbf16> to vector<5x5x8xf32>
    %c1_9 = arith.constant 1 : index
    %c0_10 = arith.constant 0 : index
    %c0_11 = arith.constant 0 : index
    %13 = vector.load %arg3[%c1_9, %c0_10, %c0_11] : memref<9x1x8xf32, #tpu.memory_space<vmem>>, vector<1x1x8xf32>
    %14 = vector.shape_cast %13 : vector<1x1x8xf32> to vector<1x8xf32>
    %15 = vector.shape_cast %14 : vector<1x8xf32> to vector<1x1x8xf32>
    %16 = vector.broadcast %15 : vector<1x1x8xf32> to vector<5x5x8xf32>
    %17 = arith.mulf %12, %16 : vector<5x5x8xf32>
    %18 = arith.addf %9, %17 : vector<5x5x8xf32>
    %c0_12 = arith.constant 0 : index
    %c0_13 = arith.constant 0 : index
    %c2 = arith.constant 2 : index
    %c0_14 = arith.constant 0 : index
    %19 = vector.load %arg2[%c0_12, %c0_13, %c2, %c0_14] : memref<1x7x7x8xbf16, #tpu.memory_space<vmem>>, vector<1x5x5x8xbf16>
    %20 = vector.shape_cast %19 : vector<1x5x5x8xbf16> to vector<5x5x8xbf16>
    %21 = arith.extf %20 : vector<5x5x8xbf16> to vector<5x5x8xf32>
    %c2_15 = arith.constant 2 : index
    %c0_16 = arith.constant 0 : index
    %c0_17 = arith.constant 0 : index
    %22 = vector.load %arg3[%c2_15, %c0_16, %c0_17] : memref<9x1x8xf32, #tpu.memory_space<vmem>>, vector<1x1x8xf32>
    %23 = vector.shape_cast %22 : vector<1x1x8xf32> to vector<1x8xf32>
    %24 = vector.shape_cast %23 : vector<1x8xf32> to vector<1x1x8xf32>
    %25 = vector.broadcast %24 : vector<1x1x8xf32> to vector<5x5x8xf32>
    %26 = arith.mulf %21, %25 : vector<5x5x8xf32>
    %27 = arith.addf %18, %26 : vector<5x5x8xf32>
    %c0_18 = arith.constant 0 : index
    %c1_19 = arith.constant 1 : index
    %c0_20 = arith.constant 0 : index
    %c0_21 = arith.constant 0 : index
    %28 = vector.load %arg2[%c0_18, %c1_19, %c0_20, %c0_21] : memref<1x7x7x8xbf16, #tpu.memory_space<vmem>>, vector<1x5x5x8xbf16>
    %29 = vector.shape_cast %28 : vector<1x5x5x8xbf16> to vector<5x5x8xbf16>
    %30 = arith.extf %29 : vector<5x5x8xbf16> to vector<5x5x8xf32>
    %c3 = arith.constant 3 : index
    %c0_22 = arith.constant 0 : index
    %c0_23 = arith.constant 0 : index
    %31 = vector.load %arg3[%c3, %c0_22, %c0_23] : memref<9x1x8xf32, #tpu.memory_space<vmem>>, vector<1x1x8xf32>
    %32 = vector.shape_cast %31 : vector<1x1x8xf32> to vector<1x8xf32>
    %33 = vector.shape_cast %32 : vector<1x8xf32> to vector<1x1x8xf32>
    %34 = vector.broadcast %33 : vector<1x1x8xf32> to vector<5x5x8xf32>
    %35 = arith.mulf %30, %34 : vector<5x5x8xf32>
    %36 = arith.addf %27, %35 : vector<5x5x8xf32>
    %c0_24 = arith.constant 0 : index
    %c1_25 = arith.constant 1 : index
    %c1_26 = arith.constant 1 : index
    %c0_27 = arith.constant 0 : index
    %37 = vector.load %arg2[%c0_24, %c1_25, %c1_26, %c0_27] : memref<1x7x7x8xbf16, #tpu.memory_space<vmem>>, vector<1x5x5x8xbf16>
    %38 = vector.shape_cast %37 : vector<1x5x5x8xbf16> to vector<5x5x8xbf16>
    %39 = arith.extf %38 : vector<5x5x8xbf16> to vector<5x5x8xf32>
    %c4 = arith.constant 4 : index
    %c0_28 = arith.constant 0 : index
    %c0_29 = arith.constant 0 : index
    %40 = vector.load %arg3[%c4, %c0_28, %c0_29] : memref<9x1x8xf32, #tpu.memory_space<vmem>>, vector<1x1x8xf32>
    %41 = vector.shape_cast %40 : vector<1x1x8xf32> to vector<1x8xf32>
    %42 = vector.shape_cast %41 : vector<1x8xf32> to vector<1x1x8xf32>
    %43 = vector.broadcast %42 : vector<1x1x8xf32> to vector<5x5x8xf32>
    %44 = arith.mulf %39, %43 : vector<5x5x8xf32>
    %45 = arith.addf %36, %44 : vector<5x5x8xf32>
    %c0_30 = arith.constant 0 : index
    %c1_31 = arith.constant 1 : index
    %c2_32 = arith.constant 2 : index
    %c0_33 = arith.constant 0 : index
    %46 = vector.load %arg2[%c0_30, %c1_31, %c2_32, %c0_33] : memref<1x7x7x8xbf16, #tpu.memory_space<vmem>>, vector<1x5x5x8xbf16>
    %47 = vector.shape_cast %46 : vector<1x5x5x8xbf16> to vector<5x5x8xbf16>
    %48 = arith.extf %47 : vector<5x5x8xbf16> to vector<5x5x8xf32>
    %c5 = arith.constant 5 : index
    %c0_34 = arith.constant 0 : index
    %c0_35 = arith.constant 0 : index
    %49 = vector.load %arg3[%c5, %c0_34, %c0_35] : memref<9x1x8xf32, #tpu.memory_space<vmem>>, vector<1x1x8xf32>
    %50 = vector.shape_cast %49 : vector<1x1x8xf32> to vector<1x8xf32>
    %51 = vector.shape_cast %50 : vector<1x8xf32> to vector<1x1x8xf32>
    %52 = vector.broadcast %51 : vector<1x1x8xf32> to vector<5x5x8xf32>
    %53 = arith.mulf %48, %52 : vector<5x5x8xf32>
    %54 = arith.addf %45, %53 : vector<5x5x8xf32>
    %c0_36 = arith.constant 0 : index
    %c2_37 = arith.constant 2 : index
    %c0_38 = arith.constant 0 : index
    %c0_39 = arith.constant 0 : index
    %55 = vector.load %arg2[%c0_36, %c2_37, %c0_38, %c0_39] : memref<1x7x7x8xbf16, #tpu.memory_space<vmem>>, vector<1x5x5x8xbf16>
    %56 = vector.shape_cast %55 : vector<1x5x5x8xbf16> to vector<5x5x8xbf16>
    %57 = arith.extf %56 : vector<5x5x8xbf16> to vector<5x5x8xf32>
    %c6 = arith.constant 6 : index
    %c0_40 = arith.constant 0 : index
    %c0_41 = arith.constant 0 : index
    %58 = vector.load %arg3[%c6, %c0_40, %c0_41] : memref<9x1x8xf32, #tpu.memory_space<vmem>>, vector<1x1x8xf32>
    %59 = vector.shape_cast %58 : vector<1x1x8xf32> to vector<1x8xf32>
    %60 = vector.shape_cast %59 : vector<1x8xf32> to vector<1x1x8xf32>
    %61 = vector.broadcast %60 : vector<1x1x8xf32> to vector<5x5x8xf32>
    %62 = arith.mulf %57, %61 : vector<5x5x8xf32>
    %63 = arith.addf %54, %62 : vector<5x5x8xf32>
    %c0_42 = arith.constant 0 : index
    %c2_43 = arith.constant 2 : index
    %c1_44 = arith.constant 1 : index
    %c0_45 = arith.constant 0 : index
    %64 = vector.load %arg2[%c0_42, %c2_43, %c1_44, %c0_45] : memref<1x7x7x8xbf16, #tpu.memory_space<vmem>>, vector<1x5x5x8xbf16>
    %65 = vector.shape_cast %64 : vector<1x5x5x8xbf16> to vector<5x5x8xbf16>
    %66 = arith.extf %65 : vector<5x5x8xbf16> to vector<5x5x8xf32>
    %c7 = arith.constant 7 : index
    %c0_46 = arith.constant 0 : index
    %c0_47 = arith.constant 0 : index
    %67 = vector.load %arg3[%c7, %c0_46, %c0_47] : memref<9x1x8xf32, #tpu.memory_space<vmem>>, vector<1x1x8xf32>
    %68 = vector.shape_cast %67 : vector<1x1x8xf32> to vector<1x8xf32>
    %69 = vector.shape_cast %68 : vector<1x8xf32> to vector<1x1x8xf32>
    %70 = vector.broadcast %69 : vector<1x1x8xf32> to vector<5x5x8xf32>
    %71 = arith.mulf %66, %70 : vector<5x5x8xf32>
    %72 = arith.addf %63, %71 : vector<5x5x8xf32>
    %c0_48 = arith.constant 0 : index
    %c2_49 = arith.constant 2 : index
    %c2_50 = arith.constant 2 : index
    %c0_51 = arith.constant 0 : index
    %73 = vector.load %arg2[%c0_48, %c2_49, %c2_50, %c0_51] : memref<1x7x7x8xbf16, #tpu.memory_space<vmem>>, vector<1x5x5x8xbf16>
    %74 = vector.shape_cast %73 : vector<1x5x5x8xbf16> to vector<5x5x8xbf16>
    %75 = arith.extf %74 : vector<5x5x8xbf16> to vector<5x5x8xf32>
    %c8 = arith.constant 8 : index
    %c0_52 = arith.constant 0 : index
    %c0_53 = arith.constant 0 : index
    %76 = vector.load %arg3[%c8, %c0_52, %c0_53] : memref<9x1x8xf32, #tpu.memory_space<vmem>>, vector<1x1x8xf32>
    %77 = vector.shape_cast %76 : vector<1x1x8xf32> to vector<1x8xf32>
    %78 = vector.shape_cast %77 : vector<1x8xf32> to vector<1x1x8xf32>
    %79 = vector.broadcast %78 : vector<1x1x8xf32> to vector<5x5x8xf32>
    %80 = arith.mulf %75, %79 : vector<5x5x8xf32>
    %81 = arith.addf %72, %80 : vector<5x5x8xf32>
    %c0_54 = arith.constant 0 : index
    %c0_55 = arith.constant 0 : index
    %82 = vector.load %arg4[%c0_54, %c0_55] : memref<1x8xf32, #tpu.memory_space<vmem>>, vector<1x8xf32>
    %83 = vector.shape_cast %82 : vector<1x8xf32> to vector<1x1x8xf32>
    %84 = vector.broadcast %83 : vector<1x1x8xf32> to vector<5x5x8xf32>
    %85 = arith.mulf %81, %84 : vector<5x5x8xf32>
    %c0_56 = arith.constant 0 : index
    %c0_57 = arith.constant 0 : index
    %86 = vector.load %arg5[%c0_56, %c0_57] : memref<1x8xf32, #tpu.memory_space<vmem>>, vector<1x8xf32>
    %87 = vector.shape_cast %86 : vector<1x8xf32> to vector<1x1x8xf32>
    %88 = vector.broadcast %87 : vector<1x1x8xf32> to vector<5x5x8xf32>
    %89 = arith.addf %85, %88 : vector<5x5x8xf32>
    %90 = arith.truncf %89 : vector<5x5x8xf32> to vector<5x5x8xbf16>
    %c0_58 = arith.constant 0 : index
    %c0_59 = arith.constant 0 : index
    %c0_60 = arith.constant 0 : index
    %c0_61 = arith.constant 0 : index
    %91 = vector.load %arg6[%c0_58, %c0_59, %c0_60, %c0_61] : memref<1x5x5x8xbf16, #tpu.memory_space<vmem>>, vector<1x5x5x8xbf16>
    %92 = vector.shape_cast %91 : vector<1x5x5x8xbf16> to vector<5x5x8xbf16>
    %93 = vector.shape_cast %90 : vector<5x5x8xbf16> to vector<1x5x5x8xbf16>
    tpu.vector_store %arg6[%c0_58, %c0_59, %c0_60, %c0_61], %93 {strides = array<i32>} : memref<1x5x5x8xbf16, #tpu.memory_space<vmem>>, vector<1x5x5x8xbf16>,
    return
  }
  func.func @transform_0(%arg0: i32, %arg1: i32) -> (i32, i32, i32, i32) {
    %c0_i32 = arith.constant 0 : i32
    %c0_i32_0 = arith.constant 0 : i32
    %c0_i32_1 = arith.constant 0 : i32
    return %arg0, %c0_i32, %c0_i32_0, %arg1 : i32, i32, i32, i32
  }
  func.func @transform_1(%arg0: i32, %arg1: i32) -> (i32, i32, i32) {
    %c0_i32 = arith.constant 0 : i32
    %c0_i32_0 = arith.constant 0 : i32
    %c0_i32_1 = arith.constant 0 : i32
    return %c0_i32, %c0_i32_0, %arg1 : i32, i32, i32
  }
  func.func @transform_2(%arg0: i32, %arg1: i32) -> (i32, i32) {
    %c0_i32 = arith.constant 0 : i32
    %c0_i32_0 = arith.constant 0 : i32
    return %c0_i32, %arg1 : i32, i32
  }
  func.func @transform_3(%arg0: i32, %arg1: i32) -> (i32, i32) {
    %c0_i32 = arith.constant 0 : i32
    %c0_i32_0 = arith.constant 0 : i32
    return %c0_i32, %arg1 : i32, i32
  }
  func.func @transform_4(%arg0: i32, %arg1: i32) -> (i32, i32, i32, i32) {
    %c0_i32 = arith.constant 0 : i32
    %c0_i32_0 = arith.constant 0 : i32
    %c0_i32_1 = arith.constant 0 : i32
    return %arg0, %c0_i32, %c0_i32_0, %arg1 : i32, i32, i32, i32
  }
}

module attributes {stable_mosaic.version = 11 : i64} {
  func.func @_semca_tail_kernel(%arg0: i32, %arg1: memref<1x24x2x2xf32, #tpu.memory_space<vmem>>, %arg2: memref<1x10x6x6xbf16, #tpu.memory_space<vmem>>, %arg3: memref<1x8x6x6xbf16, #tpu.memory_space<vmem>>, %arg4: memref<1x8x6x6xbf16, #tpu.memory_space<vmem>>) attributes {dimension_semantics = [#tpu.dimension_semantics<parallel>], iteration_bounds = array<i64: 2>, scalar_prefetch = 0 : i64, scratch_operands = 0 : i64, tpu.core_type = #tpu.core_type<tc>, window_params = [{transform_indices = @transform_0, window_bounds = array<i64: 1, 24, 2, 2>}, {transform_indices = @transform_1, window_bounds = array<i64: 1, 10, 6, 6>}, {transform_indices = @transform_2, window_bounds = array<i64: 1, 8, 6, 6>}, {transform_indices = @transform_3, window_bounds = array<i64: 1, 8, 6, 6>}]} {
    %c0 = arith.constant 0 : index
    %c0_0 = arith.constant 0 : index
    %c0_1 = arith.constant 0 : index
    %c0_2 = arith.constant 0 : index
    %0 = vector.load %arg1[%c0, %c0_0, %c0_1, %c0_2] : memref<1x24x2x2xf32, #tpu.memory_space<vmem>>, vector<1x8x2x2xf32>
    %1 = vector.shape_cast %0 : vector<1x8x2x2xf32> to vector<8x2x2xf32>
    %c0_3 = arith.constant 0 : index
    %c8 = arith.constant 8 : index
    %c0_4 = arith.constant 0 : index
    %c0_5 = arith.constant 0 : index
    %2 = vector.load %arg1[%c0_3, %c8, %c0_4, %c0_5] : memref<1x24x2x2xf32, #tpu.memory_space<vmem>>, vector<1x8x2x2xf32>
    %3 = vector.shape_cast %2 : vector<1x8x2x2xf32> to vector<8x2x2xf32>
    %c0_6 = arith.constant 0 : index
    %c16 = arith.constant 16 : index
    %c0_7 = arith.constant 0 : index
    %c0_8 = arith.constant 0 : index
    %4 = vector.load %arg1[%c0_6, %c16, %c0_7, %c0_8] : memref<1x24x2x2xf32, #tpu.memory_space<vmem>>, vector<1x8x2x2xf32>
    %5 = vector.shape_cast %4 : vector<1x8x2x2xf32> to vector<8x2x2xf32>
    %6 = arith.maximumf %1, %3 : vector<8x2x2xf32>
    %7 = arith.maximumf %6, %5 : vector<8x2x2xf32>
    %8 = arith.subf %1, %7 : vector<8x2x2xf32>
    %9 = math.exp %8 : vector<8x2x2xf32>
    %10 = arith.subf %3, %7 : vector<8x2x2xf32>
    %11 = math.exp %10 : vector<8x2x2xf32>
    %12 = arith.subf %5, %7 : vector<8x2x2xf32>
    %13 = math.exp %12 : vector<8x2x2xf32>
    %14 = arith.addf %9, %11 : vector<8x2x2xf32>
    %15 = arith.addf %14, %13 : vector<8x2x2xf32>
    %16 = tpu.reciprocal %15 {approx = true} : vector<8x2x2xf32> -> vector<8x2x2xf32>
    %cst = arith.constant 0.000000e+00 : f32
    %17 = vector.broadcast %cst : f32 to vector<8x6x6xf32>
    %18 = arith.mulf %9, %16 : vector<8x2x2xf32>
    %19 = tpu.concatenate %18, %18, %18 in 2 : vector<8x2x2xf32>, vector<8x2x2xf32>, vector<8x2x2xf32> -> vector<8x2x6xf32>
    %20 = tpu.concatenate %19, %19, %19 in 1 : vector<8x2x6xf32>, vector<8x2x6xf32>, vector<8x2x6xf32> -> vector<8x6x6xf32>
    %c0_9 = arith.constant 0 : index
    %c0_10 = arith.constant 0 : index
    %c0_11 = arith.constant 0 : index
    %c0_12 = arith.constant 0 : index
    %21 = vector.load %arg2[%c0_9, %c0_10, %c0_11, %c0_12] : memref<1x10x6x6xbf16, #tpu.memory_space<vmem>>, vector<1x8x6x6xbf16>
    %22 = vector.shape_cast %21 : vector<1x8x6x6xbf16> to vector<8x6x6xbf16>
    %23 = arith.extf %22 : vector<8x6x6xbf16> to vector<8x6x6xf32>
    %24 = arith.mulf %20, %23 : vector<8x6x6xf32>
    %25 = arith.addf %17, %24 : vector<8x6x6xf32>
    %26 = arith.mulf %11, %16 : vector<8x2x2xf32>
    %27 = tpu.concatenate %26, %26, %26 in 2 : vector<8x2x2xf32>, vector<8x2x2xf32>, vector<8x2x2xf32> -> vector<8x2x6xf32>
    %28 = tpu.concatenate %27, %27, %27 in 1 : vector<8x2x6xf32>, vector<8x2x6xf32>, vector<8x2x6xf32> -> vector<8x6x6xf32>
    %c0_13 = arith.constant 0 : index
    %c1 = arith.constant 1 : index
    %c0_14 = arith.constant 0 : index
    %c0_15 = arith.constant 0 : index
    %29 = vector.load %arg2[%c0_13, %c1, %c0_14, %c0_15] : memref<1x10x6x6xbf16, #tpu.memory_space<vmem>>, vector<1x8x6x6xbf16>
    %30 = vector.shape_cast %29 : vector<1x8x6x6xbf16> to vector<8x6x6xbf16>
    %31 = arith.extf %30 : vector<8x6x6xbf16> to vector<8x6x6xf32>
    %32 = arith.mulf %28, %31 : vector<8x6x6xf32>
    %33 = arith.addf %25, %32 : vector<8x6x6xf32>
    %34 = arith.mulf %13, %16 : vector<8x2x2xf32>
    %35 = tpu.concatenate %34, %34, %34 in 2 : vector<8x2x2xf32>, vector<8x2x2xf32>, vector<8x2x2xf32> -> vector<8x2x6xf32>
    %36 = tpu.concatenate %35, %35, %35 in 1 : vector<8x2x6xf32>, vector<8x2x6xf32>, vector<8x2x6xf32> -> vector<8x6x6xf32>
    %c0_16 = arith.constant 0 : index
    %c2 = arith.constant 2 : index
    %c0_17 = arith.constant 0 : index
    %c0_18 = arith.constant 0 : index
    %37 = vector.load %arg2[%c0_16, %c2, %c0_17, %c0_18] : memref<1x10x6x6xbf16, #tpu.memory_space<vmem>>, vector<1x8x6x6xbf16>
    %38 = vector.shape_cast %37 : vector<1x8x6x6xbf16> to vector<8x6x6xbf16>
    %39 = arith.extf %38 : vector<8x6x6xbf16> to vector<8x6x6xf32>
    %40 = arith.mulf %36, %39 : vector<8x6x6xf32>
    %41 = arith.addf %33, %40 : vector<8x6x6xf32>
    %c0_19 = arith.constant 0 : index
    %c0_20 = arith.constant 0 : index
    %c0_21 = arith.constant 0 : index
    %c0_22 = arith.constant 0 : index
    %42 = vector.load %arg3[%c0_19, %c0_20, %c0_21, %c0_22] : memref<1x8x6x6xbf16, #tpu.memory_space<vmem>>, vector<1x8x6x6xbf16>
    %43 = vector.shape_cast %42 : vector<1x8x6x6xbf16> to vector<8x6x6xbf16>
    %44 = arith.extf %43 : vector<8x6x6xbf16> to vector<8x6x6xf32>
    %45 = arith.addf %44, %41 : vector<8x6x6xf32>
    %46 = arith.truncf %45 : vector<8x6x6xf32> to vector<8x6x6xbf16>
    %c0_23 = arith.constant 0 : index
    %c0_24 = arith.constant 0 : index
    %c0_25 = arith.constant 0 : index
    %c0_26 = arith.constant 0 : index
    %47 = vector.load %arg4[%c0_23, %c0_24, %c0_25, %c0_26] : memref<1x8x6x6xbf16, #tpu.memory_space<vmem>>, vector<1x8x6x6xbf16>
    %48 = vector.shape_cast %47 : vector<1x8x6x6xbf16> to vector<8x6x6xbf16>
    %49 = vector.shape_cast %46 : vector<8x6x6xbf16> to vector<1x8x6x6xbf16>
    tpu.vector_store %arg4[%c0_23, %c0_24, %c0_25, %c0_26], %49 {strides = array<i32>} : memref<1x8x6x6xbf16, #tpu.memory_space<vmem>>, vector<1x8x6x6xbf16>,
    return
  }
  func.func @transform_0(%arg0: i32) -> (i32, i32, i32, i32) {
    %c0_i32 = arith.constant 0 : i32
    %c0_i32_0 = arith.constant 0 : i32
    %c0_i32_1 = arith.constant 0 : i32
    %c0_i32_2 = arith.constant 0 : i32
    return %arg0, %c0_i32, %c0_i32_0, %c0_i32_1 : i32, i32, i32, i32
  }
  func.func @transform_1(%arg0: i32) -> (i32, i32, i32, i32) {
    %c0_i32 = arith.constant 0 : i32
    %c0_i32_0 = arith.constant 0 : i32
    %c0_i32_1 = arith.constant 0 : i32
    %c0_i32_2 = arith.constant 0 : i32
    return %arg0, %c0_i32, %c0_i32_0, %c0_i32_1 : i32, i32, i32, i32
  }
  func.func @transform_2(%arg0: i32) -> (i32, i32, i32, i32) {
    %c0_i32 = arith.constant 0 : i32
    %c0_i32_0 = arith.constant 0 : i32
    %c0_i32_1 = arith.constant 0 : i32
    %c0_i32_2 = arith.constant 0 : i32
    return %arg0, %c0_i32, %c0_i32_0, %c0_i32_1 : i32, i32, i32, i32
  }
  func.func @transform_3(%arg0: i32) -> (i32, i32, i32, i32) {
    %c0_i32 = arith.constant 0 : i32
    %c0_i32_0 = arith.constant 0 : i32
    %c0_i32_1 = arith.constant 0 : i32
    %c0_i32_2 = arith.constant 0 : i32
    return %arg0, %c0_i32, %c0_i32_0, %c0_i32_1 : i32, i32, i32, i32
  }
}

module attributes {stable_mosaic.version = 11 : i64} {
  func.func @_dwconv2d_kernel(%arg0: i32, %arg1: i32, %arg2: memref<1x7x7x8xbf16, #tpu.memory_space<vmem>>, %arg3: memref<9x1x8xf32, #tpu.memory_space<vmem>>, %arg4: memref<1x8xf32, #tpu.memory_space<vmem>>, %arg5: memref<1x8xf32, #tpu.memory_space<vmem>>, %arg6: memref<1x5x5x8xbf16, #tpu.memory_space<vmem>>) attributes {dimension_semantics = [#tpu.dimension_semantics<parallel>, #tpu.dimension_semantics<parallel>], iteration_bounds = array<i64: 2, 1>, scalar_prefetch = 0 : i64, scratch_operands = 0 : i64, tpu.core_type = #tpu.core_type<tc>, window_params = [{transform_indices = @transform_0, window_bounds = array<i64: 1, 7, 7, 8>}, {transform_indices = @transform_1, window_bounds = array<i64: 9, 1, 8>}, {transform_indices = @transform_2, window_bounds = array<i64: 1, 8>}, {transform_indices = @transform_3, window_bounds = array<i64: 1, 8>}, {transform_indices = @transform_4, window_bounds = array<i64: 1, 5, 5, 8>}]} {
    %cst = arith.constant 0.000000e+00 : f32
    %0 = vector.broadcast %cst : f32 to vector<5x5x8xf32>
    %c0 = arith.constant 0 : index
    %c0_0 = arith.constant 0 : index
    %c0_1 = arith.constant 0 : index
    %c0_2 = arith.constant 0 : index
    %1 = vector.load %arg2[%c0, %c0_0, %c0_1, %c0_2] : memref<1x7x7x8xbf16, #tpu.memory_space<vmem>>, vector<1x5x5x8xbf16>
    %2 = vector.shape_cast %1 : vector<1x5x5x8xbf16> to vector<5x5x8xbf16>
    %3 = arith.extf %2 : vector<5x5x8xbf16> to vector<5x5x8xf32>
    %c0_3 = arith.constant 0 : index
    %c0_4 = arith.constant 0 : index
    %c0_5 = arith.constant 0 : index
    %4 = vector.load %arg3[%c0_3, %c0_4, %c0_5] : memref<9x1x8xf32, #tpu.memory_space<vmem>>, vector<1x1x8xf32>
    %5 = vector.shape_cast %4 : vector<1x1x8xf32> to vector<1x8xf32>
    %6 = vector.shape_cast %5 : vector<1x8xf32> to vector<1x1x8xf32>
    %7 = vector.broadcast %6 : vector<1x1x8xf32> to vector<5x5x8xf32>
    %8 = arith.mulf %3, %7 : vector<5x5x8xf32>
    %9 = arith.addf %0, %8 : vector<5x5x8xf32>
    %c0_6 = arith.constant 0 : index
    %c0_7 = arith.constant 0 : index
    %c1 = arith.constant 1 : index
    %c0_8 = arith.constant 0 : index
    %10 = vector.load %arg2[%c0_6, %c0_7, %c1, %c0_8] : memref<1x7x7x8xbf16, #tpu.memory_space<vmem>>, vector<1x5x5x8xbf16>
    %11 = vector.shape_cast %10 : vector<1x5x5x8xbf16> to vector<5x5x8xbf16>
    %12 = arith.extf %11 : vector<5x5x8xbf16> to vector<5x5x8xf32>
    %c1_9 = arith.constant 1 : index
    %c0_10 = arith.constant 0 : index
    %c0_11 = arith.constant 0 : index
    %13 = vector.load %arg3[%c1_9, %c0_10, %c0_11] : memref<9x1x8xf32, #tpu.memory_space<vmem>>, vector<1x1x8xf32>
    %14 = vector.shape_cast %13 : vector<1x1x8xf32> to vector<1x8xf32>
    %15 = vector.shape_cast %14 : vector<1x8xf32> to vector<1x1x8xf32>
    %16 = vector.broadcast %15 : vector<1x1x8xf32> to vector<5x5x8xf32>
    %17 = arith.mulf %12, %16 : vector<5x5x8xf32>
    %18 = arith.addf %9, %17 : vector<5x5x8xf32>
    %c0_12 = arith.constant 0 : index
    %c0_13 = arith.constant 0 : index
    %c2 = arith.constant 2 : index
    %c0_14 = arith.constant 0 : index
    %19 = vector.load %arg2[%c0_12, %c0_13, %c2, %c0_14] : memref<1x7x7x8xbf16, #tpu.memory_space<vmem>>, vector<1x5x5x8xbf16>
    %20 = vector.shape_cast %19 : vector<1x5x5x8xbf16> to vector<5x5x8xbf16>
    %21 = arith.extf %20 : vector<5x5x8xbf16> to vector<5x5x8xf32>
    %c2_15 = arith.constant 2 : index
    %c0_16 = arith.constant 0 : index
    %c0_17 = arith.constant 0 : index
    %22 = vector.load %arg3[%c2_15, %c0_16, %c0_17] : memref<9x1x8xf32, #tpu.memory_space<vmem>>, vector<1x1x8xf32>
    %23 = vector.shape_cast %22 : vector<1x1x8xf32> to vector<1x8xf32>
    %24 = vector.shape_cast %23 : vector<1x8xf32> to vector<1x1x8xf32>
    %25 = vector.broadcast %24 : vector<1x1x8xf32> to vector<5x5x8xf32>
    %26 = arith.mulf %21, %25 : vector<5x5x8xf32>
    %27 = arith.addf %18, %26 : vector<5x5x8xf32>
    %c0_18 = arith.constant 0 : index
    %c1_19 = arith.constant 1 : index
    %c0_20 = arith.constant 0 : index
    %c0_21 = arith.constant 0 : index
    %28 = vector.load %arg2[%c0_18, %c1_19, %c0_20, %c0_21] : memref<1x7x7x8xbf16, #tpu.memory_space<vmem>>, vector<1x5x5x8xbf16>
    %29 = vector.shape_cast %28 : vector<1x5x5x8xbf16> to vector<5x5x8xbf16>
    %30 = arith.extf %29 : vector<5x5x8xbf16> to vector<5x5x8xf32>
    %c3 = arith.constant 3 : index
    %c0_22 = arith.constant 0 : index
    %c0_23 = arith.constant 0 : index
    %31 = vector.load %arg3[%c3, %c0_22, %c0_23] : memref<9x1x8xf32, #tpu.memory_space<vmem>>, vector<1x1x8xf32>
    %32 = vector.shape_cast %31 : vector<1x1x8xf32> to vector<1x8xf32>
    %33 = vector.shape_cast %32 : vector<1x8xf32> to vector<1x1x8xf32>
    %34 = vector.broadcast %33 : vector<1x1x8xf32> to vector<5x5x8xf32>
    %35 = arith.mulf %30, %34 : vector<5x5x8xf32>
    %36 = arith.addf %27, %35 : vector<5x5x8xf32>
    %c0_24 = arith.constant 0 : index
    %c1_25 = arith.constant 1 : index
    %c1_26 = arith.constant 1 : index
    %c0_27 = arith.constant 0 : index
    %37 = vector.load %arg2[%c0_24, %c1_25, %c1_26, %c0_27] : memref<1x7x7x8xbf16, #tpu.memory_space<vmem>>, vector<1x5x5x8xbf16>
    %38 = vector.shape_cast %37 : vector<1x5x5x8xbf16> to vector<5x5x8xbf16>
    %39 = arith.extf %38 : vector<5x5x8xbf16> to vector<5x5x8xf32>
    %c4 = arith.constant 4 : index
    %c0_28 = arith.constant 0 : index
    %c0_29 = arith.constant 0 : index
    %40 = vector.load %arg3[%c4, %c0_28, %c0_29] : memref<9x1x8xf32, #tpu.memory_space<vmem>>, vector<1x1x8xf32>
    %41 = vector.shape_cast %40 : vector<1x1x8xf32> to vector<1x8xf32>
    %42 = vector.shape_cast %41 : vector<1x8xf32> to vector<1x1x8xf32>
    %43 = vector.broadcast %42 : vector<1x1x8xf32> to vector<5x5x8xf32>
    %44 = arith.mulf %39, %43 : vector<5x5x8xf32>
    %45 = arith.addf %36, %44 : vector<5x5x8xf32>
    %c0_30 = arith.constant 0 : index
    %c1_31 = arith.constant 1 : index
    %c2_32 = arith.constant 2 : index
    %c0_33 = arith.constant 0 : index
    %46 = vector.load %arg2[%c0_30, %c1_31, %c2_32, %c0_33] : memref<1x7x7x8xbf16, #tpu.memory_space<vmem>>, vector<1x5x5x8xbf16>
    %47 = vector.shape_cast %46 : vector<1x5x5x8xbf16> to vector<5x5x8xbf16>
    %48 = arith.extf %47 : vector<5x5x8xbf16> to vector<5x5x8xf32>
    %c5 = arith.constant 5 : index
    %c0_34 = arith.constant 0 : index
    %c0_35 = arith.constant 0 : index
    %49 = vector.load %arg3[%c5, %c0_34, %c0_35] : memref<9x1x8xf32, #tpu.memory_space<vmem>>, vector<1x1x8xf32>
    %50 = vector.shape_cast %49 : vector<1x1x8xf32> to vector<1x8xf32>
    %51 = vector.shape_cast %50 : vector<1x8xf32> to vector<1x1x8xf32>
    %52 = vector.broadcast %51 : vector<1x1x8xf32> to vector<5x5x8xf32>
    %53 = arith.mulf %48, %52 : vector<5x5x8xf32>
    %54 = arith.addf %45, %53 : vector<5x5x8xf32>
    %c0_36 = arith.constant 0 : index
    %c2_37 = arith.constant 2 : index
    %c0_38 = arith.constant 0 : index
    %c0_39 = arith.constant 0 : index
    %55 = vector.load %arg2[%c0_36, %c2_37, %c0_38, %c0_39] : memref<1x7x7x8xbf16, #tpu.memory_space<vmem>>, vector<1x5x5x8xbf16>
    %56 = vector.shape_cast %55 : vector<1x5x5x8xbf16> to vector<5x5x8xbf16>
    %57 = arith.extf %56 : vector<5x5x8xbf16> to vector<5x5x8xf32>
    %c6 = arith.constant 6 : index
    %c0_40 = arith.constant 0 : index
    %c0_41 = arith.constant 0 : index
    %58 = vector.load %arg3[%c6, %c0_40, %c0_41] : memref<9x1x8xf32, #tpu.memory_space<vmem>>, vector<1x1x8xf32>
    %59 = vector.shape_cast %58 : vector<1x1x8xf32> to vector<1x8xf32>
    %60 = vector.shape_cast %59 : vector<1x8xf32> to vector<1x1x8xf32>
    %61 = vector.broadcast %60 : vector<1x1x8xf32> to vector<5x5x8xf32>
    %62 = arith.mulf %57, %61 : vector<5x5x8xf32>
    %63 = arith.addf %54, %62 : vector<5x5x8xf32>
    %c0_42 = arith.constant 0 : index
    %c2_43 = arith.constant 2 : index
    %c1_44 = arith.constant 1 : index
    %c0_45 = arith.constant 0 : index
    %64 = vector.load %arg2[%c0_42, %c2_43, %c1_44, %c0_45] : memref<1x7x7x8xbf16, #tpu.memory_space<vmem>>, vector<1x5x5x8xbf16>
    %65 = vector.shape_cast %64 : vector<1x5x5x8xbf16> to vector<5x5x8xbf16>
    %66 = arith.extf %65 : vector<5x5x8xbf16> to vector<5x5x8xf32>
    %c7 = arith.constant 7 : index
    %c0_46 = arith.constant 0 : index
    %c0_47 = arith.constant 0 : index
    %67 = vector.load %arg3[%c7, %c0_46, %c0_47] : memref<9x1x8xf32, #tpu.memory_space<vmem>>, vector<1x1x8xf32>
    %68 = vector.shape_cast %67 : vector<1x1x8xf32> to vector<1x8xf32>
    %69 = vector.shape_cast %68 : vector<1x8xf32> to vector<1x1x8xf32>
    %70 = vector.broadcast %69 : vector<1x1x8xf32> to vector<5x5x8xf32>
    %71 = arith.mulf %66, %70 : vector<5x5x8xf32>
    %72 = arith.addf %63, %71 : vector<5x5x8xf32>
    %c0_48 = arith.constant 0 : index
    %c2_49 = arith.constant 2 : index
    %c2_50 = arith.constant 2 : index
    %c0_51 = arith.constant 0 : index
    %73 = vector.load %arg2[%c0_48, %c2_49, %c2_50, %c0_51] : memref<1x7x7x8xbf16, #tpu.memory_space<vmem>>, vector<1x5x5x8xbf16>
    %74 = vector.shape_cast %73 : vector<1x5x5x8xbf16> to vector<5x5x8xbf16>
    %75 = arith.extf %74 : vector<5x5x8xbf16> to vector<5x5x8xf32>
    %c8 = arith.constant 8 : index
    %c0_52 = arith.constant 0 : index
    %c0_53 = arith.constant 0 : index
    %76 = vector.load %arg3[%c8, %c0_52, %c0_53] : memref<9x1x8xf32, #tpu.memory_space<vmem>>, vector<1x1x8xf32>
    %77 = vector.shape_cast %76 : vector<1x1x8xf32> to vector<1x8xf32>
    %78 = vector.shape_cast %77 : vector<1x8xf32> to vector<1x1x8xf32>
    %79 = vector.broadcast %78 : vector<1x1x8xf32> to vector<5x5x8xf32>
    %80 = arith.mulf %75, %79 : vector<5x5x8xf32>
    %81 = arith.addf %72, %80 : vector<5x5x8xf32>
    %c0_54 = arith.constant 0 : index
    %c0_55 = arith.constant 0 : index
    %82 = vector.load %arg4[%c0_54, %c0_55] : memref<1x8xf32, #tpu.memory_space<vmem>>, vector<1x8xf32>
    %83 = vector.shape_cast %82 : vector<1x8xf32> to vector<1x1x8xf32>
    %84 = vector.broadcast %83 : vector<1x1x8xf32> to vector<5x5x8xf32>
    %85 = arith.mulf %81, %84 : vector<5x5x8xf32>
    %c0_56 = arith.constant 0 : index
    %c0_57 = arith.constant 0 : index
    %86 = vector.load %arg5[%c0_56, %c0_57] : memref<1x8xf32, #tpu.memory_space<vmem>>, vector<1x8xf32>
    %87 = vector.shape_cast %86 : vector<1x8xf32> to vector<1x1x8xf32>
    %88 = vector.broadcast %87 : vector<1x1x8xf32> to vector<5x5x8xf32>
    %89 = arith.addf %85, %88 : vector<5x5x8xf32>
    %cst_58 = arith.constant 0.000000e+00 : f32
    %90 = vector.broadcast %cst_58 : f32 to vector<5x5x8xf32>
    %91 = arith.maximumf %89, %90 : vector<5x5x8xf32>
    %92 = arith.truncf %91 : vector<5x5x8xf32> to vector<5x5x8xbf16>
    %c0_59 = arith.constant 0 : index
    %c0_60 = arith.constant 0 : index
    %c0_61 = arith.constant 0 : index
    %c0_62 = arith.constant 0 : index
    %93 = vector.load %arg6[%c0_59, %c0_60, %c0_61, %c0_62] : memref<1x5x5x8xbf16, #tpu.memory_space<vmem>>, vector<1x5x5x8xbf16>
    %94 = vector.shape_cast %93 : vector<1x5x5x8xbf16> to vector<5x5x8xbf16>
    %95 = vector.shape_cast %92 : vector<5x5x8xbf16> to vector<1x5x5x8xbf16>
    tpu.vector_store %arg6[%c0_59, %c0_60, %c0_61, %c0_62], %95 {strides = array<i32>} : memref<1x5x5x8xbf16, #tpu.memory_space<vmem>>, vector<1x5x5x8xbf16>,
    return
  }
  func.func @transform_0(%arg0: i32, %arg1: i32) -> (i32, i32, i32, i32) {
    %c0_i32 = arith.constant 0 : i32
    %c0_i32_0 = arith.constant 0 : i32
    %c0_i32_1 = arith.constant 0 : i32
    return %arg0, %c0_i32, %c0_i32_0, %arg1 : i32, i32, i32, i32
  }
  func.func @transform_1(%arg0: i32, %arg1: i32) -> (i32, i32, i32) {
    %c0_i32 = arith.constant 0 : i32
    %c0_i32_0 = arith.constant 0 : i32
    %c0_i32_1 = arith.constant 0 : i32
    return %c0_i32, %c0_i32_0, %arg1 : i32, i32, i32
  }
  func.func @transform_2(%arg0: i32, %arg1: i32) -> (i32, i32) {
    %c0_i32 = arith.constant 0 : i32
    %c0_i32_0 = arith.constant 0 : i32
    return %c0_i32, %arg1 : i32, i32
  }
  func.func @transform_3(%arg0: i32, %arg1: i32) -> (i32, i32) {
    %c0_i32 = arith.constant 0 : i32
    %c0_i32_0 = arith.constant 0 : i32
    return %c0_i32, %arg1 : i32, i32
  }
  func.func @transform_4(%arg0: i32, %arg1: i32) -> (i32, i32, i32, i32) {
    %c0_i32 = arith.constant 0 : i32
    %c0_i32_0 = arith.constant 0 : i32
    %c0_i32_1 = arith.constant 0 : i32
    return %arg0, %c0_i32, %c0_i32_0, %arg1 : i32, i32, i32, i32
  }
}

module attributes {stable_mosaic.version = 11 : i64} {
  func.func @_samca_combine_kernel(%arg0: i32, %arg1: memref<1x8x25xbf16, #tpu.memory_space<vmem>>, %arg2: memref<1x8x25xbf16, #tpu.memory_space<vmem>>, %arg3: memref<1x8x25xbf16, #tpu.memory_space<vmem>>, %arg4: memref<1x8x25xf32, #tpu.memory_space<vmem>>, %arg5: memref<4x2x2xbf16, #tpu.memory_space<vmem>>, %arg6: memref<4x2x2xbf16, #tpu.memory_space<vmem>>, %arg7: memref<4x2x1xf32, #tpu.memory_space<vmem>>, %arg8: memref<4x2x1xf32, #tpu.memory_space<vmem>>, %arg9: memref<4x1x2xf32, #tpu.memory_space<vmem>>, %arg10: memref<4x1x1xf32, #tpu.memory_space<vmem>>, %arg11: memref<8x1xf32, #tpu.memory_space<vmem>>, %arg12: memref<8x1xf32, #tpu.memory_space<vmem>>, %arg13: memref<1x1xf32, #tpu.memory_space<vmem>>, %arg14: memref<1x8x25xf32, #tpu.memory_space<vmem>>) attributes {dimension_semantics = [#tpu.dimension_semantics<parallel>], iteration_bounds = array<i64: 2>, scalar_prefetch = 0 : i64, scratch_operands = 0 : i64, tpu.core_type = #tpu.core_type<tc>, window_params = [{transform_indices = @transform_0, window_bounds = array<i64: 1, 8, 25>}, {transform_indices = @transform_1, window_bounds = array<i64: 1, 8, 25>}, {transform_indices = @transform_2, window_bounds = array<i64: 1, 8, 25>}, {transform_indices = @transform_3, window_bounds = array<i64: 1, 8, 25>}, {pipeline_mode = #tpu.pipeline_mode<synchronous>, transform_indices = @transform_4, window_bounds = array<i64: 4, 2, 2>}, {pipeline_mode = #tpu.pipeline_mode<synchronous>, transform_indices = @transform_5, window_bounds = array<i64: 4, 2, 2>}, {pipeline_mode = #tpu.pipeline_mode<synchronous>, transform_indices = @transform_6, window_bounds = array<i64: 4, 2, 1>}, {pipeline_mode = #tpu.pipeline_mode<synchronous>, transform_indices = @transform_7, window_bounds = array<i64: 4, 2, 1>}, {pipeline_mode = #tpu.pipeline_mode<synchronous>, transform_indices = @transform_8, window_bounds = array<i64: 4, 1, 2>}, {pipeline_mode = #tpu.pipeline_mode<synchronous>, transform_indices = @transform_9, window_bounds = array<i64: 4, 1, 1>}, {pipeline_mode = #tpu.pipeline_mode<synchronous>, transform_indices = @transform_10, window_bounds = array<i64: 8, 1>}, {pipeline_mode = #tpu.pipeline_mode<synchronous>, transform_indices = @transform_11, window_bounds = array<i64: 8, 1>}, {pipeline_mode = #tpu.pipeline_mode<synchronous>, transform_indices = @transform_12, window_bounds = array<i64: 1, 1>}, {transform_indices = @transform_13, window_bounds = array<i64: 1, 8, 25>}]} {
    %c0 = arith.constant 0 : index
    %c0_0 = arith.constant 0 : index
    %c0_1 = arith.constant 0 : index
    %0 = vector.load %arg1[%c0, %c0_0, %c0_1] : memref<1x8x25xbf16, #tpu.memory_space<vmem>>, vector<1x8x25xbf16>
    %1 = vector.shape_cast %0 : vector<1x8x25xbf16> to vector<8x25xbf16>
    %c0_2 = arith.constant 0 : index
    %c0_3 = arith.constant 0 : index
    %c0_4 = arith.constant 0 : index
    %2 = vector.load %arg2[%c0_2, %c0_3, %c0_4] : memref<1x8x25xbf16, #tpu.memory_space<vmem>>, vector<1x8x25xbf16>
    %3 = vector.shape_cast %2 : vector<1x8x25xbf16> to vector<8x25xbf16>
    %c0_5 = arith.constant 0 : index
    %c0_6 = arith.constant 0 : index
    %c0_7 = arith.constant 0 : index
    %4 = vector.load %arg5[%c0_5, %c0_6, %c0_7] : memref<4x2x2xbf16, #tpu.memory_space<vmem>>, vector<1x2x2xbf16>
    %5 = vector.shape_cast %4 : vector<1x2x2xbf16> to vector<2x2xbf16>
    %6 = vector.extract_strided_slice %1 {offsets = [0, 0], sizes = [2, 25], strides = [1, 1]} : vector<8x25xbf16> to vector<2x25xbf16>
    %cst = arith.constant dense<0.000000e+00> : vector<2x25xf32>
    %7 = tpu.matmul %5, %6, %cst {dimension_numbers = #tpu.dot_dimension_numbers<[1], [0], [0], [1], [0, 0, 1, 1], [], []>} : vector<2x2xbf16>, vector<2x25xbf16>, vector<2x25xf32> -> vector<2x25xf32>
    %c0_8 = arith.constant 0 : index
    %c0_9 = arith.constant 0 : index
    %c0_10 = arith.constant 0 : index
    %8 = vector.load %arg6[%c0_8, %c0_9, %c0_10] : memref<4x2x2xbf16, #tpu.memory_space<vmem>>, vector<1x2x2xbf16>
    %9 = vector.shape_cast %8 : vector<1x2x2xbf16> to vector<2x2xbf16>
    %10 = vector.extract_strided_slice %3 {offsets = [0, 0], sizes = [2, 25], strides = [1, 1]} : vector<8x25xbf16> to vector<2x25xbf16>
    %cst_11 = arith.constant dense<0.000000e+00> : vector<2x25xf32>
    %11 = tpu.matmul %9, %10, %cst_11 {dimension_numbers = #tpu.dot_dimension_numbers<[1], [0], [0], [1], [0, 0, 1, 1], [], []>} : vector<2x2xbf16>, vector<2x25xbf16>, vector<2x25xf32> -> vector<2x25xf32>
    %12 = arith.addf %7, %11 : vector<2x25xf32>
    %c0_12 = arith.constant 0 : index
    %c0_13 = arith.constant 0 : index
    %c0_14 = arith.constant 0 : index
    %13 = vector.load %arg7[%c0_12, %c0_13, %c0_14] : memref<4x2x1xf32, #tpu.memory_space<vmem>>, vector<1x2x1xf32>
    %14 = vector.shape_cast %13 : vector<1x2x1xf32> to vector<2x1xf32>
    %15 = vector.broadcast %14 : vector<2x1xf32> to vector<2x25xf32>
    %16 = arith.mulf %12, %15 : vector<2x25xf32>
    %c0_15 = arith.constant 0 : index
    %c0_16 = arith.constant 0 : index
    %c0_17 = arith.constant 0 : index
    %17 = vector.load %arg8[%c0_15, %c0_16, %c0_17] : memref<4x2x1xf32, #tpu.memory_space<vmem>>, vector<1x2x1xf32>
    %18 = vector.shape_cast %17 : vector<1x2x1xf32> to vector<2x1xf32>
    %19 = vector.broadcast %18 : vector<2x1xf32> to vector<2x25xf32>
    %20 = arith.addf %16, %19 : vector<2x25xf32>
    %cst_18 = arith.constant 0.000000e+00 : f32
    %21 = vector.broadcast %cst_18 : f32 to vector<2x25xf32>
    %22 = arith.maximumf %20, %21 : vector<2x25xf32>
    %c0_19 = arith.constant 0 : index
    %c0_20 = arith.constant 0 : index
    %c0_21 = arith.constant 0 : index
    %23 = vector.load %arg9[%c0_19, %c0_20, %c0_21] : memref<4x1x2xf32, #tpu.memory_space<vmem>>, vector<1x1x2xf32>
    %24 = vector.shape_cast %23 : vector<1x1x2xf32> to vector<1x2xf32>
    %cst_22 = arith.constant dense<0.000000e+00> : vector<1x25xf32>
    %25 = tpu.matmul %24, %22, %cst_22 {dimension_numbers = #tpu.dot_dimension_numbers<[1], [0], [0], [1], [0, 0, 1, 1], [], []>} : vector<1x2xf32>, vector<2x25xf32>, vector<1x25xf32> -> vector<1x25xf32>
    %c0_23 = arith.constant 0 : index
    %c0_24 = arith.constant 0 : index
    %c0_25 = arith.constant 0 : index
    %26 = vector.load %arg10[%c0_23, %c0_24, %c0_25] : memref<4x1x1xf32, #tpu.memory_space<vmem>>, vector<1x1x1xf32>
    %27 = vector.shape_cast %26 : vector<1x1x1xf32> to vector<1x1xf32>
    %28 = vector.broadcast %27 : vector<1x1xf32> to vector<1x25xf32>
    %29 = arith.addf %25, %28 : vector<1x25xf32>
    %c1 = arith.constant 1 : index
    %c0_26 = arith.constant 0 : index
    %c0_27 = arith.constant 0 : index
    %30 = vector.load %arg5[%c1, %c0_26, %c0_27] : memref<4x2x2xbf16, #tpu.memory_space<vmem>>, vector<1x2x2xbf16>
    %31 = vector.shape_cast %30 : vector<1x2x2xbf16> to vector<2x2xbf16>
    %32 = vector.extract_strided_slice %1 {offsets = [2, 0], sizes = [2, 25], strides = [1, 1]} : vector<8x25xbf16> to vector<2x25xbf16>
    %cst_28 = arith.constant dense<0.000000e+00> : vector<2x25xf32>
    %33 = tpu.matmul %31, %32, %cst_28 {dimension_numbers = #tpu.dot_dimension_numbers<[1], [0], [0], [1], [0, 0, 1, 1], [], []>} : vector<2x2xbf16>, vector<2x25xbf16>, vector<2x25xf32> -> vector<2x25xf32>
    %c1_29 = arith.constant 1 : index
    %c0_30 = arith.constant 0 : index
    %c0_31 = arith.constant 0 : index
    %34 = vector.load %arg6[%c1_29, %c0_30, %c0_31] : memref<4x2x2xbf16, #tpu.memory_space<vmem>>, vector<1x2x2xbf16>
    %35 = vector.shape_cast %34 : vector<1x2x2xbf16> to vector<2x2xbf16>
    %36 = vector.extract_strided_slice %3 {offsets = [2, 0], sizes = [2, 25], strides = [1, 1]} : vector<8x25xbf16> to vector<2x25xbf16>
    %cst_32 = arith.constant dense<0.000000e+00> : vector<2x25xf32>
    %37 = tpu.matmul %35, %36, %cst_32 {dimension_numbers = #tpu.dot_dimension_numbers<[1], [0], [0], [1], [0, 0, 1, 1], [], []>} : vector<2x2xbf16>, vector<2x25xbf16>, vector<2x25xf32> -> vector<2x25xf32>
    %38 = arith.addf %33, %37 : vector<2x25xf32>
    %c1_33 = arith.constant 1 : index
    %c0_34 = arith.constant 0 : index
    %c0_35 = arith.constant 0 : index
    %39 = vector.load %arg7[%c1_33, %c0_34, %c0_35] : memref<4x2x1xf32, #tpu.memory_space<vmem>>, vector<1x2x1xf32>
    %40 = vector.shape_cast %39 : vector<1x2x1xf32> to vector<2x1xf32>
    %41 = vector.broadcast %40 : vector<2x1xf32> to vector<2x25xf32>
    %42 = arith.mulf %38, %41 : vector<2x25xf32>
    %c1_36 = arith.constant 1 : index
    %c0_37 = arith.constant 0 : index
    %c0_38 = arith.constant 0 : index
    %43 = vector.load %arg8[%c1_36, %c0_37, %c0_38] : memref<4x2x1xf32, #tpu.memory_space<vmem>>, vector<1x2x1xf32>
    %44 = vector.shape_cast %43 : vector<1x2x1xf32> to vector<2x1xf32>
    %45 = vector.broadcast %44 : vector<2x1xf32> to vector<2x25xf32>
    %46 = arith.addf %42, %45 : vector<2x25xf32>
    %cst_39 = arith.constant 0.000000e+00 : f32
    %47 = vector.broadcast %cst_39 : f32 to vector<2x25xf32>
    %48 = arith.maximumf %46, %47 : vector<2x25xf32>
    %c1_40 = arith.constant 1 : index
    %c0_41 = arith.constant 0 : index
    %c0_42 = arith.constant 0 : index
    %49 = vector.load %arg9[%c1_40, %c0_41, %c0_42] : memref<4x1x2xf32, #tpu.memory_space<vmem>>, vector<1x1x2xf32>
    %50 = vector.shape_cast %49 : vector<1x1x2xf32> to vector<1x2xf32>
    %cst_43 = arith.constant dense<0.000000e+00> : vector<1x25xf32>
    %51 = tpu.matmul %50, %48, %cst_43 {dimension_numbers = #tpu.dot_dimension_numbers<[1], [0], [0], [1], [0, 0, 1, 1], [], []>} : vector<1x2xf32>, vector<2x25xf32>, vector<1x25xf32> -> vector<1x25xf32>
    %c1_44 = arith.constant 1 : index
    %c0_45 = arith.constant 0 : index
    %c0_46 = arith.constant 0 : index
    %52 = vector.load %arg10[%c1_44, %c0_45, %c0_46] : memref<4x1x1xf32, #tpu.memory_space<vmem>>, vector<1x1x1xf32>
    %53 = vector.shape_cast %52 : vector<1x1x1xf32> to vector<1x1xf32>
    %54 = vector.broadcast %53 : vector<1x1xf32> to vector<1x25xf32>
    %55 = arith.addf %51, %54 : vector<1x25xf32>
    %c2 = arith.constant 2 : index
    %c0_47 = arith.constant 0 : index
    %c0_48 = arith.constant 0 : index
    %56 = vector.load %arg5[%c2, %c0_47, %c0_48] : memref<4x2x2xbf16, #tpu.memory_space<vmem>>, vector<1x2x2xbf16>
    %57 = vector.shape_cast %56 : vector<1x2x2xbf16> to vector<2x2xbf16>
    %58 = vector.extract_strided_slice %1 {offsets = [4, 0], sizes = [2, 25], strides = [1, 1]} : vector<8x25xbf16> to vector<2x25xbf16>
    %cst_49 = arith.constant dense<0.000000e+00> : vector<2x25xf32>
    %59 = tpu.matmul %57, %58, %cst_49 {dimension_numbers = #tpu.dot_dimension_numbers<[1], [0], [0], [1], [0, 0, 1, 1], [], []>} : vector<2x2xbf16>, vector<2x25xbf16>, vector<2x25xf32> -> vector<2x25xf32>
    %c2_50 = arith.constant 2 : index
    %c0_51 = arith.constant 0 : index
    %c0_52 = arith.constant 0 : index
    %60 = vector.load %arg6[%c2_50, %c0_51, %c0_52] : memref<4x2x2xbf16, #tpu.memory_space<vmem>>, vector<1x2x2xbf16>
    %61 = vector.shape_cast %60 : vector<1x2x2xbf16> to vector<2x2xbf16>
    %62 = vector.extract_strided_slice %3 {offsets = [4, 0], sizes = [2, 25], strides = [1, 1]} : vector<8x25xbf16> to vector<2x25xbf16>
    %cst_53 = arith.constant dense<0.000000e+00> : vector<2x25xf32>
    %63 = tpu.matmul %61, %62, %cst_53 {dimension_numbers = #tpu.dot_dimension_numbers<[1], [0], [0], [1], [0, 0, 1, 1], [], []>} : vector<2x2xbf16>, vector<2x25xbf16>, vector<2x25xf32> -> vector<2x25xf32>
    %64 = arith.addf %59, %63 : vector<2x25xf32>
    %c2_54 = arith.constant 2 : index
    %c0_55 = arith.constant 0 : index
    %c0_56 = arith.constant 0 : index
    %65 = vector.load %arg7[%c2_54, %c0_55, %c0_56] : memref<4x2x1xf32, #tpu.memory_space<vmem>>, vector<1x2x1xf32>
    %66 = vector.shape_cast %65 : vector<1x2x1xf32> to vector<2x1xf32>
    %67 = vector.broadcast %66 : vector<2x1xf32> to vector<2x25xf32>
    %68 = arith.mulf %64, %67 : vector<2x25xf32>
    %c2_57 = arith.constant 2 : index
    %c0_58 = arith.constant 0 : index
    %c0_59 = arith.constant 0 : index
    %69 = vector.load %arg8[%c2_57, %c0_58, %c0_59] : memref<4x2x1xf32, #tpu.memory_space<vmem>>, vector<1x2x1xf32>
    %70 = vector.shape_cast %69 : vector<1x2x1xf32> to vector<2x1xf32>
    %71 = vector.broadcast %70 : vector<2x1xf32> to vector<2x25xf32>
    %72 = arith.addf %68, %71 : vector<2x25xf32>
    %cst_60 = arith.constant 0.000000e+00 : f32
    %73 = vector.broadcast %cst_60 : f32 to vector<2x25xf32>
    %74 = arith.maximumf %72, %73 : vector<2x25xf32>
    %c2_61 = arith.constant 2 : index
    %c0_62 = arith.constant 0 : index
    %c0_63 = arith.constant 0 : index
    %75 = vector.load %arg9[%c2_61, %c0_62, %c0_63] : memref<4x1x2xf32, #tpu.memory_space<vmem>>, vector<1x1x2xf32>
    %76 = vector.shape_cast %75 : vector<1x1x2xf32> to vector<1x2xf32>
    %cst_64 = arith.constant dense<0.000000e+00> : vector<1x25xf32>
    %77 = tpu.matmul %76, %74, %cst_64 {dimension_numbers = #tpu.dot_dimension_numbers<[1], [0], [0], [1], [0, 0, 1, 1], [], []>} : vector<1x2xf32>, vector<2x25xf32>, vector<1x25xf32> -> vector<1x25xf32>
    %c2_65 = arith.constant 2 : index
    %c0_66 = arith.constant 0 : index
    %c0_67 = arith.constant 0 : index
    %78 = vector.load %arg10[%c2_65, %c0_66, %c0_67] : memref<4x1x1xf32, #tpu.memory_space<vmem>>, vector<1x1x1xf32>
    %79 = vector.shape_cast %78 : vector<1x1x1xf32> to vector<1x1xf32>
    %80 = vector.broadcast %79 : vector<1x1xf32> to vector<1x25xf32>
    %81 = arith.addf %77, %80 : vector<1x25xf32>
    %c3 = arith.constant 3 : index
    %c0_68 = arith.constant 0 : index
    %c0_69 = arith.constant 0 : index
    %82 = vector.load %arg5[%c3, %c0_68, %c0_69] : memref<4x2x2xbf16, #tpu.memory_space<vmem>>, vector<1x2x2xbf16>
    %83 = vector.shape_cast %82 : vector<1x2x2xbf16> to vector<2x2xbf16>
    %84 = vector.extract_strided_slice %1 {offsets = [6, 0], sizes = [2, 25], strides = [1, 1]} : vector<8x25xbf16> to vector<2x25xbf16>
    %cst_70 = arith.constant dense<0.000000e+00> : vector<2x25xf32>
    %85 = tpu.matmul %83, %84, %cst_70 {dimension_numbers = #tpu.dot_dimension_numbers<[1], [0], [0], [1], [0, 0, 1, 1], [], []>} : vector<2x2xbf16>, vector<2x25xbf16>, vector<2x25xf32> -> vector<2x25xf32>
    %c3_71 = arith.constant 3 : index
    %c0_72 = arith.constant 0 : index
    %c0_73 = arith.constant 0 : index
    %86 = vector.load %arg6[%c3_71, %c0_72, %c0_73] : memref<4x2x2xbf16, #tpu.memory_space<vmem>>, vector<1x2x2xbf16>
    %87 = vector.shape_cast %86 : vector<1x2x2xbf16> to vector<2x2xbf16>
    %88 = vector.extract_strided_slice %3 {offsets = [6, 0], sizes = [2, 25], strides = [1, 1]} : vector<8x25xbf16> to vector<2x25xbf16>
    %cst_74 = arith.constant dense<0.000000e+00> : vector<2x25xf32>
    %89 = tpu.matmul %87, %88, %cst_74 {dimension_numbers = #tpu.dot_dimension_numbers<[1], [0], [0], [1], [0, 0, 1, 1], [], []>} : vector<2x2xbf16>, vector<2x25xbf16>, vector<2x25xf32> -> vector<2x25xf32>
    %90 = arith.addf %85, %89 : vector<2x25xf32>
    %c3_75 = arith.constant 3 : index
    %c0_76 = arith.constant 0 : index
    %c0_77 = arith.constant 0 : index
    %91 = vector.load %arg7[%c3_75, %c0_76, %c0_77] : memref<4x2x1xf32, #tpu.memory_space<vmem>>, vector<1x2x1xf32>
    %92 = vector.shape_cast %91 : vector<1x2x1xf32> to vector<2x1xf32>
    %93 = vector.broadcast %92 : vector<2x1xf32> to vector<2x25xf32>
    %94 = arith.mulf %90, %93 : vector<2x25xf32>
    %c3_78 = arith.constant 3 : index
    %c0_79 = arith.constant 0 : index
    %c0_80 = arith.constant 0 : index
    %95 = vector.load %arg8[%c3_78, %c0_79, %c0_80] : memref<4x2x1xf32, #tpu.memory_space<vmem>>, vector<1x2x1xf32>
    %96 = vector.shape_cast %95 : vector<1x2x1xf32> to vector<2x1xf32>
    %97 = vector.broadcast %96 : vector<2x1xf32> to vector<2x25xf32>
    %98 = arith.addf %94, %97 : vector<2x25xf32>
    %cst_81 = arith.constant 0.000000e+00 : f32
    %99 = vector.broadcast %cst_81 : f32 to vector<2x25xf32>
    %100 = arith.maximumf %98, %99 : vector<2x25xf32>
    %c3_82 = arith.constant 3 : index
    %c0_83 = arith.constant 0 : index
    %c0_84 = arith.constant 0 : index
    %101 = vector.load %arg9[%c3_82, %c0_83, %c0_84] : memref<4x1x2xf32, #tpu.memory_space<vmem>>, vector<1x1x2xf32>
    %102 = vector.shape_cast %101 : vector<1x1x2xf32> to vector<1x2xf32>
    %cst_85 = arith.constant dense<0.000000e+00> : vector<1x25xf32>
    %103 = tpu.matmul %102, %100, %cst_85 {dimension_numbers = #tpu.dot_dimension_numbers<[1], [0], [0], [1], [0, 0, 1, 1], [], []>} : vector<1x2xf32>, vector<2x25xf32>, vector<1x25xf32> -> vector<1x25xf32>
    %c3_86 = arith.constant 3 : index
    %c0_87 = arith.constant 0 : index
    %c0_88 = arith.constant 0 : index
    %104 = vector.load %arg10[%c3_86, %c0_87, %c0_88] : memref<4x1x1xf32, #tpu.memory_space<vmem>>, vector<1x1x1xf32>
    %105 = vector.shape_cast %104 : vector<1x1x1xf32> to vector<1x1xf32>
    %106 = vector.broadcast %105 : vector<1x1xf32> to vector<1x25xf32>
    %107 = arith.addf %103, %106 : vector<1x25xf32>
    %108 = tpu.concatenate %29, %55, %81, %107 in 0 : vector<1x25xf32>, vector<1x25xf32>, vector<1x25xf32>, vector<1x25xf32> -> vector<4x25xf32>
    %cst_89 = arith.constant dense<0xFF800000> : vector<4xf32>
    %109 = vector.multi_reduction <maximumf>, %108, %cst_89 [1] : vector<4x25xf32> to vector<4xf32>
    %110 = vector.shape_cast %109 : vector<4xf32> to vector<4x1xf32>
    %111 = vector.broadcast %110 : vector<4x1xf32> to vector<4x25xf32>
    %112 = arith.subf %108, %111 : vector<4x25xf32>
    %113 = math.exp %112 : vector<4x25xf32>
    %cst_90 = arith.constant dense<0.000000e+00> : vector<4xf32>
    %114 = vector.multi_reduction <add>, %113, %cst_90 [1] : vector<4x25xf32> to vector<4xf32>
    %115 = vector.shape_cast %114 : vector<4xf32> to vector<4x1xf32>
    %116 = tpu.reciprocal %115 {approx = true} : vector<4x1xf32> -> vector<4x1xf32>
    %117 = vector.broadcast %116 : vector<4x1xf32> to vector<4x25xf32>
    %118 = arith.mulf %113, %117 : vector<4x25xf32>
    %119 = vector.extract_strided_slice %118 {offsets = [0, 0], sizes = [1, 25], strides = [1, 1]} : vector<4x25xf32> to vector<1x25xf32>
    %120 = vector.shape_cast %119 : vector<1x25xf32> to vector<1x25xf32>
    %121 = vector.broadcast %120 : vector<1x25xf32> to vector<2x25xf32>
    %122 = vector.extract_strided_slice %118 {offsets = [1, 0], sizes = [1, 25], strides = [1, 1]} : vector<4x25xf32> to vector<1x25xf32>
    %123 = vector.shape_cast %122 : vector<1x25xf32> to vector<1x25xf32>
    %124 = vector.broadcast %123 : vector<1x25xf32> to vector<2x25xf32>
    %125 = vector.extract_strided_slice %118 {offsets = [2, 0], sizes = [1, 25], strides = [1, 1]} : vector<4x25xf32> to vector<1x25xf32>
    %126 = vector.shape_cast %125 : vector<1x25xf32> to vector<1x25xf32>
    %127 = vector.broadcast %126 : vector<1x25xf32> to vector<2x25xf32>
    %128 = vector.extract_strided_slice %118 {offsets = [3, 0], sizes = [1, 25], strides = [1, 1]} : vector<4x25xf32> to vector<1x25xf32>
    %129 = vector.shape_cast %128 : vector<1x25xf32> to vector<1x25xf32>
    %130 = vector.broadcast %129 : vector<1x25xf32> to vector<2x25xf32>
    %131 = tpu.concatenate %121, %124, %127, %130 in 0 : vector<2x25xf32>, vector<2x25xf32>, vector<2x25xf32>, vector<2x25xf32> -> vector<8x25xf32>
    %132 = arith.extf %1 : vector<8x25xbf16> to vector<8x25xf32>
    %133 = arith.extf %3 : vector<8x25xbf16> to vector<8x25xf32>
    %134 = arith.mulf %131, %133 : vector<8x25xf32>
    %135 = arith.addf %132, %134 : vector<8x25xf32>
    %c0_91 = arith.constant 0 : index
    %c0_92 = arith.constant 0 : index
    %136 = vector.load %arg13[%c0_91, %c0_92] : memref<1x1xf32, #tpu.memory_space<vmem>>, vector<1x1xf32>
    %c0_93 = arith.constant 0 : index
    %c0_94 = arith.constant 0 : index
    %c0_95 = arith.constant 0 : index
    %137 = vector.load %arg3[%c0_93, %c0_94, %c0_95] : memref<1x8x25xbf16, #tpu.memory_space<vmem>>, vector<1x8x25xbf16>
    %138 = vector.shape_cast %137 : vector<1x8x25xbf16> to vector<8x25xbf16>
    %139 = arith.extf %138 : vector<8x25xbf16> to vector<8x25xf32>
    %140 = vector.broadcast %136 : vector<1x1xf32> to vector<8x25xf32>
    %141 = arith.mulf %140, %139 : vector<8x25xf32>
    %cst_96 = arith.constant 1.000000e+00 : f32
    %142 = vector.broadcast %cst_96 : f32 to vector<1x1xf32>
    %143 = arith.subf %142, %136 : vector<1x1xf32>
    %144 = vector.broadcast %143 : vector<1x1xf32> to vector<8x25xf32>
    %145 = arith.mulf %144, %135 : vector<8x25xf32>
    %146 = arith.addf %141, %145 : vector<8x25xf32>
    %c0_97 = arith.constant 0 : index
    %c0_98 = arith.constant 0 : index
    %147 = vector.load %arg11[%c0_97, %c0_98] : memref<8x1xf32, #tpu.memory_space<vmem>>, vector<8x1xf32>
    %148 = vector.broadcast %147 : vector<8x1xf32> to vector<8x25xf32>
    %149 = arith.mulf %146, %148 : vector<8x25xf32>
    %c0_99 = arith.constant 0 : index
    %c0_100 = arith.constant 0 : index
    %150 = vector.load %arg12[%c0_99, %c0_100] : memref<8x1xf32, #tpu.memory_space<vmem>>, vector<8x1xf32>
    %151 = vector.broadcast %150 : vector<8x1xf32> to vector<8x25xf32>
    %152 = arith.addf %149, %151 : vector<8x25xf32>
    %c0_101 = arith.constant 0 : index
    %c0_102 = arith.constant 0 : index
    %c0_103 = arith.constant 0 : index
    %153 = vector.load %arg4[%c0_101, %c0_102, %c0_103] : memref<1x8x25xf32, #tpu.memory_space<vmem>>, vector<1x8x25xf32>
    %154 = vector.shape_cast %153 : vector<1x8x25xf32> to vector<8x25xf32>
    %155 = arith.addf %152, %154 : vector<8x25xf32>
    %cst_104 = arith.constant 0.000000e+00 : f32
    %156 = vector.broadcast %cst_104 : f32 to vector<8x25xf32>
    %157 = arith.maximumf %155, %156 : vector<8x25xf32>
    %c0_105 = arith.constant 0 : index
    %c0_106 = arith.constant 0 : index
    %c0_107 = arith.constant 0 : index
    %158 = vector.load %arg14[%c0_105, %c0_106, %c0_107] : memref<1x8x25xf32, #tpu.memory_space<vmem>>, vector<1x8x25xf32>
    %159 = vector.shape_cast %158 : vector<1x8x25xf32> to vector<8x25xf32>
    %160 = vector.shape_cast %157 : vector<8x25xf32> to vector<1x8x25xf32>
    tpu.vector_store %arg14[%c0_105, %c0_106, %c0_107], %160 {strides = array<i32>} : memref<1x8x25xf32, #tpu.memory_space<vmem>>, vector<1x8x25xf32>,
    return
  }
  func.func @transform_0(%arg0: i32) -> (i32, i32, i32) {
    %c0_i32 = arith.constant 0 : i32
    %c0_i32_0 = arith.constant 0 : i32
    %c0_i32_1 = arith.constant 0 : i32
    return %arg0, %c0_i32, %c0_i32_0 : i32, i32, i32
  }
  func.func @transform_1(%arg0: i32) -> (i32, i32, i32) {
    %c0_i32 = arith.constant 0 : i32
    %c0_i32_0 = arith.constant 0 : i32
    %c0_i32_1 = arith.constant 0 : i32
    return %arg0, %c0_i32, %c0_i32_0 : i32, i32, i32
  }
  func.func @transform_2(%arg0: i32) -> (i32, i32, i32) {
    %c0_i32 = arith.constant 0 : i32
    %c0_i32_0 = arith.constant 0 : i32
    %c0_i32_1 = arith.constant 0 : i32
    return %arg0, %c0_i32, %c0_i32_0 : i32, i32, i32
  }
  func.func @transform_3(%arg0: i32) -> (i32, i32, i32) {
    %c0_i32 = arith.constant 0 : i32
    %c0_i32_0 = arith.constant 0 : i32
    %c0_i32_1 = arith.constant 0 : i32
    return %arg0, %c0_i32, %c0_i32_0 : i32, i32, i32
  }
  func.func @transform_4(%arg0: i32) -> (i32, i32, i32) {
    %c0_i32 = arith.constant 0 : i32
    %c0_i32_0 = arith.constant 0 : i32
    %c0_i32_1 = arith.constant 0 : i32
    %c0_i32_2 = arith.constant 0 : i32
    return %c0_i32, %c0_i32_0, %c0_i32_1 : i32, i32, i32
  }
  func.func @transform_5(%arg0: i32) -> (i32, i32, i32) {
    %c0_i32 = arith.constant 0 : i32
    %c0_i32_0 = arith.constant 0 : i32
    %c0_i32_1 = arith.constant 0 : i32
    %c0_i32_2 = arith.constant 0 : i32
    return %c0_i32, %c0_i32_0, %c0_i32_1 : i32, i32, i32
  }
  func.func @transform_6(%arg0: i32) -> (i32, i32, i32) {
    %c0_i32 = arith.constant 0 : i32
    %c0_i32_0 = arith.constant 0 : i32
    %c0_i32_1 = arith.constant 0 : i32
    %c0_i32_2 = arith.constant 0 : i32
    return %c0_i32, %c0_i32_0, %c0_i32_1 : i32, i32, i32
  }
  func.func @transform_7(%arg0: i32) -> (i32, i32, i32) {
    %c0_i32 = arith.constant 0 : i32
    %c0_i32_0 = arith.constant 0 : i32
    %c0_i32_1 = arith.constant 0 : i32
    %c0_i32_2 = arith.constant 0 : i32
    return %c0_i32, %c0_i32_0, %c0_i32_1 : i32, i32, i32
  }
  func.func @transform_8(%arg0: i32) -> (i32, i32, i32) {
    %c0_i32 = arith.constant 0 : i32
    %c0_i32_0 = arith.constant 0 : i32
    %c0_i32_1 = arith.constant 0 : i32
    %c0_i32_2 = arith.constant 0 : i32
    return %c0_i32, %c0_i32_0, %c0_i32_1 : i32, i32, i32
  }
  func.func @transform_9(%arg0: i32) -> (i32, i32, i32) {
    %c0_i32 = arith.constant 0 : i32
    %c0_i32_0 = arith.constant 0 : i32
    %c0_i32_1 = arith.constant 0 : i32
    %c0_i32_2 = arith.constant 0 : i32
    return %c0_i32, %c0_i32_0, %c0_i32_1 : i32, i32, i32
  }
  func.func @transform_10(%arg0: i32) -> (i32, i32) {
    %c0_i32 = arith.constant 0 : i32
    %c0_i32_0 = arith.constant 0 : i32
    %c0_i32_1 = arith.constant 0 : i32
    return %c0_i32, %c0_i32_0 : i32, i32
  }
  func.func @transform_11(%arg0: i32) -> (i32, i32) {
    %c0_i32 = arith.constant 0 : i32
    %c0_i32_0 = arith.constant 0 : i32
    %c0_i32_1 = arith.constant 0 : i32
    return %c0_i32, %c0_i32_0 : i32, i32
  }
  func.func @transform_12(%arg0: i32) -> (i32, i32) {
    %c0_i32 = arith.constant 0 : i32
    %c0_i32_0 = arith.constant 0 : i32
    %c0_i32_1 = arith.constant 0 : i32
    return %c0_i32, %c0_i32_0 : i32, i32
  }
  func.func @transform_13(%arg0: i32) -> (i32, i32, i32) {
    %c0_i32 = arith.constant 0 : i32
    %c0_i32_0 = arith.constant 0 : i32
    %c0_i32_1 = arith.constant 0 : i32
    return %arg0, %c0_i32, %c0_i32_0 : i32, i32, i32
  }
}

</mosaic_0001>

<bundles_post_ra>
// kernel: _lambda_.7
= control target key start
LH: loop header
LB: loop body
LE: loop exit
PB: predicated region body
PF: predicated region fallthrough
CT: control target
= control target key end

     0   :  { %vm22_vm0 = vcmask 64512   ;;  %v361_v1 = vmov 0.0   ;;  %vm99_vm1 = vcmask 588800   ;;  %vm112_vm2 = vcmask 1043456   ;;  %s465_s1 = inlined_call_operand.vmem [shape: bf16[72,8], index: 1, kind: input, shape index: {}]   ;;  %s466_s0 = inlined_call_operand.vmem [shape: bf16[50,72], index: 0, kind: input, shape index: {}]   ;;  %s467_s2 = inlined_call_operand.vmem [shape: f32[1,8], index: 2, kind: input, shape index: {}]   ;;  %s468_s3 = inlined_call_operand.vmem [shape: f32[1,8], index: 3, kind: input, shape index: {}]   ;;  %s469_s4 = inlined_call_operand.vmem [shape: bf16[50,8], index: 4, kind: output, shape index: {}]  }
   0x1   :  { %v352_v0 = vld [vmem:[%s465_s1] sm:$0xff]   ;;  %25 = vst.msk [vmem:[#allocation2 + $0x10] sm:$0xff] %vm22_vm0, %v361_v1  ;;  %23 = vst.msk [vmem:[#allocation2] sm:$0xff] %vm22_vm0, %v361_v1  ;;  %v353_v2 = vld [vmem:[%s465_s1 + $0x8] sm:$0xff]   ;;  %vm29_vm3 = vcmask 58368   ;;  %vm270_vm4 = vcmask 60416  }
   0x2   :  { %24 = vst.msk [vmem:[#allocation2 + $0x8] sm:$0xff] %vm22_vm0, %v361_v1  ;;  %26 = vst.msk [vmem:[#allocation2 + $0x18] sm:$0xff] %vm22_vm0, %v361_v1  ;;  %321 = vmatprep.subr.bf16.mxu0 %v352_v0  ;;  %339 = vmatprep.subr.bf16.mxu1 %v352_v0  ;;  %v354_v3 = vld [vmem:[%s465_s1 + $0x10] sm:$0xff]   ;;  %v357_v4 = vld [vmem:[%s466_s0] sm:$0xff]   ;;  %vm277_vm5 = vcmask 57344  }
   0x3   :  { %27 = vst.msk [vmem:[#allocation2 + $0x20] sm:$0xff] %vm22_vm0, %v361_v1  ;;  %28 = vst.msk [vmem:[#allocation2 + $0x28] sm:$0xff] %vm22_vm0, %v361_v1  ;;  %322 = vmatpush3.bf16.msra.mxu0 %v352_v0  ;;  %344 = vmatpush3.bf16.msra.mxu1 %v352_v0  ;;  %v358_v5 = vld [vmem:[%s466_s0 + $0x10] sm:$0xff]   ;;  %v355_v6 = vld [vmem:[%s465_s1 + $0x18] sm:$0xff]  }
   0x4   :  { %323 = vmatprep.subr.bf16.mxu0 %v353_v2  ;;  %340 = vmatprep.subr.bf16.mxu1 %v353_v2  ;;  %v356_v7 = vld [vmem:[%s465_s1 + $0x20] ss:$0 sps:$4 sm:$0xff]   ;;  %v359_v9 = vld [vmem:[%s466_s0 + $0x8] sm:$0xff]   ;;  %v360_v10 = vld [vmem:[%s466_s0 + $0x18] ss:$0 sps:$4 sm:$0x11]  }
   0x5   :  { %331 = vmatprep.mubr.msk.bf16.mxu0 %vm99_vm1, %v357_v4  ;;  %335 = vmatprep.mubr.msk.bf16.mxu1 %vm99_vm1, %v358_v5  ;;  %v114_v8 = vsel %vm112_vm2, %v356_v7, 0  ;;  %30 = vst.msk [vmem:[#allocation2 + $0x30] sm:$0x3] %vm29_vm3, %v361_v1  ;;  %v296_v33 = vld [vmem:[%s467_s2] ss:$0 sm:$0xff] }
   0x6   :  { %v297_v35 = vld [vmem:[%s468_s3] ss:$0 sm:$0xff] }
   0x7   :  { %324 = vmatpush3.bf16.msra.mxu0 %v353_v2  ;;  %345 = vmatpush3.bf16.msra.mxu1 %v353_v2 }
   0x8   :  { %325 = vmatprep.subr.bf16.mxu0 %v354_v3  ;;  %341 = vmatprep.subr.bf16.mxu1 %v354_v3  ;;  %v33_v11 = vld [vmem:[#allocation2 + $0x10] sm:$0xff]  ;;  %v31_v13 = vld [vmem:[#allocation2] sm:$0xff] }
   0x9   :  { %v34_v17 = vld [vmem:[#allocation2 + $0x18] sm:$0xff]  ;;  %v32_v22 = vld [vmem:[#allocation2 + $0x8] sm:$0xff] }
   0xa   :  { %v35_v14 = vld [vmem:[#allocation2 + $0x20] sm:$0xff]  ;;  %v36_v23 = vld [vmem:[#allocation2 + $0x28] sm:$0xff] }
   0xb   :  { %326 = vmatpush3.bf16.msra.mxu0 %v354_v3  ;;  %346 = vmatpush3.bf16.msra.mxu1 %v354_v3 }
   0xc   :  { %327 = vmatprep.subr.bf16.mxu0 %v355_v6  ;;  %342 = vmatprep.subr.bf16.mxu1 %v355_v6  ;;  %v37_v12 = vld [vmem:[#allocation2 + $0x30] sm:$0x3] }
   0xf   :  { %328 = vmatpush3.bf16.msra.mxu0 %v355_v6  ;;  %347 = vmatpush3.bf16.msra.mxu1 %v355_v6 }
  0x10   :  { %349 = vmatprep.subr.msk.bf16.mxu0 %vm112_vm2, %v356_v7  ;;  %350 = vmatprep.subr.msk.bf16.mxu1 %vm112_vm2, %v356_v7 }
  0x13   :  { %330 = vmatpush3.bf16.msra.mxu0 %v114_v8  ;;  %348 = vmatpush3.bf16.msra.mxu1 %v114_v8 }
  0x16   :  { %332 = vmatmul.mubr.msk.bf16.vlgmr.msra.gmra.mrb[0].mxu0 %vm99_vm1, %v359_v9  ;;  %336 = vmatmul.mubr.msk.bf16.vlgmr.msra.gmra.mrb[0].mxu1 %vm99_vm1, %v360_v10 }
  0xe9   :  { %v333_v15 = vpop.f32.mrb[0].mxu0  ;;  %v337_v16 = vpop.f32.mrb[0].mxu1 }
  0xea   :  { %v182_v18 = vadd.f32 %v333_v15, %v33_v11  ;;  %v186_v19 = vadd.f32 %v337_v16, %v37_v12  ;;  %v150_v20 = vpop.f32.mrb[1].mxu0  ;;  %v166_v21 = vpop.f32.mrb[1].mxu1 }
  0xeb   :  { %v180_v24 = vadd.f32 %v150_v20, %v31_v13  ;;  %v184_v25 = vadd.f32 %v166_v21, %v35_v14  ;;  %v334_v26 = vpop.f32.mrb[2].mxu0  ;;  %v338_v27 = vpop.f32.mrb[2].mxu1 }
  0xec   :  { %190 = vst.msk [vmem:[#allocation2 + $0x10] sm:$0xff] %vm22_vm0, %v182_v18  ;;  %v183_v28 = vadd.f32 %v334_v26, %v34_v17  ;;  %v153_v29 = vpop.f32.mrb[3].mxu0  ;;  %v169_v30 = vpop.f32.mrb[3].mxu1 }
  0xed   :  { %195 = vst.msk [vmem:[#allocation2 + $0x30] sm:$0x3] %vm29_vm3, %v186_v19  ;;  %v181_v31 = vadd.f32 %v153_v29, %v32_v22  ;;  %v185_v32 = vadd.f32 %v169_v30, %v36_v23 }
  0xee   :  { %188 = vst.msk [vmem:[#allocation2] sm:$0xff] %vm22_vm0, %v180_v24  ;;  %192 = vst.msk [vmem:[#allocation2 + $0x20] sm:$0xff] %vm22_vm0, %v184_v25 }
  0xef   :  { %191 = vst.msk [vmem:[#allocation2 + $0x18] sm:$0xff] %vm22_vm0, %v183_v28  ;;  %189 = vst.msk [vmem:[#allocation2 + $0x8] sm:$0xff] %vm22_vm0, %v181_v31 }
  0xf0   :  { %193 = vst.msk [vmem:[#allocation2 + $0x28] sm:$0xff] %vm22_vm0, %v185_v32 }
  0xf3   :  { %v201_v34 = vld [vmem:[#allocation2 + $0x10] sm:$0xff] }
  0xf4   :  { %v205_v36 = vld [vmem:[#allocation2 + $0x30] sm:$0x3]  ;;  %v215_v37 = vmul.f32 %v296_v33, %v201_v34 }
  0xf5   :  { %v219_v38 = vmul.f32 %v296_v33, %v205_v36  ;;  %v199_v39 = vld [vmem:[#allocation2] sm:$0xff] }
  0xf6   :  { %v203_v40 = vld [vmem:[#allocation2 + $0x20] sm:$0xff]  ;;  %v213_v41 = vmul.f32 %v296_v33, %v199_v39  ;;  %v202_v43 = vld [vmem:[#allocation2 + $0x18] sm:$0xff]  ;;  %v229_v44 = vadd.f32 %v297_v35, %v215_v37  ;;  %v200_v47 = vld [vmem:[#allocation2 + $0x8] sm:$0xff] }
  0xf7   :  { %v217_v42 = vmul.f32 %v296_v33, %v203_v40  ;;  %v233_v45 = vadd.f32 %v297_v35, %v219_v38  ;;  %v216_v46 = vmul.f32 %v296_v33, %v202_v43  ;;  %v204_v48 = vld [vmem:[#allocation2 + $0x28] sm:$0xff]  ;;  %v214_v51 = vmul.f32 %v296_v33, %v200_v47 }
  0xf8   :  { %v227_v49 = vadd.f32 %v297_v35, %v213_v41  ;;  %v218_v52 = vmul.f32 %v296_v33, %v204_v48  ;;  %v236_v53 = vmax.f32 %v229_v44, 0.0 }
  0xf9   :  { %v231_v50 = vadd.f32 %v297_v35, %v217_v42  ;;  %v240_v54 = vmax.f32 %v233_v45, 0.0  ;;  %v230_v55 = vadd.f32 %v297_v35, %v216_v46  ;;  %v228_v58 = vadd.f32 %v297_v35, %v214_v51 }
  0xfa   :  { %v234_v56 = vmax.f32 %v227_v49, 0.0  ;;  %v232_v59 = vadd.f32 %v297_v35, %v218_v52  ;;  %v307_v60 = vpack.c.bf16 %v236_v53, %v236_v53 }
  0xfb   :  { %v238_v57 = vmax.f32 %v231_v50, 0.0  ;;  %v311_v61 = vpack.c.bf16 %v240_v54, %v240_v54  ;;  %v237_v62 = vmax.f32 %v230_v55, 0.0  ;;  %v235_v1 = vmax.f32 %v228_v58, 0.0 }
  0xfc   :  { %v305_v63 = vpack.c.bf16 %v234_v56, %v234_v56  ;;  %v239_v2 = vmax.f32 %v232_v59, 0.0  ;;  %273 = vst.msk [vmem:[%s469_s4 + $0x8] sm:$0xf] %vm270_vm4, %v307_v60 }
  0xfd   :  { %v309_v0 = vpack.c.bf16 %v238_v57, %v238_v57  ;;  %278 = vst.msk [vmem:[%s469_s4 + $0x18] sm:$0x1] %vm277_vm5, %v311_v61  ;;  %v308_v3 = vpack.c.bf16 %v237_v62, %v237_v62  ;;  %v306_v4 = vpack.c.bf16 %v235_v1, %v235_v1 }
  0xfe   :  { %271 = vst.msk [vmem:[%s469_s4] sm:$0xf] %vm270_vm4, %v305_v63  ;;  %v310_v5 = vpack.c.bf16 %v239_v2, %v239_v2 }
  0xff   :  { %275 = vst.msk [vmem:[%s469_s4 + $0x10] sm:$0xf] %vm270_vm4, %v309_v0  ;;  %274 = vst.msk [vmem:[%s469_s4 + $0xc] sm:$0xf] %vm270_vm4, %v308_v3 }
 0x100   :  { %272 = vst.msk [vmem:[%s469_s4 + $0x4] sm:$0xf] %vm270_vm4, %v306_v4  ;;  %276 = vst.msk [vmem:[%s469_s4 + $0x14] sm:$0xf] %vm270_vm4, %v310_v5 }

// kernel: _lambda_.8
= control target key start
LH: loop header
LB: loop body
LE: loop exit
PB: predicated region body
PF: predicated region fallthrough
CT: control target
= control target key end

     0   :  { %s475_s12 = smov 0   ;;  %s477_s13 = smov 0   ;;  %s524_s0 = inlined_call_operand.vmem [shape: bf16[2,10,25], index: 0, kind: input, shape index: {}]   ;;  %s525_s1 = inlined_call_operand.vmem [shape: f32[3,25], index: 1, kind: input, shape index: {}]   ;;  %s526_s2 = inlined_call_operand.vmem [shape: f32[1,25], index: 2, kind: input, shape index: {}]   ;;  %s527_s3 = inlined_call_operand.vmem [shape: bf16[2,8,25], index: 3, kind: output, shape index: {}]  }
   0x1   :  { %s479_s14 = smov 0  }
   0x2 LB: > { %s25_s15 = sadd.s32 1, %s449_s13  ;;  %p396_p0 = scmp.ge.s32.totalorder %s453_s14, 1  ;;  %s453_s14 = sphi %s479_s14, %s13_s14   ;;  %s449_s13 = sphi %s477_s13, %s529_s13   ;;  %s445_s12 = sphi %s475_s12, %s528_s12  }
   0x3   : > { %p27_p1 = scmp.ge.s32.totalorder %s25_s15, 2  ;;  %p173_p2 = scmp.lt.s32.totalorder %s453_s14, 3 }
   0x5   : > { %s531_s15 = smov (%p27_p1, %s25_s15), 0  ;;  %p174_p3 = pnand %p396_p0, %p173_p2 }
   0x6   : > { %p209_p4 = scmp.lt.s32.totalorder (!%p174_p3), %s445_s12, 1  ;;  %v401_v0 = vld [vmem:[%s525_s1] ss:$0 sm:$0xff] (!%p174_p3)  ;;  %v402_v1 = vld [vmem:[%s525_s1 + $0x1] ss:$0 sm:$0xff] (!%p174_p3)  ;;  %vm259_vm0 = vcmask (!%p174_p3), 1046528  }
   0x7   : > { %177 = sbr.rel (%p174_p3) target bundleno = 32 (0x20), region = 32  ;;  %v403_v2 = vld [vmem:[%s525_s1 + $0x2] ss:$0 sm:$0xff] (!%p174_p3)  ;;  %v400_v9 = vld [vmem:[%s526_s2] ss:$0 sm:$0xff] (!%p174_p3)  ;;  %vm276_vm1 = vcmask (!%p174_p3), 1045504  }
   0x8   : > { %vm283_vm2 = vcmask (!%p174_p3), 199680  }
   0xe   : > { %s533_s12 = smov (!%p209_p4, %s445_s12), 1 }
   0xf   : > { %s406_s16 = sshll.u32 %s533_s12, 3  ;;  %s399_s28 = sshll.u32 %s533_s12, 2 }
  0x10   : > { %s216_s19 = scalar_lea.vmem %s524_s0, %s406_s16  ;;  %s230_s4 = scalar_lea.vmem %s527_s3, %s399_s28 }
  0x11   : > { %v239_v3 = vld [vmem:[%s216_s19] sm:$0xf]  ;;  %v248_v4 = vld [vmem:[%s216_s19 + $0x4] sm:$0x1] }
  0x12   : > { %v265_v5 = vld [vmem:[%s216_s19] sm:$0xe]  ;;  %v240_v6 = vunpack.c.l.bf16 %v239_v3  ;;  %v249_v7 = vunpack.c.l.bf16 %v248_v4 }
  0x13   : > { %v266_v8 = vunpack.c.l.bf16 %v265_v5 }
  0x14   : > { %v246_v10 = vmul.f32 %v401_v0, %v240_v6  ;;  %v255_v11 = vmul.f32 %v402_v1, %v240_v6  ;;  %v256_v12 = vmul.f32 %v402_v1, %v249_v7  ;;  %v273_v14 = vmul.f32 %v403_v2, %v249_v7 }
  0x15   : > { %v272_v13 = vmul.f32 %v403_v2, %v266_v8 }
  0x16   : > { %v247_v15 = vadd.f32 %v400_v9, %v246_v10  ;;  %v260_v16 = vrot.slane %v255_v11, 1  ;;  %v261_v17 = vrot.slane %v256_v12, 1  ;;  %v278_v19 = vrot.slane %v273_v14, 2 }
  0x17   : > { %v277_v18 = vrot.slane %v272_v13, 2 }
  0x18   : > { %v262_v20 = vsel %vm259_vm0, %v260_v16, %v261_v17 }
  0x19   : > { %v264_v21 = vadd.f32 %v262_v20, %v247_v15  ;;  %v279_v22 = vsel %vm276_vm1, %v277_v18, %v278_v19 }
  0x1b   : > { %v281_v23 = vadd.f32 %v279_v22, %v264_v21 }
  0x1d   : > { %v282_v24 = vpack.c.bf16 %v281_v23, %v281_v23 }
  0x1f   : > { %284 = vst.msk [vmem:[%s230_s4] sm:$0xf] %vm283_vm2, %v282_v24 }
  0x20 PF: > { %s13_s14 = sadd.s32 1, %s453_s14   ;;  %s528_s12 = smov %s449_s13 }
  0x21   : > { %p10_p5 = scmp.ge.s32.totalorder %s13_s14, 4   ;;  %s529_s13 = smov %s531_s15 }
  0x23   :  { %12 = sbr.rel (!%p10_p5) target bundleno = 2 (0x2), region = 68 }

// kernel: squeeze.9
= control target key start
LH: loop header
LB: loop body
LE: loop exit
PB: predicated region body
PF: predicated region fallthrough
CT: control target
= control target key end

     0   :  { %vm3_vm0 = vcmask 72704   ;;  %s73_s0 = inlined_call_operand.vmem [shape: f32[12,9,1,1], index: 0, kind: input, shape index: {}]   ;;  %s74_s1 = inlined_call_operand.vmem [shape: f32[4,3,9], index: 1, kind: output, shape index: {}]  }
   0x1   :  { %v2_v0 = vld [vmem:[%s73_s0] sm:$0xff]   ;;  %v41_v1 = vld [vmem:[%s73_s0 + $0x8] sm:$0xf]  }
   0x2   :  { %4 = vst.msk [vmem:[#allocation0] sm:$0x7] %vm3_vm0, %v2_v0   ;;  %6 = vst.msk [vmem:[#allocation0 + $0x5] sm:$0x38] %vm3_vm0, %v2_v0  }
   0x3   :  { %8 = vst.msk [vmem:[#allocation0 + $0xa] sm:$0xc0] %vm3_vm0, %v2_v0   ;;  %13 = vst.msk [vmem:[#allocation0 + $0x12] ss:$6 sm:$0x3] %vm3_vm0, %v41_v1  }
   0x4   :  { %15 = vst.msk [vmem:[#allocation0 + $0x17] sm:$0xc] %vm3_vm0, %v41_v1  }
   0x9   :  { %v19_v2 = vld [vmem:[#allocation0] sm:$0xf]  ;;  %v23_v3 = vld [vmem:[#allocation0 + $0x8] sm:$0xf] }
   0xa   :  { %v28_v4 = vld [vmem:[#allocation0 + $0x10] sm:$0xf]  ;;  %21 = vst [vmem:[%s74_s1] sm:$0xf] %v19_v2  ;;  %42 = vst [vmem:[%s74_s1 + $0x4] sm:$0xf] %v23_v3 }
   0xb   :  { %43 = vst [vmem:[%s74_s1 + $0x8] sm:$0xf] %v28_v4  ;;  %v34_v5 = vld [vmem:[#allocation0 + $0x18] sm:$0xf] }
   0xc   :  { %44 = vst [vmem:[%s74_s1 + $0xc] sm:$0xf] %v34_v5 }

// kernel: squeeze.10
= control target key start
LH: loop header
LB: loop body
LE: loop exit
PB: predicated region body
PF: predicated region fallthrough
CT: control target
= control target key end

     0   :  { %vm16_vm0 = vcmask 64512   ;;  %s61_s0 = inlined_call_operand.vmem [shape: f32[8,3,3], index: 0, kind: input, shape index: {}]   ;;  %s62_s1 = inlined_call_operand.vmem [shape: f32[8,9], index: 1, kind: output, shape index: {}]  }
   0x1   :  { %v29_v0 = vld [vmem:[%s61_s0 + $0x8] sm:$0xf]  ;;  %v30_v1 = vld [vmem:[%s61_s0 + $0x4] sm:$0xf]  ;;  %v13_v2 = vld [vmem:[%s61_s0] sm:$0xf] }
   0x2   :  { %8 = vst [vmem:[#allocation0 + $0x10] sm:$0xf] %v29_v0  ;;  %12 = vst [vmem:[#allocation0 + $0x8] sm:$0xf] %v30_v1 }
   0x3   :  { %14 = vst [vmem:[#allocation0] sm:$0xf] %v13_v2 }
   0x9   :  { %v19_v4 = vld [vmem:[#allocation0 + $0x8] sm:$0x7]   ;;  %v24_v5 = vld [vmem:[#allocation0 + $0x10] sm:$0x7]  }
   0xa   :  { %v15_v3 = vld [vmem:[#allocation0] sm:$0x7]   ;;  %31 = vst.msk [vmem:[%s62_s1 + $0x3] sm:$0x7] %vm16_vm0, %v19_v4   ;;  %32 = vst.msk [vmem:[%s62_s1 + $0x6] sm:$0x7] %vm16_vm0, %v24_v5  }
   0xb   :  { %17 = vst.msk [vmem:[%s62_s1] sm:$0x7] %vm16_vm0, %v15_v3  }

// kernel: _lambda_.9
= control target key start
LH: loop header
LB: loop body
LE: loop exit
PB: predicated region body
PF: predicated region fallthrough
CT: control target
= control target key end

     0   :  { %s760_s21 = smov 0   ;;  %s799_s0 = inlined_call_operand.vmem [shape: bf16[4,18,16], index: 0, kind: input, shape index: {}]   ;;  %s800_s1 = inlined_call_operand.vmem [shape: bf16[4,9,18], index: 1, kind: input, shape index: {}]   ;;  %s801_s2 = inlined_call_operand.vmem [shape: f32[4,9,1], index: 2, kind: input, shape index: {}]   ;;  %s802_s3 = inlined_call_operand.vmem [shape: f32[4,9,1], index: 3, kind: input, shape index: {}]   ;;  %s803_s4 = inlined_call_operand.vmem [shape: f32[4,3,9], index: 4, kind: input, shape index: {}]   ;;  %s804_s5 = inlined_call_operand.vmem [shape: f32[4,3,1], index: 5, kind: input, shape index: {}]   ;;  %s805_s6 = inlined_call_operand.vmem [shape: f32[4,3,16], index: 6, kind: output, shape index: {}]  }
   0x1 LB: > { %s642_s22 = sadd.s32 4294967295, %s718_s21   ;;  %p646_p0 = scmp.ge.s32.totalorder %s718_s21, 1  ;;  %s718_s21 = sphi %s760_s21, %s16_s21  }
   0x2   : > { %p260_p1 = scmp.lt.s32.totalorder %s718_s21, 5 }
   0x4   : > { %p261_p2 = pnand %p646_p0, %p260_p1 }
   0x5   : > { %p312_p3 = scmp.lt.s32.totalorder (!%p261_p2), %s642_s22, 3  ;;  %v720_v0 = vmov (!%p261_p2), 0.0   ;;  %vm721_vm0 = vmmov (!%p261_p2), 0   ;;  %v722_v1 = vmov (!%p261_p2), 0   ;;  %vm368_vm1 = vcmask (!%p261_p2), 1040384  }
   0x6   : > { %264 = sbr.rel (%p261_p2) target bundleno = 465 (0x1d1), region = 44  ;;  %674 = vmatprep.subr.bf16.mxu0 (!%p261_p2), %v720_v0  ;;  %678 = vmatprep.mubr.msk.bf16.mxu0 (!%p261_p2), %vm721_vm0, %v720_v0  ;;  %vm364_vm2 = vcmask (!%p261_p2), 146432   ;;  %v723_v11 = vmov (!%p261_p2), 0.0|0.0   ;;  %vm724_vm3 = vmmov (!%p261_p2), 1   ;;  %vm450_vm5 = vcmask (!%p261_p2), 72704  }
   0x7   : > { %707 = vset.pattern.permute.xlu0 (!%p261_p2), %v722_v1  ;;  %708 = vset.pattern.permute.xlu1 (!%p261_p2), %v722_v1  ;;  %vm691_vm4 = vmpackc.low (!%p261_p2), %vm368_vm1, %vm724_vm3  ;;  %vm527_vm6 = vcmask (!%p261_p2), 124928  }
   0x8   : > { %686 = vmatprep.mubr.msk.f32.mxu1 (!%p261_p2), %vm721_vm0, %v720_v0  ;;  %689 = vmatprep.subr.bf16.mxu1 (!%p261_p2), %v723_v11 }
   0xd   : > { %s807_s22 = smov (!%p312_p3, %s642_s22), 3 }
   0xe   : > { %s693_s23 = smul.u32 12, %s807_s22  ;;  %s665_s24 = sshll.u32 %s807_s22, 3 }
   0xf   : > { %s321_s27 = scalar_lea.vmem %s800_s1, %s665_s24  ;;  %s666_s28 = sshll.u32 %s807_s22, 4 }
  0x10   : > { %s316_s7 = scalar_lea.vmem %s799_s0, %s693_s23  ;;  %s326_s10 = scalar_lea.vmem %s801_s2, %s666_s28  ;;  %v711_v9 = vld [vmem:[%s321_s27] sm:$0x1f]  }
  0x11   : > { %v709_v2 = vld [vmem:[%s316_s7] sm:$0xff]   ;;  %s331_s13 = scalar_lea.vmem %s802_s3, %s666_s28  ;;  %s780_s14 = sshll.u32 %s807_s22, 2  ;;  %v710_v3 = vld [vmem:[%s316_s7 + $0x8] ss:$0 sps:$4 sm:$0x11]  }
  0x12   : > { %v413_v4 = vld [vmem:[%s326_s10] sm:$0xff]  ;;  %675 = vmatpush3.bf16.msra.mxu0 %v709_v2  ;;  %v370_v6 = vsel %vm368_vm1, %v710_v3, 0  ;;  %v414_v7 = vld [vmem:[%s326_s10 + $0x8] sm:$0x1]  ;;  %s339_s17 = scalar_lea.vmem %s804_s5, %s780_s14  ;;  %s335_s20 = scalar_lea.vmem %s803_s4, %s780_s14 }
  0x13   : > { %417 = vperm.xlu0 %707, %v413_v4   ;;  %v427_v5 = vld [vmem:[%s331_s13] sm:$0xff]  ;;  %676 = vmatprep.subr.bf16.mxu0 %v720_v0  ;;  %v428_v8 = vld [vmem:[%s331_s13 + $0x8] sm:$0x1]  ;;  %s343_s24 = scalar_lea.vmem %s805_s6, %s780_s14 }
  0x14   : > { %431 = vperm.xlu1 %708, %v427_v5   ;;  %v444_v10 = vld [vmem:[%s339_s17] sm:$0x7] }
  0x15   : > { %v443_v27 = vld [vmem:[%s335_s20] sm:$0x7] }
  0x16   : > { %677 = vmatpush3.bf16.msra.mxu0 %v370_v6 }
  0x17   : > { %422 = vperm.xlu0 %707, %v414_v7  }
  0x18   : > { %436 = vperm.xlu1 %708, %v428_v8  }
  0x19   : > { %679 = vmatmul.mubr.msk.bf16.vlgmr.msra.gmra.mrb[0].mxu0 %vm364_vm2, %v711_v9 }
  0x1b   : > { %447 = vperm.xlu0 %707, %v444_v10  }
  0x92   : > { %v418_v12 = vpop.permute.xlu0 %417 }
  0x93   : > { %v432_v13 = vpop.permute.xlu1 %431 }
  0x96   : > { %v423_v17 = vpop.permute.xlu0 %422 }
  0x97   : > { %v437_v22 = vpop.permute.xlu1 %436 }
  0x9a   : > { %v448_v28 = vpop.permute.xlu0 %447 }
  0xec   : > { %v406_v14 = vpop.f32.mrb[0].mxu0 }
  0xed   : > { %v425_v15 = vmul.f32 %v418_v12, %v406_v14  ;;  %v680_v16 = vpop.f32.mrb[1].mxu0 }
  0xee   : > { %v409_v18 = vpop.f32.mrb[2].mxu0 }
  0xef   : > { %v439_v19 = vadd.f32 %v432_v13, %v425_v15  ;;  %v426_v20 = vmul.f32 %v423_v17, %v409_v18  ;;  %v681_v21 = vpop.f32.mrb[3].mxu0 }
  0xf1   : > { %v440_v23 = vadd.f32 %v437_v22, %v426_v20  ;;  %v441_v24 = vmax.f32 %v439_v19, 0.0 }
  0xf3   : > { %v442_v25 = vmax.f32 %v440_v23, 0.0 }
  0xf5   : > { %v690_v26 = vpack.c.bf16 %v442_v25, %v441_v24 }
  0xf7   : > { %692 = vmatpush3.bf16.msk.msra.mxu1 %vm691_vm4, %v690_v26 }
  0xfa   : > { %687 = vmatmul.mubr.msk.f32.vlgmr.msra.gmra.mrb[0].mxu1 %vm450_vm5, %v443_v27 }
 0x1cd   : > { %v523_v29 = vpop.f32.mrb[0].mxu1 }
 0x1ce   : > { %v524_v30 = vadd.f32 %v523_v29, %v448_v28  ;;  %v688_v31 = vpop.f32.mrb[1].mxu1 }
 0x1d0   : > { %528 = vst.msk [vmem:[%s343_s24] sm:$0x7] %vm527_vm6, %v524_v30 }
 0x1d1 PF: > { %s16_s21 = sadd.s32 1, %s718_s21  }
 0x1d2   : > { %p13_p4 = scmp.ge.s32.totalorder %s16_s21, 6  }
 0x1d4   :  { %15 = sbr.rel (!%p13_p4) target bundleno = 1 (0x1), region = 89 }

// kernel: _lambda_.10
= control target key start
LH: loop header
LB: loop body
LE: loop exit
PB: predicated region body
PF: predicated region fallthrough
CT: control target
= control target key end

     0   :  { %s877_s15 = smov 0   ;;  %s879_s16 = smov 0   ;;  %s1093_s0 = inlined_call_operand.vmem [shape: bf16[2,7,7,8], index: 0, kind: input, shape index: {}]   ;;  %s1094_s1 = inlined_call_operand.vmem [shape: f32[9,1,8], index: 1, kind: input, shape index: {}]   ;;  %s1095_s2 = inlined_call_operand.vmem [shape: f32[1,8], index: 2, kind: input, shape index: {}]   ;;  %s1096_s3 = inlined_call_operand.vmem [shape: f32[1,8], index: 3, kind: input, shape index: {}]   ;;  %s1097_s4 = inlined_call_operand.vmem [shape: bf16[2,5,5,8], index: 4, kind: output, shape index: {}]  }
   0x1   :  { %s881_s17 = smov 0  }
   0x2 LB: > { %s26_s18 = sadd.s32 1, %s846_s16  ;;  %p758_p0 = scmp.ge.s32.totalorder %s850_s17, 1  ;;  %s850_s17 = sphi %s881_s17, %s14_s17   ;;  %s846_s16 = sphi %s879_s16, %s1101_s16   ;;  %s842_s15 = sphi %s877_s15, %s1100_s15  }
   0x3   : > { %p28_p1 = scmp.ge.s32.totalorder %s26_s18, 2  ;;  %p205_p2 = scmp.lt.s32.totalorder %s850_s17, 3 }
   0x5   : > { %s1103_s18 = smov (%p28_p1, %s26_s18), 0  ;;  %p206_p3 = pnand %p758_p0, %p205_p2 }
   0x6   : > { %p246_p4 = scmp.lt.s32.totalorder (!%p206_p3), %s842_s15, 1  ;;  %v901_v0 = vld [vmem:[%s1094_s1] ss:$0 sm:$0xff] (!%p206_p3)  ;;  %v906_v1 = vld [vmem:[%s1094_s1 + $0x1] ss:$0 sm:$0xff] (!%p206_p3)  ;;  %vm613_vm0 = vcmask (!%p206_p3), 59392  }
   0x7   : > { %209 = sbr.rel (%p206_p3) target bundleno = 76 (0x4c), region = 36  ;;  %v911_v2 = vld [vmem:[%s1094_s1 + $0x2] ss:$0 sm:$0xff] (!%p206_p3)  ;;  %v921_v3 = vld [vmem:[%s1094_s1 + $0x3] ss:$0 sm:$0xff] (!%p206_p3) }
   0x8   : > { %v926_v4 = vld [vmem:[%s1094_s1 + $0x4] ss:$0 sm:$0xff] (!%p206_p3)  ;;  %v931_v5 = vld [vmem:[%s1094_s1 + $0x5] ss:$0 sm:$0xff] (!%p206_p3)  ;;  %v942_v17 = vld [vmem:[%s1094_s1 + $0x6] ss:$0 sm:$0xff] (!%p206_p3) }
   0x9   : > { %v951_v23 = vld [vmem:[%s1094_s1 + $0x7] ss:$0 sm:$0xff] (!%p206_p3)  ;;  %v956_v24 = vld [vmem:[%s1094_s1 + $0x8] ss:$0 sm:$0xff] (!%p206_p3)  ;;  %vm614_vm1 = vsmask.f32 (!%p206_p3), 2304 }
   0xa   : > { %vm1033_vm2 = vmand (!%p206_p3), %vm613_vm0, %vm614_vm1 }
   0xe   : > { %s1105_s15 = smov (!%p246_p4, %s842_s15), 1 }
   0xf   : > { %s802_s19 = smul.u32 28, %s1105_s15 }
  0x11   : > { %s916_s28 = scalar_lea.vmem %s1093_s0, %s802_s19  ;;  %s803_s19 = smul.u32 20, %s1105_s15 }
  0x12   : > { %v271_v6 = vld [vmem:[%s916_s28] sm:$0x7]  ;;  %v766_v8 = vld [vmem:[%s916_s28 + $0x4] sm:$0x7]  ;;  %v782_v13 = vld [vmem:[%s916_s28 + $0x8] sm:$0x7] }
  0x13   : > { %v331_v7 = vld [vmem:[%s916_s28] sm:$0xe]  ;;  %v276_v9 = vunpack.c.l.bf16 %v271_v6  ;;  %v380_v11 = vunpack.c.l.bf16 %v766_v8  ;;  %v775_v12 = vld [vmem:[%s916_s28 + $0x4] sm:$0xe]  ;;  %v791_v14 = vld [vmem:[%s916_s28 + $0x8] sm:$0xe]  ;;  %v485_v16 = vunpack.c.l.bf16 %v782_v13  ;;  %s1023_s25 = scalar_lea.vmem %s1097_s4, %s803_s19 }
  0x14   : > { %v336_v10 = vunpack.c.l.bf16 %v331_v7  ;;  %v441_v15 = vunpack.c.l.bf16 %v775_v12  ;;  %v546_v18 = vunpack.c.l.bf16 %v791_v14  ;;  %v272_v19 = vld [vmem:[%s916_s28 + $0x4] sm:$0x7]  ;;  %v767_v29 = vld [vmem:[%s916_s28 + $0x8] sm:$0x7]  ;;  %v783_v35 = vld [vmem:[%s916_s28 + $0xc] sm:$0x7] }
  0x15   : > { %v288_v20 = vmul.f32 %v901_v0, %v276_v9  ;;  %v306_v21 = vmul.f32 %v906_v1, %v276_v9  ;;  %v332_v25 = vld [vmem:[%s916_s28 + $0x4] sm:$0xe]  ;;  %v393_v26 = vmul.f32 %v921_v3, %v380_v11  ;;  %v411_v27 = vmul.f32 %v926_v4, %v380_v11  ;;  %v776_v34 = vld [vmem:[%s916_s28 + $0x8] sm:$0xe]  ;;  %v792_v40 = vld [vmem:[%s916_s28 + $0xc] sm:$0xe] }
  0x16   : > { %v349_v22 = vmul.f32 %v911_v2, %v336_v10  ;;  %v454_v28 = vmul.f32 %v931_v5, %v441_v15  ;;  %v498_v32 = vmul.f32 %v942_v17, %v485_v16  ;;  %v277_v33 = vunpack.c.l.bf16 %v272_v19  ;;  %v273_v41 = vld [vmem:[%s916_s28 + $0x8] sm:$0x7]  ;;  %v768_v63 = vld [vmem:[%s916_s28 + $0xc] sm:$0x7]  ;;  %v784_v11 = vld [vmem:[%s916_s28 + $0x10] sm:$0x7] }
  0x17   : > { %v316_v30 = vrot.slane %v306_v21, 1  ;;  %v421_v36 = vrot.slane %v411_v27, 1  ;;  %v967_v37 = vmul.f32 %v951_v23, %v485_v16  ;;  %v970_v38 = vmul.f32 %v956_v24, %v546_v18  ;;  %v333_v58 = vld [vmem:[%s916_s28 + $0x8] sm:$0xe]  ;;  %v777_v6 = vld [vmem:[%s916_s28 + $0xc] sm:$0xe] }
  0x18   : > { %v359_v31 = vrot.slane %v349_v22, 2  ;;  %v337_v39 = vunpack.c.l.bf16 %v332_v25  ;;  %v464_v43 = vrot.slane %v454_v28, 2  ;;  %v289_v44 = vmul.f32 %v901_v0, %v277_v33 }
  0x19   : > { %v326_v42 = vadd.f32 %v316_v30, %v288_v20  ;;  %v307_v45 = vmul.f32 %v906_v1, %v277_v33  ;;  %v381_v47 = vunpack.c.l.bf16 %v767_v29  ;;  %v442_v48 = vunpack.c.l.bf16 %v776_v34  ;;  %v274_v33 = vld [vmem:[%s916_s28 + $0xc] sm:$0x7] }
  0x1a   : > { %v350_v46 = vmul.f32 %v911_v2, %v337_v39  ;;  %v486_v49 = vunpack.c.l.bf16 %v783_v35  ;;  %v547_v52 = vunpack.c.l.bf16 %v792_v40  ;;  %v278_v53 = vunpack.c.l.bf16 %v273_v41  ;;  %v769_v39 = vld [vmem:[%s916_s28 + $0x10] sm:$0x7] }
  0x1b   : > { %v369_v50 = vadd.f32 %v359_v31, %v326_v42  ;;  %v317_v51 = vrot.slane %v307_v45, 1  ;;  %v526_v54 = vrot.slane %v967_v37, 1  ;;  %v412_v56 = vmul.f32 %v926_v4, %v381_v47  ;;  %v793_v31 = vld [vmem:[%s916_s28 + $0x10] sm:$0xe] }
  0x1c   : > { %v360_v55 = vrot.slane %v350_v46, 2  ;;  %v455_v57 = vmul.f32 %v931_v5, %v442_v48  ;;  %v569_v60 = vrot.slane %v970_v38, 2  ;;  %v394_v62 = vmul.f32 %v921_v3, %v381_v47  ;;  %v334_v38 = vld [vmem:[%s916_s28 + $0xc] sm:$0xe] }
  0x1d   : > { %v398_v59 = vadd.f32 %v393_v26, %v369_v50  ;;  %v327_v61 = vadd.f32 %v317_v51, %v289_v44  ;;  %v422_v7 = vrot.slane %v412_v56, 1  ;;  %v499_v8 = vmul.f32 %v942_v17, %v486_v49 }
  0x1e   : > { %v517_v9 = vmul.f32 %v951_v23, %v486_v49  ;;  %v988_v10 = vmul.f32 %v956_v24, %v547_v52  ;;  %v290_v14 = vmul.f32 %v901_v0, %v278_v53  ;;  %v308_v15 = vmul.f32 %v906_v1, %v278_v53 }
  0x1f   : > { %v431_v12 = vadd.f32 %v421_v36, %v398_v59  ;;  %v370_v13 = vadd.f32 %v360_v55, %v327_v61  ;;  %v465_v16 = vrot.slane %v455_v57, 2  ;;  %v338_v18 = vunpack.c.l.bf16 %v333_v58  ;;  %v778_v57 = vld [vmem:[%s916_s28 + $0x10] sm:$0xe] }
  0x20   : > { %v382_v19 = vunpack.c.l.bf16 %v768_v63  ;;  %v443_v20 = vunpack.c.l.bf16 %v777_v6  ;;  %v318_v25 = vrot.slane %v308_v15, 1  ;;  %v487_v26 = vunpack.c.l.bf16 %v784_v11  ;;  %v785_v63 = vld [vmem:[%s916_s28 + $0x14] sm:$0x7] }
  0x21   : > { %v474_v21 = vadd.f32 %v464_v43, %v431_v12  ;;  %v399_v22 = vadd.f32 %v394_v62, %v370_v13  ;;  %v527_v27 = vrot.slane %v517_v9, 1  ;;  %v570_v28 = vrot.slane %v988_v10, 2  ;;  %v794_v9 = vld [vmem:[%s916_s28 + $0x14] sm:$0xe] }
  0x22   : > { %v351_v29 = vmul.f32 %v911_v2, %v338_v18  ;;  %v413_v30 = vmul.f32 %v926_v4, %v382_v19  ;;  %v328_v36 = vadd.f32 %v318_v25, %v290_v14  ;;  %v456_v37 = vmul.f32 %v931_v5, %v443_v20  ;;  %v616_v20 = vld [vmem:[%s1023_s25] sm:$0x7] }
  0x23   : > { %v503_v34 = vadd.f32 %v498_v32, %v474_v21  ;;  %v432_v35 = vadd.f32 %v422_v7, %v399_v22  ;;  %v395_v41 = vmul.f32 %v921_v3, %v382_v19  ;;  %v500_v42 = vmul.f32 %v942_v17, %v487_v26  ;;  %v1008_v32 = vld [vmem:[%s1095_s2] ss:$0 sm:$0xff] }
  0x24   : > { %v361_v40 = vrot.slane %v351_v29, 2  ;;  %v518_v43 = vmul.f32 %v951_v23, %v487_v26  ;;  %v548_v46 = vunpack.c.l.bf16 %v793_v31  ;;  %v279_v47 = vunpack.c.l.bf16 %v274_v33  ;;  %v335_v33 = vld [vmem:[%s916_s28 + $0x10] sm:$0xe] }
  0x25   : > { %v536_v44 = vadd.f32 %v526_v54, %v503_v34  ;;  %v475_v45 = vadd.f32 %v465_v16, %v432_v35  ;;  %v423_v49 = vrot.slane %v413_v30, 1  ;;  %v339_v50 = vunpack.c.l.bf16 %v334_v38  ;;  %v1014_v54 = vld [vmem:[%s1096_s3] ss:$0 sm:$0xff]  ;;  %v770_v38 = vld [vmem:[%s916_s28 + $0x14] sm:$0x7] }
  0x26   : > { %v371_v48 = vadd.f32 %v361_v40, %v328_v36  ;;  %v383_v51 = vunpack.c.l.bf16 %v769_v39  ;;  %v466_v55 = vrot.slane %v456_v37, 2  ;;  %v528_v56 = vrot.slane %v518_v43, 1 }
  0x27   : > { %v579_v52 = vadd.f32 %v569_v60, %v536_v44  ;;  %v504_v53 = vadd.f32 %v499_v8, %v475_v45  ;;  %v291_v59 = vmul.f32 %v901_v0, %v279_v47  ;;  %v309_v61 = vmul.f32 %v906_v1, %v279_v47  ;;  %v779_v44 = vld [vmem:[%s916_s28 + $0x14] sm:$0xe]  ;;  %v619_v45 = vld [vmem:[%s1023_s25 + $0x4] sm:$0x7] }
  0x28   : > { %v400_v58 = vadd.f32 %v395_v41, %v371_v48  ;;  %v352_v62 = vmul.f32 %v911_v2, %v339_v50  ;;  %v561_v7 = vmul.f32 %v956_v24, %v548_v46  ;;  %v414_v8 = vmul.f32 %v926_v4, %v383_v51 }
  0x29   : > { %v591_v60 = vmul.f32 %v1008_v32, %v579_v52  ;;  %v537_v6 = vadd.f32 %v527_v27, %v504_v53  ;;  %v319_v11 = vrot.slane %v309_v61, 1  ;;  %v444_v13 = vunpack.c.l.bf16 %v778_v57  ;;  %v275_v27 = vld [vmem:[%s916_s28 + $0x10] sm:$0x7] }
  0x2a   : > { %v433_v10 = vadd.f32 %v423_v49, %v400_v58  ;;  %v362_v12 = vrot.slane %v352_v62, 2  ;;  %v396_v16 = vmul.f32 %v921_v3, %v383_v51  ;;  %v488_v18 = vunpack.c.l.bf16 %v785_v63 }
  0x2b   : > { %v603_v14 = vadd.f32 %v1014_v54, %v591_v60  ;;  %v580_v15 = vadd.f32 %v570_v28, %v537_v6  ;;  %v329_v22 = vadd.f32 %v319_v11, %v291_v59  ;;  %v457_v25 = vmul.f32 %v931_v5, %v444_v13  ;;  %v786_v59 = vld [vmem:[%s916_s28 + $0x18] sm:$0x7]  ;;  %v622_v13 = vld [vmem:[%s1023_s25 + $0x8] sm:$0x7] }
  0x2c   : > { %v476_v21 = vadd.f32 %v466_v55, %v433_v10  ;;  %v549_v26 = vunpack.c.l.bf16 %v794_v9  ;;  %v571_v30 = vrot.slane %v561_v7, 2  ;;  %v424_v31 = vrot.slane %v414_v8, 1  ;;  %v795_v6 = vld [vmem:[%s916_s28 + $0x18] sm:$0xe] }
  0x2d   : > { %v608_v28 = vpack.c.bf16 %v603_v14, %v603_v14  ;;  %v592_v29 = vmul.f32 %v1008_v32, %v580_v15  ;;  %v372_v35 = vadd.f32 %v362_v12, %v329_v22  ;;  %v501_v36 = vmul.f32 %v942_v17, %v488_v18 }
  0x2e   : > { %v505_v34 = vadd.f32 %v500_v42, %v476_v21  ;;  %v519_v37 = vmul.f32 %v951_v23, %v488_v18  ;;  %v467_v41 = vrot.slane %v457_v25, 2  ;;  %v280_v43 = vunpack.c.l.bf16 %v275_v27 }
  0x2f   : > { %v617_v39 = vsel %vm1033_vm2, %v608_v28, %v616_v20  ;;  %v604_v40 = vadd.f32 %v1014_v54, %v592_v29  ;;  %v401_v42 = vadd.f32 %v396_v16, %v372_v35  ;;  %v562_v47 = vmul.f32 %v956_v24, %v549_v26 }
  0x30   : > { %618 = vst [vmem:[%s1023_s25] sm:$0x7] %v617_v39  ;;  %v538_v46 = vadd.f32 %v528_v56, %v505_v34  ;;  %v340_v48 = vunpack.c.l.bf16 %v335_v33  ;;  %v292_v50 = vmul.f32 %v901_v0, %v280_v43  ;;  %v310_v51 = vmul.f32 %v906_v1, %v280_v43  ;;  %v628_v39 = vld [vmem:[%s1023_s25 + $0x10] sm:$0x7] }
  0x31   : > { %v609_v49 = vpack.c.bf16 %v604_v40, %v604_v40  ;;  %v384_v52 = vunpack.c.l.bf16 %v770_v38  ;;  %v434_v55 = vadd.f32 %v424_v31, %v401_v42  ;;  %v445_v58 = vunpack.c.l.bf16 %v779_v44 }
  0x32   : > { %v581_v53 = vadd.f32 %v571_v30, %v538_v46  ;;  %v353_v57 = vmul.f32 %v911_v2, %v340_v48  ;;  %v320_v61 = vrot.slane %v310_v51, 1  ;;  %v529_v60 = vrot.slane %v519_v37, 1 }
  0x33   : > { %v620_v56 = vsel %vm1033_vm2, %v609_v49, %v619_v45  ;;  %v415_v62 = vmul.f32 %v926_v4, %v384_v52  ;;  %v477_v63 = vadd.f32 %v467_v41, %v434_v55  ;;  %v397_v8 = vmul.f32 %v921_v3, %v384_v52 }
  0x34   : > { %621 = vst [vmem:[%s1023_s25 + $0x4] sm:$0x7] %v620_v56  ;;  %v593_v0 = vmul.f32 %v1008_v32, %v581_v53  ;;  %v363_v1 = vrot.slane %v353_v57, 2  ;;  %v330_v7 = vadd.f32 %v320_v61, %v292_v50  ;;  %v458_v2 = vmul.f32 %v931_v5, %v445_v58 }
  0x35   : > { %v489_v9 = vunpack.c.l.bf16 %v786_v59  ;;  %v506_v11 = vadd.f32 %v501_v36, %v477_v63  ;;  %v572_v12 = vrot.slane %v562_v47, 2  ;;  %v425_v14 = vrot.slane %v415_v62, 1 }
  0x36   : > { %v605_v10 = vadd.f32 %v1014_v54, %v593_v0  ;;  %v373_v4 = vadd.f32 %v363_v1, %v330_v7  ;;  %v550_v15 = vunpack.c.l.bf16 %v795_v6  ;;  %v468_v21 = vrot.slane %v458_v2, 2 }
  0x37   : > { %v539_v18 = vadd.f32 %v529_v60, %v506_v11  ;;  %v520_v22 = vmul.f32 %v951_v23, %v489_v9  ;;  %v502_v26 = vmul.f32 %v942_v17, %v489_v9  ;;  %v625_v23 = vld [vmem:[%s1023_s25 + $0xc] sm:$0x7] }
  0x38   : > { %v610_v16 = vpack.c.bf16 %v605_v10, %v605_v10  ;;  %v402_v20 = vadd.f32 %v397_v8, %v373_v4  ;;  %v563_v27 = vmul.f32 %v956_v24, %v550_v15 }
  0x39   : > { %v582_v5 = vadd.f32 %v572_v12, %v539_v18  ;;  %v530_v30 = vrot.slane %v520_v22, 1 }
  0x3a   : > { %v623_v3 = vsel %vm1033_vm2, %v610_v16, %v622_v13  ;;  %v435_v25 = vadd.f32 %v425_v14, %v402_v20  ;;  %v573_v34 = vrot.slane %v563_v27, 2 }
  0x3b   : > { %624 = vst [vmem:[%s1023_s25 + $0x8] sm:$0x7] %v623_v3  ;;  %v594_v28 = vmul.f32 %v1008_v32, %v582_v5 }
  0x3c   : > { %v478_v29 = vadd.f32 %v468_v21, %v435_v25 }
  0x3d   : > { %v606_v31 = vadd.f32 %v1014_v54, %v594_v28 }
  0x3e   : > { %v507_v33 = vadd.f32 %v502_v26, %v478_v29 }
  0x3f   : > { %v611_v35 = vpack.c.bf16 %v606_v31, %v606_v31 }
  0x40   : > { %v540_v36 = vadd.f32 %v530_v30, %v507_v33 }
  0x41   : > { %v626_v37 = vsel %vm1033_vm2, %v611_v35, %v625_v23 }
  0x42   : > { %627 = vst [vmem:[%s1023_s25 + $0xc] sm:$0x7] %v626_v37  ;;  %v583_v17 = vadd.f32 %v573_v34, %v540_v36 }
  0x44   : > { %v595_v38 = vmul.f32 %v1008_v32, %v583_v17 }
  0x46   : > { %v607_v24 = vadd.f32 %v1014_v54, %v595_v38 }
  0x48   : > { %v612_v40 = vpack.c.bf16 %v607_v24, %v607_v24 }
  0x4a   : > { %v629_v41 = vsel %vm1033_vm2, %v612_v40, %v628_v39 }
  0x4b   : > { %630 = vst [vmem:[%s1023_s25 + $0x10] sm:$0x7] %v629_v41 }
  0x4c PF: > { %s14_s17 = sadd.s32 1, %s850_s17   ;;  %s1100_s15 = smov %s846_s16 }
  0x4d   : > { %p11_p5 = scmp.ge.s32.totalorder %s14_s17, 4   ;;  %s1101_s16 = smov %s1103_s18 }
  0x4f   :  { %13 = sbr.rel (!%p11_p5) target bundleno = 2 (0x2), region = 85 }

// kernel: _lambda_.11
= control target key start
LH: loop header
LB: loop body
LE: loop exit
PB: predicated region body
PF: predicated region fallthrough
CT: control target
= control target key end

     0   :  { %s1132_s12 = smov 0   ;;  %s1811_s0 = inlined_call_operand.vmem [shape: f32[2,24,2,2], index: 0, kind: input, shape index: {}]   ;;  %s1812_s1 = inlined_call_operand.vmem [shape: bf16[2,10,6,6], index: 1, kind: input, shape index: {}]   ;;  %s1813_s2 = inlined_call_operand.vmem [shape: bf16[2,8,6,6], index: 2, kind: input, shape index: {}]   ;;  %s1814_s3 = inlined_call_operand.vmem [shape: bf16[2,8,6,6], index: 3, kind: output, shape index: {}]  }
   0x1 LB: > { %s979_s13 = sadd.s32 4294967295, %s1108_s12   ;;  %p983_p0 = scmp.ge.s32.totalorder %s1108_s12, 1  ;;  %s1108_s12 = sphi %s1132_s12, %s13_s12  }
   0x2   : > { %p157_p1 = scmp.lt.s32.totalorder %s1108_s12, 3 }
   0x4   : > { %p158_p2 = pnand %p983_p0, %p157_p1 }
   0x6   : > { %161 = sbr.rel (%p158_p2) target bundleno = 294 (0x126), region = 32 }
   0xd   : > { %p191_p3 = scmp.lt.s32.totalorder %s979_s13, 1  ;;  %s1110_s18 = smov 2   ;;  %vm413_vm0 = vcmask 15360   ;;  %vm422_vm1 = vcmask 31744   ;;  %vm471_vm2 = vcmask 1041408   ;;  %vm480_vm3 = vcmask 1043456  }
   0xe   : > { %s1111_s19 = smov 4   ;;  %vm891_vm4 = vcmask 43008  }
   0xf   : > { %s1918_s13 = smov (!%p191_p3, %s979_s13), 1 }
  0x10   : > { %s1026_s14 = smul.u32 48, %s1918_s13  ;;  %s1024_s24 = sshll.u32 %s1918_s13, 5 }
  0x11   : > { %s1027_s20 = smul.u32 40, %s1918_s13  ;;  %s1424_s27 = scalar_lea.vmem %s1813_s2, %s1024_s24 }
  0x12   : > { %s1146_s17 = scalar_lea.vmem %s1811_s0, %s1026_s14  ;;  %s1740_s30 = scalar_lea.vmem %s1814_s3, %s1024_s24 }
  0x13   : > { %v213_v0 = vld [vmem:[%s1146_s17 + $0x4] sm:$0x3]  ;;  %v992_v1 = vld [vmem:[%s1146_s17 + $0x14] sm:$0x3]  ;;  %v211_v4 = vld [vmem:[%s1146_s17] sm:$0x3]  ;;  %s1376_s23 = scalar_lea.vmem %s1812_s1, %s1027_s20 }
  0x14   : > { %v1000_v2 = vld [vmem:[%s1146_s17 + $0x24] sm:$0x3]  ;;  %v239_v3 = vmax.f32 %v213_v0, %v992_v1  ;;  %v990_v5 = vld [vmem:[%s1146_s17 + $0x10] sm:$0x3]  ;;  %v998_v6 = vld [vmem:[%s1146_s17 + $0x20] sm:$0x3] }
  0x15   : > { %v237_v7 = vmax.f32 %v211_v4, %v990_v5  ;;  %v214_v8 = vld [vmem:[%s1146_s17 + $0x6] sm:$0x3]  ;;  %v993_v9 = vld [vmem:[%s1146_s17 + $0x16] sm:$0x3]  ;;  %v212_v13 = vld [vmem:[%s1146_s17 + $0x2] sm:$0x3] }
  0x16   : > { %v1001_v10 = vld [vmem:[%s1146_s17 + $0x26] sm:$0x3]  ;;  %v247_v11 = vmax.f32 %v239_v3, %v1000_v2  ;;  %v240_v12 = vmax.f32 %v214_v8, %v993_v9  ;;  %v991_v14 = vld [vmem:[%s1146_s17 + $0x12] sm:$0x3]  ;;  %v999_v15 = vld [vmem:[%s1146_s17 + $0x22] sm:$0x3] }
  0x17   : > { %v245_v16 = vmax.f32 %v237_v7, %v998_v6  ;;  %v238_v17 = vmax.f32 %v212_v13, %v991_v14  ;;  %v216_v32 = vld [vmem:[%s1146_s17 + $0xa] sm:$0x3]  ;;  %v995_v33 = vld [vmem:[%s1146_s17 + $0x1a] sm:$0x3]  ;;  %v215_v37 = vld [vmem:[%s1146_s17 + $0x8] sm:$0x3] }
  0x18   : > { %v255_v18 = vsub.f32 %v213_v0, %v247_v11  ;;  %v279_v19 = vsub.f32 %v992_v1, %v247_v11  ;;  %v303_v20 = vsub.f32 %v1000_v2, %v247_v11  ;;  %v248_v21 = vmax.f32 %v240_v12, %v1001_v10  ;;  %v994_v38 = vld [vmem:[%s1146_s17 + $0x18] sm:$0x3]  ;;  %v1003_v41 = vld [vmem:[%s1146_s17 + $0x2a] sm:$0x3]  ;;  %v1002_v42 = vld [vmem:[%s1146_s17 + $0x28] sm:$0x3] }
  0x19   : > { %v253_v22 = vsub.f32 %v211_v4, %v245_v16  ;;  %v277_v23 = vsub.f32 %v990_v5, %v245_v16  ;;  %v301_v24 = vsub.f32 %v998_v6, %v245_v16  ;;  %v246_v25 = vmax.f32 %v238_v17, %v999_v15  ;;  %v218_v45 = vld [vmem:[%s1146_s17 + $0xe] sm:$0x3]  ;;  %v997_v46 = vld [vmem:[%s1146_s17 + $0x1e] sm:$0x3]  ;;  %v217_v56 = vld [vmem:[%s1146_s17 + $0xc] sm:$0x3] }
  0x1a   : > { %v265_v26 = vmul.f32 1.442695, %v255_v18  ;;  %v289_v27 = vmul.f32 1.442695, %v279_v19  ;;  %v313_v28 = vmul.f32 1.442695, %v303_v20  ;;  %v256_v29 = vsub.f32 %v214_v8, %v248_v21 }
  0x1b   : > { %v261_v30 = vmul.f32 1.442695, %v253_v22  ;;  %v280_v31 = vsub.f32 %v993_v9, %v248_v21  ;;  %v285_v34 = vmul.f32 1.442695, %v277_v23  ;;  %v304_v35 = vsub.f32 %v1001_v10, %v248_v21  ;;  %v1170_v57 = vld [vmem:[%s1146_s17 + $0x1c] sm:$0x3] }
  0x1c   : > { %1038 = vpow2.f32 %v265_v26  ;;  %v254_v36 = vsub.f32 %v212_v13, %v246_v25  ;;  %v309_v39 = vmul.f32 1.442695, %v301_v24  ;;  %v278_v40 = vsub.f32 %v991_v14, %v246_v25  ;;  %v1005_v63 = vld [vmem:[%s1146_s17 + $0x2e] sm:$0x3]  ;;  %v1004_v4 = vld [vmem:[%s1146_s17 + $0x2c] sm:$0x3] }
  0x1d   : > { %1040 = vpow2.f32 %v289_v27  ;;  %v267_v43 = vmul.f32 1.442695, %v256_v29  ;;  %v242_v44 = vmax.f32 %v216_v32, %v995_v33  ;;  %v291_v47 = vmul.f32 1.442695, %v280_v31 }
  0x1e   : > { %1042 = vpow2.f32 %v313_v28  ;;  %v302_v48 = vsub.f32 %v999_v15, %v246_v25  ;;  %v241_v49 = vmax.f32 %v215_v37, %v994_v38  ;;  %v315_v50 = vmul.f32 1.442695, %v304_v35 }
  0x1f   : > { %1044 = vpow2.f32 %v261_v30  ;;  %v263_v51 = vmul.f32 1.442695, %v254_v36  ;;  %v250_v52 = vmax.f32 %v242_v44, %v1003_v41  ;;  %v287_v53 = vmul.f32 1.442695, %v278_v40 }
  0x20   : > { %1046 = vpow2.f32 %v285_v34  ;;  %v249_v54 = vmax.f32 %v241_v49, %v1002_v42  ;;  %v244_v55 = vmax.f32 %v218_v45, %v997_v46  ;;  %v311_v61 = vmul.f32 1.442695, %v302_v48 }
  0x21   : > { %1048 = vpow2.f32 %v309_v39  ;;  %v258_v58 = vsub.f32 %v216_v32, %v250_v52  ;;  %v282_v59 = vsub.f32 %v995_v33, %v250_v52  ;;  %v306_v60 = vsub.f32 %v1003_v41, %v250_v52 }
  0x22   : > { %1050 = vpow2.f32 %v267_v43  ;;  %v257_v62 = vsub.f32 %v215_v37, %v249_v54  ;;  %v243_v1 = vmax.f32 %v217_v56, %v1170_v57  ;;  %v281_v3 = vsub.f32 %v994_v38, %v249_v54 }
  0x23   : > { %1052 = vpow2.f32 %v291_v47  ;;  %v271_v0 = vmul.f32 1.442695, %v258_v58  ;;  %v295_v2 = vmul.f32 1.442695, %v282_v59  ;;  %v319_v6 = vmul.f32 1.442695, %v306_v60 }
  0x24   : > { %1054 = vpow2.f32 %v315_v50  ;;  %v305_v7 = vsub.f32 %v1002_v42, %v249_v54  ;;  %v252_v8 = vmax.f32 %v244_v55, %v1005_v63  ;;  %v269_v10 = vmul.f32 1.442695, %v257_v62 }
  0x25   : > { %1056 = vpow2.f32 %v263_v51  ;;  %v251_v14 = vmax.f32 %v243_v1, %v1004_v4  ;;  %v293_v16 = vmul.f32 1.442695, %v281_v3 }
  0x26   : > { %v1175_v5 = vpop.eup %1038  ;;  %1058 = vpow2.f32 %v287_v53  ;;  %v260_v13 = vsub.f32 %v218_v45, %v252_v8  ;;  %v284_v17 = vsub.f32 %v997_v46, %v252_v8  ;;  %v317_v20 = vmul.f32 1.442695, %v305_v7 }
  0x27   : > { %v1177_v9 = vpop.eup %1040  ;;  %1060 = vpow2.f32 %v311_v61  ;;  %v308_v23 = vsub.f32 %v1005_v63, %v252_v8  ;;  %v259_v26 = vsub.f32 %v217_v56, %v251_v14  ;;  %v283_v32 = vsub.f32 %v1170_v57, %v251_v14 }
  0x28   : > { %v1043_v11 = vpop.eup %1042  ;;  %v327_v12 = vadd.f32 %v1177_v9, %v1175_v5  ;;  %1062 = vpow2.f32 %v271_v0  ;;  %v275_v25 = vmul.f32 1.442695, %v260_v13  ;;  %v299_v29 = vmul.f32 1.442695, %v284_v17 }
  0x29   : > { %v1045_v15 = vpop.eup %1044  ;;  %1064 = vpow2.f32 %v295_v2  ;;  %v323_v34 = vmul.f32 1.442695, %v308_v23  ;;  %v307_v35 = vsub.f32 %v1004_v4, %v251_v14  ;;  %v273_v38 = vmul.f32 1.442695, %v259_v26 }
  0x2a   : > { %v1181_v18 = vpop.eup %1046  ;;  %v335_v19 = vadd.f32 %v1043_v11, %v327_v12  ;;  %1066 = vpow2.f32 %v319_v6  ;;  %v297_v42 = vmul.f32 1.442695, %v283_v32 }
  0x2b   : > { %v1049_v21 = vpop.eup %1048  ;;  %v325_v22 = vadd.f32 %v1181_v18, %v1045_v15  ;;  %1068 = vpow2.f32 %v269_v10  ;;  %v321_v45 = vmul.f32 1.442695, %v307_v35 }
  0x2c   : > { %v1051_v24 = vpop.eup %1050  ;;  %1070 = vrcp.f32 %v335_v19 }
  0x2d   : > { %v1184_v27 = vpop.eup %1052  ;;  %v333_v28 = vadd.f32 %v1049_v21, %v325_v22  ;;  %1072 = vpow2.f32 %v293_v16 }
  0x2e   : > { %v1055_v30 = vpop.eup %1054  ;;  %v328_v31 = vadd.f32 %v1184_v27, %v1051_v24  ;;  %1074 = vpow2.f32 %v317_v20 }
  0x2f   : > { %v1057_v33 = vpop.eup %1056  ;;  %1076 = vrcp.f32 %v333_v28 }
  0x30   : > { %v1188_v36 = vpop.eup %1058  ;;  %v336_v37 = vadd.f32 %v1055_v30, %v328_v31  ;;  %1078 = vpow2.f32 %v275_v25 }
  0x31   : > { %v1061_v39 = vpop.eup %1060  ;;  %v326_v40 = vadd.f32 %v1188_v36, %v1057_v33  ;;  %1080 = vpow2.f32 %v299_v29 }
  0x32   : > { %v1063_v41 = vpop.eup %1062  ;;  %1082 = vrcp.f32 %v336_v37 }
  0x33   : > { %v1191_v43 = vpop.eup %1064  ;;  %v334_v44 = vadd.f32 %v1061_v39, %v326_v40  ;;  %1084 = vpow2.f32 %v323_v34 }
  0x34   : > { %v1067_v46 = vpop.eup %1066  ;;  %v330_v47 = vadd.f32 %v1191_v43, %v1063_v41  ;;  %1086 = vpow2.f32 %v273_v38 }
  0x35   : > { %v1069_v48 = vpop.eup %1068  ;;  %1088 = vrcp.f32 %v334_v44 }
  0x36   : > { %v1071_v49 = vpop.eup %1070  ;;  %v338_v50 = vadd.f32 %v1067_v46, %v330_v47  ;;  %1090 = vpow2.f32 %v297_v42 }
  0x37   : > { %v1073_v51 = vpop.eup %1072  ;;  %v1195_v52 = vmul.f32 %v1071_v49, %v1175_v5  ;;  %1092 = vpow2.f32 %v321_v45  ;;  %v1197_v53 = vmul.f32 %v1071_v49, %v1043_v11  ;;  %v1251_v28 = vmul.f32 %v1071_v49, %v1177_v9 }
  0x38   : > { %v1075_v54 = vpop.eup %1074  ;;  %1094 = vrcp.f32 %v338_v50  ;;  %v329_v55 = vadd.f32 %v1073_v51, %v1069_v48 }
  0x39   : > { %1840 = vst [vmem:[#allocation2_spill] sm:$0xff] %v1197_v53  ;;  %v1077_v56 = vpop.eup %1076  ;;  %369 = vrot.lane.b32.xlu1 %v1195_v52, %s1110_s18 }
  0x3a   : > { %v1079_v57 = vpop.eup %1078  ;;  %v1201_v58 = vmul.f32 %v1077_v56, %v1045_v15  ;;  %v337_v59 = vadd.f32 %v1075_v54, %v329_v55  ;;  %v1203_v60 = vmul.f32 %v1077_v56, %v1049_v21  ;;  %v1244_v26 = vmul.f32 %v1077_v56, %v1181_v18  ;;  %v1381_v55 = vld [vmem:[%s1376_s23 + $0x4] sm:$0x7]  ;;  %v1384_v56 = vld [vmem:[%s1376_s23] sm:$0x7] }
  0x3b   : > { %v1081_v61 = vpop.eup %1080 }
  0x3c   : > { %1841 = vst [vmem:[#allocation3_spill] sm:$0xff] %v1203_v60  ;;  %v1083_v62 = vpop.eup %1082  ;;  %365 = vrot.lane.b32.xlu0 %v1201_v58, %s1110_s18  ;;  %1096 = vrcp.f32 %v337_v59  ;;  %v332_v63 = vadd.f32 %v1081_v61, %v1079_v57  ;;  %v1390_v59 = vld [vmem:[%s1376_s23 + $0x8] sm:$0x7] }
  0x3d   : > { %v1085_v0 = vpop.eup %1084  ;;  %v1207_v1 = vmul.f32 %v1083_v62, %v1051_v24  ;;  %v1209_v2 = vmul.f32 %v1083_v62, %v1055_v30  ;;  %v1271_v9 = vmul.f32 %v1083_v62, %v1184_v27 }
  0x3e   : > { %v1087_v3 = vpop.eup %1086  ;;  %v340_v4 = vadd.f32 %v1085_v0, %v332_v63  ;;  %v1398_v63 = vld [vmem:[%s1376_s23 + $0x14] sm:$0x7] }
  0x3f   : > { %1842 = vst [vmem:[#allocation4_spill] sm:$0xff] %v1209_v2  ;;  %v1089_v5 = vpop.eup %1088  ;;  %371 = vrot.lane.b32.xlu1 %v1207_v1, %s1110_s18 }
  0x40   : > { %v1091_v6 = vpop.eup %1090  ;;  %v1213_v7 = vmul.f32 %v1089_v5, %v1057_v33  ;;  %1098 = vrcp.f32 %v340_v4  ;;  %v1215_v8 = vmul.f32 %v1089_v5, %v1061_v39  ;;  %v1262_v18 = vmul.f32 %v1089_v5, %v1188_v36  ;;  %v1442_v5 = vld [vmem:[%s1376_s23 + $0x18] sm:$0x7] }
  0x41   : > { %v1093_v10 = vpop.eup %1092  ;;  %v331_v11 = vadd.f32 %v1091_v6, %v1087_v3  ;;  %1853 = vst [vmem:[#allocation15_spill] sm:$0xff] %v1442_v5 }
  0x42   : > { %1843 = vst [vmem:[#allocation5_spill] sm:$0xff] %v1215_v8  ;;  %v1095_v12 = vpop.eup %1094  ;;  %367 = vrot.lane.b32.xlu0 %v1213_v7, %s1110_s18 }
  0x43   : > { %v1219_v13 = vmul.f32 %v1095_v12, %v1063_v41  ;;  %v339_v14 = vadd.f32 %v1093_v10, %v331_v11  ;;  %v1221_v15 = vmul.f32 %v1095_v12, %v1067_v46  ;;  %v1278_v31 = vmul.f32 %v1095_v12, %v1191_v43  ;;  %v1414_v11 = vld [vmem:[%s1376_s23 + $0x8] sm:$0x7]  ;;  %v1417_v12 = vld [vmem:[%s1376_s23 + $0x4] sm:$0x7] }
  0x44   : > { %1851 = vst [vmem:[#allocation13_spill] sm:$0xff] %v1417_v12 }
  0x45   : > { %1844 = vst [vmem:[#allocation6_spill] sm:$0xff] %v1221_v15  ;;  %375 = vrot.lane.b32.xlu1 %v1219_v13, %s1110_s18  ;;  %1100 = vrcp.f32 %v339_v14 }
  0x46   : > { %v1097_v16 = vpop.eup %1096 }
  0x47   : > { %v1225_v17 = vmul.f32 %v1097_v16, %v1069_v48  ;;  %v1227_v19 = vmul.f32 %v1097_v16, %v1075_v54  ;;  %v1257_v29 = vmul.f32 %v1097_v16, %v1073_v51  ;;  %v1454_v16 = vld [vmem:[%s1376_s23 + $0x14] sm:$0x7] }
  0x48   : > { %1854 = vst [vmem:[#allocation16_spill] sm:$0xff] %v1454_v16  ;;  %v1509_v16 = vld [vmem:[%s1376_s23 + $0x1c] sm:$0x7] }
  0x49   : > { %1845 = vst [vmem:[#allocation7_spill] sm:$0xff] %v1227_v19  ;;  %373 = vrot.lane.b32.xlu0 %v1225_v17, %s1110_s18 }
  0x4a   : > { %v1099_v20 = vpop.eup %1098 }
  0x4b   : > { %v1231_v21 = vmul.f32 %v1099_v20, %v1079_v57  ;;  %v1233_v22 = vmul.f32 %v1099_v20, %v1085_v0  ;;  %v1284_v32 = vmul.f32 %v1099_v20, %v1081_v61  ;;  %v1393_v61 = vld [vmem:[%s1376_s23 + $0xc] sm:$0x7]  ;;  %v1401_v0 = vld [vmem:[%s1376_s23 + $0x10] sm:$0x7] }
  0x4c   : > { %1848 = vst [vmem:[#allocation10_spill] sm:$0xff] %v1401_v0  ;;  %v1516_v0 = vld [vmem:[%s1424_s27 + $0x14] sm:$0x7] }
  0x4d   : > { %1846 = vst [vmem:[#allocation8_spill] sm:$0xff] %v1233_v22  ;;  %379 = vrot.lane.b32.xlu1 %v1231_v21, %s1110_s18 }
  0x4f   : > { %v1101_v23 = vpop.eup %1100 }
  0x50   : > { %v1237_v24 = vmul.f32 %v1101_v23, %v1087_v3  ;;  %v1239_v25 = vmul.f32 %v1101_v23, %v1093_v10  ;;  %v1266_v30 = vmul.f32 %v1101_v23, %v1091_v6  ;;  %v1404_v3 = vld [vmem:[%s1376_s23 + $0x1c] sm:$0x7]  ;;  %v1411_v10 = vld [vmem:[%s1376_s23 + $0x18] sm:$0x7]  ;;  %v1439_v6 = vld [vmem:[%s1376_s23 + $0xc] sm:$0x7] }
  0x51   : > { %391 = vrot.lane.b32.xlu1 %v1213_v7, %s1111_s19  ;;  %1849 = vst [vmem:[#allocation11_spill] sm:$0xff] %v1404_v3  ;;  %1850 = vst [vmem:[#allocation12_spill] sm:$0xff] %v1411_v10 }
  0x52   : > { %1847 = vst [vmem:[#allocation9_spill] sm:$0xff] %v1239_v25  ;;  %377 = vrot.lane.b32.xlu0 %v1237_v24, %s1110_s18  ;;  %1852 = vst [vmem:[#allocation14_spill] sm:$0xff] %v1439_v6 }
  0x55   : > { %537 = vrot.lane.b32.xlu1 %v1244_v26, %s1110_s18 }
  0x56   : > { %389 = vrot.lane.b32.xlu0 %v1201_v58, %s1111_s19 }
  0x59   : > { %541 = vrot.lane.b32.xlu1 %v1251_v28, %s1110_s18 }
  0x5a   : > { %393 = vrot.lane.b32.xlu0 %v1195_v52, %s1111_s19 }
  0x5d   : > { %545 = vrot.lane.b32.xlu1 %v1257_v29, %s1110_s18 }
  0x5e   : > { %539 = vrot.lane.b32.xlu0 %v1262_v18, %s1110_s18 }
  0x61   : > { %549 = vrot.lane.b32.xlu1 %v1266_v30, %s1110_s18 }
  0x62   : > { %543 = vrot.lane.b32.xlu0 %v1271_v9, %s1110_s18 }
  0x65   : > { %395 = vrot.lane.b32.xlu1 %v1207_v1, %s1111_s19 }
  0x66   : > { %547 = vrot.lane.b32.xlu0 %v1278_v31, %s1110_s18 }
  0x69   : > { %399 = vrot.lane.b32.xlu1 %v1219_v13, %s1111_s19 }
  0x6a   : > { %551 = vrot.lane.b32.xlu0 %v1284_v32, %s1110_s18 }
  0x6d   : > { %403 = vrot.lane.b32.xlu1 %v1231_v21, %s1111_s19 }
  0x6e   : > { %397 = vrot.lane.b32.xlu0 %v1225_v17, %s1111_s19 }
  0x71   : > { %563 = vrot.lane.b32.xlu1 %v1262_v18, %s1111_s19 }
  0x72   : > { %401 = vrot.lane.b32.xlu0 %v1237_v24, %s1111_s19 }
  0x75   : > { %567 = vrot.lane.b32.xlu1 %v1271_v9, %s1111_s19 }
  0x76   : > { %561 = vrot.lane.b32.xlu0 %v1244_v26, %s1111_s19 }
  0x79   : > { %571 = vrot.lane.b32.xlu1 %v1278_v31, %s1111_s19 }
  0x7a   : > { %565 = vrot.lane.b32.xlu0 %v1251_v28, %s1111_s19 }
  0x7d   : > { %575 = vrot.lane.b32.xlu1 %v1284_v32, %s1111_s19 }
  0x7e   : > { %569 = vrot.lane.b32.xlu0 %v1257_v29, %s1111_s19 }
  0x81   : > { %708 = vrot.lane.b32.xlu1 %v1215_v8, %s1110_s18 }
  0x82   : > { %573 = vrot.lane.b32.xlu0 %v1266_v30, %s1111_s19 }
  0x85   : > { %712 = vrot.lane.b32.xlu1 %v1209_v2, %s1110_s18 }
  0x86   : > { %706 = vrot.lane.b32.xlu0 %v1203_v60, %s1110_s18 }
  0x89   : > { %716 = vrot.lane.b32.xlu1 %v1221_v15, %s1110_s18 }
  0x8a   : > { %710 = vrot.lane.b32.xlu0 %v1197_v53, %s1110_s18 }
  0x8d   : > { %720 = vrot.lane.b32.xlu1 %v1233_v22, %s1110_s18 }
  0x8e   : > { %714 = vrot.lane.b32.xlu0 %v1227_v19, %s1110_s18 }
  0x91   : > { %732 = vrot.lane.b32.xlu1 %v1215_v8, %s1111_s19 }
  0x92   : > { %718 = vrot.lane.b32.xlu0 %v1239_v25, %s1110_s18 }
  0x95   : > { %736 = vrot.lane.b32.xlu1 %v1209_v2, %s1111_s19  ;;  %v1506_v2 = vld [vmem:[%s1424_s27 + $0x8] sm:$0x7] }
  0x96   : > { %730 = vrot.lane.b32.xlu0 %v1203_v60, %s1111_s19  ;;  %1864 = vst [vmem:[#allocation26_spill] sm:$0xff] %v1506_v2 }
  0x99   : > { %740 = vrot.lane.b32.xlu1 %v1221_v15, %s1111_s19 }
  0x9a   : > { %734 = vrot.lane.b32.xlu0 %v1197_v53, %s1111_s19 }
  0x9d   : > { %744 = vrot.lane.b32.xlu1 %v1233_v22, %s1111_s19 }
  0x9e   : > { %738 = vrot.lane.b32.xlu0 %v1227_v19, %s1111_s19  ;;  %v1460_v19 = vld [vmem:[%s1376_s23 + $0x1c] sm:$0x7] }
  0x9f   : > { %1856 = vst [vmem:[#allocation18_spill] sm:$0xff] %v1460_v19  ;;  %v1519_v19 = vld [vmem:[%s1376_s23 + $0x18] sm:$0x7] }
  0xa2   : > { %742 = vrot.lane.b32.xlu0 %v1239_v25, %s1111_s19  ;;  %v1457_v25 = vld [vmem:[%s1376_s23 + $0x20] sm:$0x7] }
  0xa3   : > { %1855 = vst [vmem:[#allocation17_spill] sm:$0xff] %v1457_v25  ;;  %v1527_v25 = vld [vmem:[%s1424_s27 + $0x10] sm:$0x7] }
  0xab   : > { %v370_v27 = vpop.permute.xlu1 %369 }
  0xae   : > { %v366_v33 = vpop.permute.xlu0 %365 }
  0xb1   : > { %v1344_v34 = vpop.permute.xlu1 %371 }
  0xb2   : > { %v417_v6 = vsel %vm413_vm0, %v1207_v1, %v1344_v34  ;;  %v840_v1 = vunpack.c.l.bf16 %v1509_v16 }
  0xb4   : > { %v368_v35 = vpop.permute.xlu0 %367 }
  0xb5   : > { %v415_v4 = vsel %vm413_vm0, %v1213_v7, %v368_v35  ;;  %v414_v7 = vsel %vm413_vm0, %v1201_v58, %v366_v33  ;;  %v1436_v35 = vld [vmem:[%s1376_s23 + $0x10] sm:$0x7]  ;;  %v416_v58 = vsel %vm413_vm0, %v1195_v52, %v370_v27  ;;  %v1482_v27 = vld [vmem:[%s1424_s27] sm:$0x7]  ;;  %v1485_v52 = vld [vmem:[%s1376_s23 + $0x14] sm:$0x7] }
  0xb6   : > { %1860 = vst [vmem:[#allocation22_spill] sm:$0xff] %v1482_v27  ;;  %1861 = vst [vmem:[#allocation23_spill] sm:$0xff] %v1485_v52  ;;  %v1540_v52 = vld [vmem:[%s1424_s27 + $0x1c] sm:$0x7] }
  0xb7   : > { %v1346_v36 = vpop.permute.xlu1 %375 }
  0xbb   : > { %v1348_v37 = vpop.permute.xlu0 %373 }
  0xbf   : > { %v1350_v38 = vpop.permute.xlu1 %379 }
  0xc3   : > { %v392_v39 = vpop.permute.xlu1 %391 }
  0xc4   : > { %v1352_v40 = vpop.permute.xlu0 %377  ;;  %v1429_v14 = vsel %vm422_vm1, %v415_v4, %v392_v39  ;;  %v1472_v4 = vld [vmem:[%s1424_s27 + $0x4] sm:$0x7]  ;;  %v1475_v39 = vld [vmem:[%s1376_s23 + $0x8] sm:$0x7] }
  0xc5   : > { %1858 = vst [vmem:[#allocation20_spill] sm:$0xff] %v1472_v4  ;;  %1859 = vst [vmem:[#allocation21_spill] sm:$0xff] %v1475_v39  ;;  %v440_v53 = vrot.slane %v1429_v14, 6  ;;  %v456_v15 = vrot.slane %v1429_v14, 4  ;;  %v1530_v39 = vld [vmem:[%s1376_s23 + $0x24] sm:$0x7] }
  0xc6   : > { %v1543_v4 = vld [vmem:[%s1376_s23 + $0x20] sm:$0x7] }
  0xc7   : > { %v1354_v41 = vpop.permute.xlu1 %537  ;;  %v473_v5 = vsel %vm471_vm2, %v1429_v14, %v440_v53 }
  0xc8   : > { %v390_v42 = vpop.permute.xlu0 %389 }
  0xc9   : > { %v1447_v33 = vsel %vm422_vm1, %v414_v7, %v390_v42  ;;  %v1469_v7 = vld [vmem:[%s1376_s23 + $0xc] sm:$0x7] }
  0xca   : > { %1857 = vst [vmem:[#allocation19_spill] sm:$0xff] %v1469_v7  ;;  %v439_v42 = vrot.slane %v1447_v33, 6  ;;  %v455_v60 = vrot.slane %v1447_v33, 4 }
  0xcb   : > { %v1356_v43 = vpop.permute.xlu1 %541 }
  0xcc   : > { %v394_v44 = vpop.permute.xlu0 %393  ;;  %v472_v12 = vsel %vm471_vm2, %v1447_v33, %v439_v42  ;;  %v482_v33 = vsel %vm480_vm3, %v473_v5, %v456_v15  ;;  %v872_v42 = vunpack.c.l.bf16 %v1516_v0  ;;  %v418_v15 = vsel %vm413_vm0, %v1225_v17, %v1348_v37  ;;  %v865_v0 = vld [vmem:[%s1424_s27 + $0x18] sm:$0x7] }
  0xcd   : > { %v1463_v22 = vsel %vm422_vm1, %v416_v58, %v394_v44  ;;  %v1494_v44 = vld [vmem:[%s1424_s27 + $0xc] sm:$0x7]  ;;  %v1497_v58 = vld [vmem:[%s1376_s23 + $0x10] sm:$0x7]  ;;  %v421_v5 = vsel %vm413_vm0, %v1231_v21, %v1350_v38  ;;  %v585_v17 = vsel %vm413_vm0, %v1244_v26, %v1354_v41  ;;  %v1866_v38 = vunpack.c.l.bf16 %v1384_v56 }
  0xce   : > { %1862 = vst [vmem:[#allocation24_spill] sm:$0xff] %v1494_v44  ;;  %1863 = vst [vmem:[#allocation25_spill] sm:$0xff] %v1497_v58  ;;  %v441_v8 = vrot.slane %v1463_v22, 6  ;;  %v457_v27 = vrot.slane %v1463_v22, 4  ;;  %v1867_v26 = vunpack.c.l.bf16 %v1390_v59 }
  0xcf   : > { %v1358_v45 = vpop.permute.xlu1 %545 }
  0xd0   : > { %v1360_v46 = vpop.permute.xlu0 %539  ;;  %v474_v7 = vsel %vm471_vm2, %v1463_v22, %v441_v8  ;;  %v419_v8 = vsel %vm413_vm0, %v1219_v13, %v1346_v36  ;;  %v481_v22 = vsel %vm480_vm3, %v472_v12, %v455_v60  ;;  %v420_v60 = vsel %vm413_vm0, %v1237_v24, %v1352_v40 }
  0xd1   : > { %v483_v14 = vsel %vm480_vm3, %v474_v7, %v457_v27  ;;  %v1865_v13 = vunpack.c.l.bf16 %v1381_v55  ;;  %v1582_v12 = vmul.f32 %v1866_v38, %v481_v22  ;;  %v587_v24 = vsel %vm413_vm0, %v1251_v28, %v1356_v43 }
  0xd2   : > { %v589_v40 = vsel %vm413_vm0, %v1257_v29, %v1358_v45  ;;  %v1594_v41 = vmul.f32 %v1867_v26, %v483_v14 }
  0xd3   : > { %v1362_v47 = vpop.permute.xlu1 %549  ;;  %v1573_v36 = vmul.f32 %v1865_v13, %v482_v33 }
  0xd4   : > { %v1364_v48 = vpop.permute.xlu0 %543 }
  0xd5   : > { %v588_v28 = vsel %vm413_vm0, %v1271_v9, %v1364_v48 }
  0xd7   : > { %v1366_v49 = vpop.permute.xlu1 %395 }
  0xd8   : > { %v1369_v50 = vpop.permute.xlu0 %547  ;;  %v426_v58 = vsel %vm422_vm1, %v417_v6, %v1366_v49  ;;  %v874_v49 = vunpack.c.l.bf16 %v1540_v52  ;;  %v841_v6 = vunpack.c.l.bf16 %v1543_v4 }
  0xd9   : > { %v442_v2 = vrot.slane %v426_v58, 6  ;;  %v458_v56 = vrot.slane %v426_v58, 4 }
  0xdb   : > { %v1371_v51 = vpop.permute.xlu1 %399  ;;  %v475_v29 = vsel %vm471_vm2, %v426_v58, %v442_v2 }
  0xdc   : > { %v1378_v54 = vpop.permute.xlu0 %551  ;;  %v428_v37 = vsel %vm422_vm1, %v419_v8, %v1371_v51  ;;  %v586_v51 = vsel %vm413_vm0, %v1262_v18, %v1360_v46  ;;  %v591_v18 = vsel %vm413_vm0, %v1266_v30, %v1362_v47  ;;  %v590_v46 = vsel %vm413_vm0, %v1278_v31, %v1369_v50 }
  0xdd   : > { %v444_v43 = vrot.slane %v428_v37, 6  ;;  %v484_v58 = vsel %vm480_vm3, %v475_v29, %v458_v56  ;;  %v592_v30 = vsel %vm413_vm0, %v1284_v32, %v1378_v54  ;;  %v460_v31 = vrot.slane %v428_v37, 4 }
  0xdf   : > { %v1386_v57 = vpop.permute.xlu1 %403  ;;  %v477_v50 = vsel %vm471_vm2, %v428_v37, %v444_v43  ;;  %v1868_v43 = vunpack.c.l.bf16 %v1393_v61 }
  0xe0   : > { %v1395_v62 = vpop.permute.xlu0 %397  ;;  %v430_v55 = vsel %vm422_vm1, %v421_v5, %v1386_v57 }
  0xe1   : > { %v427_v27 = vsel %vm422_vm1, %v418_v15, %v1395_v62  ;;  %v446_v59 = vrot.slane %v430_v55, 6 }
  0xe2   : > { %v443_v2 = vrot.slane %v427_v27, 6 }
  0xe3   : > { %v1433_v23 = vpop.permute.xlu1 %563  ;;  %v479_v32 = vsel %vm471_vm2, %v430_v55, %v446_v59 }
  0xe4   : > { %v1451_v20 = vpop.permute.xlu0 %401  ;;  %v594_v45 = vsel %vm422_vm1, %v586_v51, %v1433_v23  ;;  %v476_v5 = vsel %vm471_vm2, %v427_v27, %v443_v2 }
  0xe5   : > { %v610_v47 = vrot.slane %v594_v45, 6  ;;  %v429_v54 = vsel %vm422_vm1, %v420_v60, %v1451_v20  ;;  %v626_v13 = vrot.slane %v594_v45, 4 }
  0xe7   : > { %v1488_v10 = vpop.permute.xlu1 %567 }
  0xe8   : > { %v1500_v3 = vpop.permute.xlu0 %561  ;;  %v596_v9 = vsel %vm422_vm1, %v588_v28, %v1488_v10  ;;  %v462_v10 = vrot.slane %v430_v55, 4 }
  0xe9   : > { %v593_v62 = vsel %vm422_vm1, %v585_v17, %v1500_v3  ;;  %v612_v14 = vrot.slane %v596_v9, 6  ;;  %v459_v3 = vrot.slane %v427_v27, 4  ;;  %v642_v17 = vsel %vm471_vm2, %v594_v45, %v610_v47 }
  0xea   : > { %v628_v37 = vrot.slane %v596_v9, 4  ;;  %v445_v27 = vrot.slane %v429_v54, 6  ;;  %v488_v59 = vsel %vm480_vm3, %v479_v32, %v462_v10  ;;  %v1871_v32 = vunpack.c.l.bf16 %v1398_v63  ;;  %v1882_v63 = vld [vmem:[#allocation5_spill] sm:$0xff] }
  0xeb   : > { %v572_v53 = vpop.permute.xlu1 %571  ;;  %v644_v26 = vsel %vm471_vm2, %v596_v9, %v612_v14  ;;  %v650_v9 = vsel %vm480_vm3, %v642_v17, %v626_v13  ;;  %v1872_v17 = vld [vmem:[#allocation13_spill] sm:$0xff] }
  0xec   : > { %v566_v44 = vpop.permute.xlu0 %565  ;;  %v598_v7 = vsel %vm422_vm1, %v590_v46, %v572_v53  ;;  %v652_v2 = vsel %vm480_vm3, %v644_v26, %v628_v37  ;;  %v478_v47 = vsel %vm471_vm2, %v429_v54, %v445_v27  ;;  %v1873_v37 = vunpack.c.l.bf16 %v1872_v17  ;;  %v1880_v27 = vld [vmem:[#allocation11_spill] sm:$0xff] }
  0xed   : > { %v595_v23 = vsel %vm422_vm1, %v587_v24, %v566_v44  ;;  %v609_v44 = vrot.slane %v593_v62, 6  ;;  %v614_v53 = vrot.slane %v598_v7, 6  ;;  %v625_v24 = vrot.slane %v593_v62, 4 }
  0xee   : > { %v611_v22 = vrot.slane %v595_v23, 6  ;;  %v627_v51 = vrot.slane %v595_v23, 4  ;;  %v630_v56 = vrot.slane %v598_v7, 4 }
  0xef   : > { %v576_v34 = vpop.permute.xlu1 %575  ;;  %v641_v55 = vsel %vm471_vm2, %v593_v62, %v609_v44  ;;  %v646_v20 = vsel %vm471_vm2, %v598_v7, %v614_v53  ;;  %v1869_v44 = vunpack.c.l.bf16 %v1414_v11 }
  0xf0   : > { %v570_v21 = vpop.permute.xlu0 %569  ;;  %v600_v33 = vsel %vm422_vm1, %v592_v30, %v576_v34  ;;  %v643_v29 = vsel %vm471_vm2, %v595_v23, %v611_v22  ;;  %v485_v23 = vsel %vm480_vm3, %v476_v5, %v459_v3  ;;  %v649_v7 = vsel %vm480_vm3, %v641_v55, %v625_v24 }
  0xf1   : > { %v597_v34 = vsel %vm422_vm1, %v589_v40, %v570_v21  ;;  %v616_v38 = vrot.slane %v600_v33, 6  ;;  %v508_v21 = vmul.f32 %v1868_v43, %v484_v58  ;;  %v486_v40 = vsel %vm480_vm3, %v477_v50, %v460_v31 }
  0xf2   : > { %v613_v45 = vrot.slane %v597_v34, 6  ;;  %v632_v46 = vrot.slane %v600_v33, 4  ;;  %v651_v30 = vsel %vm480_vm3, %v643_v29, %v627_v51  ;;  %v654_v61 = vsel %vm480_vm3, %v646_v20, %v630_v56  ;;  %v1878_v51 = vld [vmem:[#allocation10_spill] sm:$0xff] }
  0xf3   : > { %v1607_v57 = vpop.permute.xlu1 %708  ;;  %v648_v62 = vsel %vm471_vm2, %v600_v33, %v616_v38  ;;  %v461_v31 = vrot.slane %v429_v54, 4  ;;  %v629_v50 = vrot.slane %v597_v34, 4  ;;  %v675_v22 = vmul.f32 %v1869_v44, %v650_v9  ;;  %v1874_v38 = vld [vmem:[#allocation14_spill] sm:$0xff] }
  0xf4   : > { %v574_v48 = vpop.permute.xlu0 %573  ;;  %v1870_v33 = vunpack.c.l.bf16 %v1436_v35  ;;  %v645_v53 = vsel %vm471_vm2, %v597_v34, %v613_v45  ;;  %v656_v5 = vsel %vm480_vm3, %v648_v62, %v632_v46  ;;  %v510_v13 = vmul.f32 %v1871_v32, %v486_v40  ;;  %v1883_v46 = vld [vmem:[#allocation17_spill] sm:$0xff] }
  0xf5   : > { %v599_v10 = vsel %vm422_vm1, %v591_v18, %v574_v48  ;;  %v674_v54 = vmul.f32 %v1873_v37, %v649_v7  ;;  %v1875_v24 = vunpack.c.l.bf16 %v1874_v38  ;;  %v1876_v48 = vld [vmem:[#allocation15_spill] sm:$0xff]  ;;  %v1879_v56 = vunpack.c.l.bf16 %v1878_v51 }
  0xf6   : > { %v677_v3 = vmul.f32 %v1870_v33, %v652_v2  ;;  %v1877_v26 = vunpack.c.l.bf16 %v1876_v48  ;;  %v1881_v34 = vunpack.c.l.bf16 %v1880_v27  ;;  %v615_v29 = vrot.slane %v599_v10, 6 }
  0xf7   : > { %v1627_v8 = vpop.permute.xlu1 %712  ;;  %v676_v18 = vmul.f32 %v1875_v24, %v651_v30  ;;  %v1674_v35 = vmul.f32 %v1879_v56, %v485_v23  ;;  %v755_v20 = vsel %vm413_vm0, %v1882_v63, %v1607_v57  ;;  %v1682_v40 = vsel %vm480_vm3, %v478_v47, %v461_v31  ;;  %v1892_v56 = vld [vmem:[#allocation2_spill] sm:$0xff] }
  0xf8   : > { %v1629_v15 = vpop.permute.xlu0 %706  ;;  %v679_v11 = vmul.f32 %v1877_v26, %v654_v61  ;;  %v512_v55 = vmul.f32 %v1881_v34, %v488_v59  ;;  %v653_v45 = vsel %vm480_vm3, %v645_v53, %v629_v50  ;;  %v1884_v9 = vunpack.c.l.bf16 %v1883_v46  ;;  %v1885_v50 = vld [vmem:[#allocation16_spill] sm:$0xff]  ;;  %v1891_v26 = vld [vmem:[#allocation6_spill] sm:$0xff] }
  0xf9   : > { %v683_v7 = vadd.f32 %v675_v22, %v1573_v36  ;;  %v685_v59 = vadd.f32 %v677_v3, %v508_v21  ;;  %v682_v44 = vadd.f32 %v674_v54, %v1582_v12  ;;  %v1691_v57 = vadd.f32 %v676_v18, %v1594_v41  ;;  %v1887_v36 = vld [vmem:[#allocation4_spill] sm:$0xff]  ;;  %v1888_v41 = vld [vmem:[#allocation3_spill] sm:$0xff] }
  0xfa   : > { %v681_v2 = vmul.f32 %v1884_v9, %v656_v5  ;;  %v1693_v31 = vadd.f32 %v679_v11, %v510_v13  ;;  %v631_v47 = vrot.slane %v599_v10, 4  ;;  %v1886_v33 = vunpack.c.l.bf16 %v1885_v50  ;;  %v1889_v54 = vld [vmem:[#allocation19_spill] sm:$0xff]  ;;  %v1893_v34 = vld [vmem:[#allocation8_spill] sm:$0xff] }
  0xfb   : > { %v1638_v28 = vpop.permute.xlu1 %716  ;;  %v647_v5 = vsel %vm471_vm2, %v599_v10, %v615_v29  ;;  %v757_v21 = vsel %vm413_vm0, %v1887_v36, %v1627_v8  ;;  %v754_v32 = vsel %vm413_vm0, %v1888_v41, %v1629_v15  ;;  %v1890_v10 = vunpack.c.l.bf16 %v1889_v54 }
  0xfc   : > { %v1643_v60 = vpop.permute.xlu0 %710  ;;  %v1697_v53 = vmul.f32 %v1886_v33, %v653_v45  ;;  %v1704_v3 = vadd.f32 %v681_v2, %v512_v55  ;;  %v655_v48 = vsel %vm480_vm3, %v647_v5, %v631_v47  ;;  %v759_v11 = vsel %vm413_vm0, %v1891_v26, %v1638_v28 }
  0xfd   : > { %v756_v27 = vsel %vm413_vm0, %v1892_v56, %v1643_v60 }
  0xff   : > { %v721_v58 = vpop.permute.xlu1 %720 }
 0x100   : > { %v715_v14 = vpop.permute.xlu0 %714  ;;  %v761_v55 = vsel %vm413_vm0, %v1893_v34, %v721_v58  ;;  %v1897_v58 = vld [vmem:[#allocation23_spill] sm:$0xff] }
 0x103   : > { %v733_v43 = vpop.permute.xlu1 %732 }
 0x104   : > { %v719_v62 = vpop.permute.xlu0 %718  ;;  %v763_v23 = vsel %vm422_vm1, %v755_v20, %v733_v43  ;;  %v1894_v43 = vld [vmem:[#allocation7_spill] sm:$0xff] }
 0x105   : > { %v779_v30 = vrot.slane %v763_v23, 6  ;;  %v795_v61 = vrot.slane %v763_v23, 4  ;;  %v758_v45 = vsel %vm413_vm0, %v1894_v43, %v715_v14  ;;  %v1899_v14 = vld [vmem:[#allocation21_spill] sm:$0xff] }
 0x106   : > { %v1900_v33 = vunpack.c.l.bf16 %v1899_v14 }
 0x107   : > { %v811_v22 = vsel %vm471_vm2, %v763_v23, %v779_v30  ;;  %v737_v12 = vpop.permute.xlu1 %736  ;;  %v1895_v23 = vld [vmem:[#allocation20_spill] sm:$0xff] }
 0x108   : > { %v819_v13 = vsel %vm480_vm3, %v811_v22, %v795_v61  ;;  %v731_v17 = vpop.permute.xlu0 %730  ;;  %v765_v37 = vsel %vm422_vm1, %v757_v21, %v737_v12  ;;  %v1896_v30 = vunpack.c.l.bf16 %v1895_v23  ;;  %v1901_v12 = vld [vmem:[#allocation9_spill] sm:$0xff] }
 0x109   : > { %v844_v38 = vmul.f32 %v1890_v10, %v819_v13  ;;  %v762_v24 = vsel %vm422_vm1, %v754_v32, %v731_v17  ;;  %v781_v8 = vrot.slane %v765_v37, 6  ;;  %v797_v18 = vrot.slane %v765_v37, 4 }
 0x10a   : > { %v778_v51 = vrot.slane %v762_v24, 6  ;;  %v794_v15 = vrot.slane %v762_v24, 4  ;;  %v760_v41 = vsel %vm413_vm0, %v1901_v12, %v719_v62 }
 0x10b   : > { %v852_v29 = vadd.f32 %v844_v38, %v683_v7  ;;  %v813_v63 = vsel %vm471_vm2, %v765_v37, %v781_v8  ;;  %v741_v20 = vpop.permute.xlu1 %740  ;;  %v1898_v7 = vunpack.c.l.bf16 %v1897_v58 }
 0x10c   : > { %v810_v46 = vsel %vm471_vm2, %v762_v24, %v778_v51  ;;  %v821_v28 = vsel %vm480_vm3, %v813_v63, %v797_v18  ;;  %v735_v9 = vpop.permute.xlu0 %734  ;;  %v767_v2 = vsel %vm422_vm1, %v759_v11, %v741_v20  ;;  %v1902_v18 = vld [vmem:[#allocation24_spill] sm:$0xff] }
 0x10d   : > { %v876_v60 = vadd.f32 %v1896_v30, %v852_v29  ;;  %v818_v61 = vsel %vm480_vm3, %v810_v46, %v794_v15  ;;  %v846_v47 = vmul.f32 %v1898_v7, %v821_v28  ;;  %v764_v50 = vsel %vm422_vm1, %v756_v27, %v735_v9  ;;  %v1906_v27 = vld [vmem:[#allocation25_spill] sm:$0xff] }
 0x10e   : > { %v843_v5 = vmul.f32 %v1900_v33, %v818_v61  ;;  %v780_v36 = vrot.slane %v764_v50, 6  ;;  %v796_v21 = vrot.slane %v764_v50, 4  ;;  %v783_v22 = vrot.slane %v767_v2, 6 }
 0x10f   : > { %v884_v32 = vpack.c.bf16 %v876_v60, %v876_v60  ;;  %v854_v13 = vadd.f32 %v846_v47, %v685_v59  ;;  %v799_v17 = vrot.slane %v767_v2, 4  ;;  %v745_v37 = vpop.permute.xlu1 %744  ;;  %v1903_v26 = vunpack.c.l.bf16 %v1902_v18 }
 0x110   : > { %v851_v54 = vadd.f32 %v843_v5, %v682_v44  ;;  %v812_v10 = vsel %vm471_vm2, %v764_v50, %v780_v36  ;;  %v815_v38 = vsel %vm471_vm2, %v767_v2, %v783_v22  ;;  %v739_v24 = vpop.permute.xlu0 %738  ;;  %v769_v8 = vsel %vm422_vm1, %v761_v55, %v745_v37  ;;  %v1904_v44 = vld [vmem:[#allocation22_spill] sm:$0xff] }
 0x111   : > { %893 = vst.msk [vmem:[%s1740_s30 + $0x4] sm:$0x7] %vm891_vm4, %v884_v32  ;;  %v878_v11 = vadd.f32 %v1903_v26, %v854_v13  ;;  %v820_v51 = vsel %vm480_vm3, %v812_v10, %v796_v21  ;;  %v823_v62 = vsel %vm480_vm3, %v815_v38, %v799_v17  ;;  %v766_v59 = vsel %vm422_vm1, %v758_v45, %v739_v24  ;;  %v1911_v50 = vld [vmem:[#allocation18_spill] sm:$0xff] }
 0x112   : > { %v1905_v15 = vunpack.c.l.bf16 %v1904_v44  ;;  %v1907_v34 = vunpack.c.l.bf16 %v1906_v27  ;;  %v848_v55 = vmul.f32 %v840_v1, %v823_v62  ;;  %v782_v63 = vrot.slane %v766_v59, 6 }
 0x113   : > { %v886_v20 = vpack.c.bf16 %v878_v11, %v878_v11  ;;  %v798_v43 = vrot.slane %v766_v59, 4  ;;  %v785_v46 = vrot.slane %v769_v8, 6  ;;  %v801_v28 = vrot.slane %v769_v8, 4 }
 0x114   : > { %v875_v56 = vadd.f32 %v1905_v15, %v851_v54  ;;  %v845_v29 = vmul.f32 %v1907_v34, %v820_v51  ;;  %v856_v45 = vadd.f32 %v848_v55, %v1693_v31  ;;  %v814_v23 = vsel %vm471_vm2, %v766_v59, %v782_v63  ;;  %v743_v30 = vpop.permute.xlu0 %742 }
 0x115   : > { %v686_v60 = vadd.f32 %v1697_v53, %v1674_v35  ;;  %895 = vst.msk [vmem:[%s1740_s30 + $0xc] sm:$0x7] %vm891_vm4, %v886_v20  ;;  %v822_v16 = vsel %vm480_vm3, %v814_v23, %v798_v43  ;;  %v817_v1 = vsel %vm471_vm2, %v769_v8, %v785_v46  ;;  %v768_v61 = vsel %vm422_vm1, %v760_v41, %v743_v30 }
 0x116   : > { %v883_v9 = vpack.c.bf16 %v875_v56, %v875_v56  ;;  %v853_v2 = vadd.f32 %v845_v29, %v1691_v57  ;;  %v1908_v57 = vld [vmem:[#allocation26_spill] sm:$0xff]  ;;  %v880_v7 = vadd.f32 %v872_v42, %v856_v45  ;;  %v1910_v35 = vunpack.c.l.bf16 %v1519_v19  ;;  %v1914_v42 = vld [vmem:[#allocation12_spill] sm:$0xff] }
 0x117   : > { %v1909_v58 = vunpack.c.l.bf16 %v1908_v57  ;;  %v825_v47 = vsel %vm480_vm3, %v817_v1, %v801_v28  ;;  %v1912_v14 = vunpack.c.l.bf16 %v1911_v50  ;;  %v1913_v5 = vunpack.c.l.bf16 %v1530_v39 }
 0x118   : > { %892 = vst.msk [vmem:[%s1740_s30] sm:$0x7] %vm891_vm4, %v883_v9  ;;  %v847_v53 = vmul.f32 %v1910_v35, %v822_v16  ;;  %v784_v21 = vrot.slane %v768_v61, 6  ;;  %v800_v22 = vrot.slane %v768_v61, 4  ;;  %v888_v41 = vpack.c.bf16 %v880_v7, %v880_v7 }
 0x119   : > { %v877_v31 = vadd.f32 %v1909_v58, %v853_v2  ;;  %v680_v33 = vmul.f32 %v1912_v14, %v655_v48  ;;  %v850_v36 = vmul.f32 %v1913_v5, %v825_v47  ;;  %v1915_v13 = vunpack.c.l.bf16 %v1914_v42 }
 0x11a   : > { %v855_v32 = vadd.f32 %v847_v53, %v686_v60  ;;  %v816_v37 = vsel %vm471_vm2, %v768_v61, %v784_v21  ;;  %897 = vst.msk [vmem:[%s1740_s30 + $0x14] sm:$0x7] %vm891_vm4, %v888_v41  ;;  %v1916_v39 = vunpack.c.l.bf16 %v1527_v25  ;;  %v873_v24 = vunpack.c.l.bf16 %v865_v0 }
 0x11b   : > { %v885_v12 = vpack.c.bf16 %v877_v31, %v877_v31  ;;  %v511_v19 = vmul.f32 %v1915_v13, %v1682_v40  ;;  %v858_v17 = vadd.f32 %v850_v36, %v1704_v3  ;;  %v824_v54 = vsel %vm480_vm3, %v816_v37, %v800_v22 }
 0x11c   : > { %v879_v48 = vadd.f32 %v1916_v39, %v855_v32  ;;  %v849_v40 = vmul.f32 %v841_v6, %v824_v54 }
 0x11d   : > { %894 = vst.msk [vmem:[%s1740_s30 + $0x8] sm:$0x7] %vm891_vm4, %v885_v12  ;;  %v688_v10 = vadd.f32 %v680_v33, %v511_v19  ;;  %v882_v38 = vadd.f32 %v874_v49, %v858_v17 }
 0x11e   : > { %v887_v3 = vpack.c.bf16 %v879_v48, %v879_v48 }
 0x11f   : > { %v890_v8 = vpack.c.bf16 %v882_v38, %v882_v38  ;;  %v857_v18 = vadd.f32 %v849_v40, %v688_v10 }
 0x120   : > { %896 = vst.msk [vmem:[%s1740_s30 + $0x10] sm:$0x7] %vm891_vm4, %v887_v3 }
 0x121   : > { %899 = vst.msk [vmem:[%s1740_s30 + $0x1c] sm:$0x7] %vm891_vm4, %v890_v8  ;;  %v881_v26 = vadd.f32 %v873_v24, %v857_v18 }
 0x123   : > { %v889_v25 = vpack.c.bf16 %v881_v26, %v881_v26 }
 0x125   : > { %898 = vst.msk [vmem:[%s1740_s30 + $0x18] sm:$0x7] %vm891_vm4, %v889_v25 }
 0x126 PF: > { %s13_s12 = sadd.s32 1, %s1108_s12  }
 0x127   : > { %p10_p4 = scmp.ge.s32.totalorder %s13_s12, 4  }
 0x129   :  { %12 = sbr.rel (!%p10_p4) target bundleno = 1 (0x1), region = 72 }

// kernel: _lambda_.12
= control target key start
LH: loop header
LB: loop body
LE: loop exit
PB: predicated region body
PF: predicated region fallthrough
CT: control target
= control target key end

     0   :  { %s882_s15 = smov 0   ;;  %s884_s16 = smov 0   ;;  %s1098_s0 = inlined_call_operand.vmem [shape: bf16[2,7,7,8], index: 0, kind: input, shape index: {}]   ;;  %s1099_s1 = inlined_call_operand.vmem [shape: f32[9,1,8], index: 1, kind: input, shape index: {}]   ;;  %s1100_s2 = inlined_call_operand.vmem [shape: f32[1,8], index: 2, kind: input, shape index: {}]   ;;  %s1101_s3 = inlined_call_operand.vmem [shape: f32[1,8], index: 3, kind: input, shape index: {}]   ;;  %s1102_s4 = inlined_call_operand.vmem [shape: bf16[2,5,5,8], index: 4, kind: output, shape index: {}]  }
   0x1   :  { %s886_s17 = smov 0  }
   0x2 LB: > { %s26_s18 = sadd.s32 1, %s851_s16  ;;  %p763_p0 = scmp.ge.s32.totalorder %s855_s17, 1  ;;  %s855_s17 = sphi %s886_s17, %s14_s17   ;;  %s851_s16 = sphi %s884_s16, %s1106_s16   ;;  %s847_s15 = sphi %s882_s15, %s1105_s15  }
   0x3   : > { %p28_p1 = scmp.ge.s32.totalorder %s26_s18, 2  ;;  %p205_p2 = scmp.lt.s32.totalorder %s855_s17, 3 }
   0x5   : > { %s1108_s18 = smov (%p28_p1, %s26_s18), 0  ;;  %p206_p3 = pnand %p763_p0, %p205_p2 }
   0x6   : > { %p246_p4 = scmp.lt.s32.totalorder (!%p206_p3), %s847_s15, 1  ;;  %v906_v0 = vld [vmem:[%s1099_s1] ss:$0 sm:$0xff] (!%p206_p3)  ;;  %v911_v1 = vld [vmem:[%s1099_s1 + $0x1] ss:$0 sm:$0xff] (!%p206_p3)  ;;  %vm618_vm0 = vcmask (!%p206_p3), 59392  }
   0x7   : > { %209 = sbr.rel (%p206_p3) target bundleno = 79 (0x4f), region = 36  ;;  %v916_v2 = vld [vmem:[%s1099_s1 + $0x2] ss:$0 sm:$0xff] (!%p206_p3)  ;;  %v926_v3 = vld [vmem:[%s1099_s1 + $0x3] ss:$0 sm:$0xff] (!%p206_p3) }
   0x8   : > { %v931_v4 = vld [vmem:[%s1099_s1 + $0x4] ss:$0 sm:$0xff] (!%p206_p3)  ;;  %v936_v5 = vld [vmem:[%s1099_s1 + $0x5] ss:$0 sm:$0xff] (!%p206_p3)  ;;  %v941_v6 = vld [vmem:[%s1099_s1 + $0x7] ss:$0 sm:$0xff] (!%p206_p3) }
   0x9   : > { %v952_v18 = vld [vmem:[%s1099_s1 + $0x6] ss:$0 sm:$0xff] (!%p206_p3)  ;;  %v961_v24 = vld [vmem:[%s1099_s1 + $0x8] ss:$0 sm:$0xff] (!%p206_p3)  ;;  %vm619_vm1 = vsmask.f32 (!%p206_p3), 2304 }
   0xa   : > { %vm1043_vm2 = vmand (!%p206_p3), %vm618_vm0, %vm619_vm1 }
   0xe   : > { %s1110_s15 = smov (!%p246_p4, %s847_s15), 1 }
   0xf   : > { %s807_s19 = smul.u32 28, %s1110_s15 }
  0x10   : > { %s808_s21 = smul.u32 20, %s1110_s15 }
  0x11   : > { %s921_s28 = scalar_lea.vmem %s1098_s0, %s807_s19 }
  0x12   : > { %v271_v7 = vld [vmem:[%s921_s28] sm:$0x7]  ;;  %v771_v9 = vld [vmem:[%s921_s28 + $0x4] sm:$0x7]  ;;  %v787_v14 = vld [vmem:[%s921_s28 + $0x8] sm:$0x7]  ;;  %s1033_s25 = scalar_lea.vmem %s1102_s4, %s808_s21 }
  0x13   : > { %v331_v8 = vld [vmem:[%s921_s28] sm:$0xe]  ;;  %v276_v10 = vunpack.c.l.bf16 %v271_v7  ;;  %v380_v12 = vunpack.c.l.bf16 %v771_v9  ;;  %v780_v13 = vld [vmem:[%s921_s28 + $0x4] sm:$0xe]  ;;  %v796_v15 = vld [vmem:[%s921_s28 + $0x8] sm:$0xe]  ;;  %v485_v17 = vunpack.c.l.bf16 %v787_v14 }
  0x14   : > { %v336_v11 = vunpack.c.l.bf16 %v331_v8  ;;  %v441_v16 = vunpack.c.l.bf16 %v780_v13  ;;  %v546_v19 = vunpack.c.l.bf16 %v796_v15  ;;  %v272_v20 = vld [vmem:[%s921_s28 + $0x4] sm:$0x7]  ;;  %v772_v30 = vld [vmem:[%s921_s28 + $0x8] sm:$0x7]  ;;  %v788_v36 = vld [vmem:[%s921_s28 + $0xc] sm:$0x7] }
  0x15   : > { %v288_v21 = vmul.f32 %v906_v0, %v276_v10  ;;  %v306_v22 = vmul.f32 %v911_v1, %v276_v10  ;;  %v332_v25 = vld [vmem:[%s921_s28 + $0x4] sm:$0xe]  ;;  %v393_v26 = vmul.f32 %v926_v3, %v380_v12  ;;  %v411_v27 = vmul.f32 %v931_v4, %v380_v12  ;;  %v781_v35 = vld [vmem:[%s921_s28 + $0x8] sm:$0xe]  ;;  %v797_v41 = vld [vmem:[%s921_s28 + $0xc] sm:$0xe] }
  0x16   : > { %v349_v23 = vmul.f32 %v916_v2, %v336_v11  ;;  %v454_v28 = vmul.f32 %v936_v5, %v441_v16  ;;  %v968_v29 = vmul.f32 %v941_v6, %v485_v17  ;;  %v498_v33 = vmul.f32 %v952_v18, %v485_v17  ;;  %v273_v42 = vld [vmem:[%s921_s28 + $0x8] sm:$0x7]  ;;  %v773_v7 = vld [vmem:[%s921_s28 + $0xc] sm:$0x7]  ;;  %v789_v13 = vld [vmem:[%s921_s28 + $0x10] sm:$0x7] }
  0x17   : > { %v316_v31 = vrot.slane %v306_v22, 1  ;;  %v277_v34 = vunpack.c.l.bf16 %v272_v20  ;;  %v421_v37 = vrot.slane %v411_v27, 1  ;;  %v975_v39 = vmul.f32 %v961_v24, %v546_v19  ;;  %v333_v63 = vld [vmem:[%s921_s28 + $0x8] sm:$0xe]  ;;  %v782_v8 = vld [vmem:[%s921_s28 + $0xc] sm:$0xe] }
  0x18   : > { %v359_v32 = vrot.slane %v349_v23, 2  ;;  %v464_v38 = vrot.slane %v454_v28, 2  ;;  %v337_v40 = vunpack.c.l.bf16 %v332_v25  ;;  %v526_v44 = vrot.slane %v968_v29, 1 }
  0x19   : > { %v326_v43 = vadd.f32 %v316_v31, %v288_v21  ;;  %v289_v45 = vmul.f32 %v906_v0, %v277_v34  ;;  %v307_v46 = vmul.f32 %v911_v1, %v277_v34  ;;  %v381_v48 = vunpack.c.l.bf16 %v772_v30  ;;  %v274_v34 = vld [vmem:[%s921_s28 + $0xc] sm:$0x7] }
  0x1a   : > { %v350_v47 = vmul.f32 %v916_v2, %v337_v40  ;;  %v442_v49 = vunpack.c.l.bf16 %v781_v35  ;;  %v486_v50 = vunpack.c.l.bf16 %v788_v36  ;;  %v547_v53 = vunpack.c.l.bf16 %v797_v41  ;;  %v774_v40 = vld [vmem:[%s921_s28 + $0x10] sm:$0x7] }
  0x1b   : > { %v369_v51 = vadd.f32 %v359_v32, %v326_v43  ;;  %v317_v52 = vrot.slane %v307_v46, 1  ;;  %v278_v54 = vunpack.c.l.bf16 %v273_v42  ;;  %v569_v55 = vrot.slane %v975_v39, 2  ;;  %v798_v32 = vld [vmem:[%s921_s28 + $0x10] sm:$0xe]  ;;  %v334_v39 = vld [vmem:[%s921_s28 + $0xc] sm:$0xe] }
  0x1c   : > { %v360_v56 = vrot.slane %v350_v47, 2  ;;  %v412_v57 = vmul.f32 %v931_v4, %v381_v48  ;;  %v455_v58 = vmul.f32 %v936_v5, %v442_v49  ;;  %v394_v61 = vmul.f32 %v926_v3, %v381_v48  ;;  %v1012_v49 = vld [vmem:[%s1100_s2] ss:$0 sm:$0xff] }
  0x1d   : > { %v398_v59 = vadd.f32 %v393_v26, %v369_v51  ;;  %v327_v60 = vadd.f32 %v317_v52, %v289_v45  ;;  %v517_v62 = vmul.f32 %v941_v6, %v486_v50  ;;  %v499_v11 = vmul.f32 %v952_v18, %v486_v50 }
  0x1e   : > { %v422_v9 = vrot.slane %v412_v57, 1  ;;  %v465_v10 = vrot.slane %v455_v58, 2  ;;  %v993_v12 = vmul.f32 %v961_v24, %v547_v53  ;;  %v290_v16 = vmul.f32 %v906_v0, %v278_v54  ;;  %v783_v58 = vld [vmem:[%s921_s28 + $0x10] sm:$0xe] }
  0x1f   : > { %v431_v14 = vadd.f32 %v421_v37, %v398_v59  ;;  %v370_v15 = vadd.f32 %v360_v56, %v327_v60  ;;  %v308_v17 = vmul.f32 %v911_v1, %v278_v54  ;;  %v527_v19 = vrot.slane %v517_v62, 1  ;;  %v1020_v59 = vld [vmem:[%s1101_s3] ss:$0 sm:$0xff] }
  0x20   : > { %v338_v20 = vunpack.c.l.bf16 %v333_v63  ;;  %v382_v21 = vunpack.c.l.bf16 %v773_v7  ;;  %v443_v22 = vunpack.c.l.bf16 %v782_v8  ;;  %v487_v27 = vunpack.c.l.bf16 %v789_v13  ;;  %v790_v7 = vld [vmem:[%s921_s28 + $0x14] sm:$0x7] }
  0x21   : > { %v474_v23 = vadd.f32 %v464_v38, %v431_v14  ;;  %v399_v25 = vadd.f32 %v394_v61, %v370_v15  ;;  %v318_v26 = vrot.slane %v308_v17, 1  ;;  %v570_v28 = vrot.slane %v993_v12, 2 }
  0x22   : > { %v351_v29 = vmul.f32 %v916_v2, %v338_v20  ;;  %v413_v30 = vmul.f32 %v931_v4, %v382_v21  ;;  %v456_v31 = vmul.f32 %v936_v5, %v443_v22  ;;  %v395_v38 = vmul.f32 %v926_v3, %v382_v21 }
  0x23   : > { %v503_v35 = vadd.f32 %v498_v33, %v474_v23  ;;  %v432_v36 = vadd.f32 %v422_v9, %v399_v25  ;;  %v328_v37 = vadd.f32 %v318_v26, %v290_v16  ;;  %v500_v43 = vmul.f32 %v952_v18, %v487_v27  ;;  %v275_v26 = vld [vmem:[%s921_s28 + $0x10] sm:$0x7] }
  0x24   : > { %v361_v41 = vrot.slane %v351_v29, 2  ;;  %v423_v42 = vrot.slane %v413_v30, 1  ;;  %v518_v45 = vmul.f32 %v941_v6, %v487_v27  ;;  %v548_v48 = vunpack.c.l.bf16 %v798_v32  ;;  %v335_v32 = vld [vmem:[%s921_s28 + $0x10] sm:$0xe] }
  0x25   : > { %v536_v46 = vadd.f32 %v526_v44, %v503_v35  ;;  %v475_v47 = vadd.f32 %v465_v10, %v432_v36  ;;  %v279_v33 = vunpack.c.l.bf16 %v274_v34  ;;  %v466_v51 = vrot.slane %v456_v31, 2  ;;  %v621_v34 = vld [vmem:[%s1033_s25] sm:$0x7] }
  0x26   : > { %v371_v50 = vadd.f32 %v361_v41, %v328_v37  ;;  %v339_v52 = vunpack.c.l.bf16 %v334_v39  ;;  %v383_v53 = vunpack.c.l.bf16 %v774_v40  ;;  %v528_v57 = vrot.slane %v518_v45, 1  ;;  %v775_v45 = vld [vmem:[%s921_s28 + $0x14] sm:$0x7] }
  0x27   : > { %v579_v54 = vadd.f32 %v569_v55, %v536_v46  ;;  %v504_v56 = vadd.f32 %v499_v11, %v475_v47  ;;  %v561_v44 = vmul.f32 %v961_v24, %v548_v48  ;;  %v291_v61 = vmul.f32 %v906_v0, %v279_v33  ;;  %v799_v11 = vld [vmem:[%s921_s28 + $0x14] sm:$0xe] }
  0x28   : > { %v400_v60 = vadd.f32 %v395_v38, %v371_v50  ;;  %v309_v62 = vmul.f32 %v911_v1, %v279_v33  ;;  %v352_v63 = vmul.f32 %v916_v2, %v339_v52  ;;  %v396_v9 = vmul.f32 %v926_v3, %v383_v53  ;;  %v784_v50 = vld [vmem:[%s921_s28 + $0x14] sm:$0xe] }
  0x29   : > { %v591_v55 = vmul.f32 %v1012_v49, %v579_v54  ;;  %v537_v8 = vadd.f32 %v527_v19, %v504_v56  ;;  %v414_v10 = vmul.f32 %v931_v4, %v383_v53  ;;  %v444_v15 = vunpack.c.l.bf16 %v783_v58  ;;  %v624_v56 = vld [vmem:[%s1033_s25 + $0x4] sm:$0x7] }
  0x2a   : > { %v433_v12 = vadd.f32 %v423_v42, %v400_v60  ;;  %v319_v13 = vrot.slane %v309_v62, 1  ;;  %v362_v14 = vrot.slane %v352_v63, 2  ;;  %v571_v19 = vrot.slane %v561_v44, 2 }
  0x2b   : > { %v603_v16 = vadd.f32 %v1020_v59, %v591_v55  ;;  %v580_v17 = vadd.f32 %v570_v28, %v537_v8  ;;  %v488_v20 = vunpack.c.l.bf16 %v790_v7  ;;  %v457_v23 = vmul.f32 %v936_v5, %v444_v15 }
  0x2c   : > { %v476_v21 = vadd.f32 %v466_v51, %v433_v12  ;;  %v329_v22 = vadd.f32 %v319_v13, %v291_v61  ;;  %v549_v25 = vunpack.c.l.bf16 %v799_v11  ;;  %v424_v30 = vrot.slane %v414_v10, 1  ;;  %v791_v51 = vld [vmem:[%s921_s28 + $0x18] sm:$0x7] }
  0x2d   : > { %v608_v27 = vmax.f32 %v603_v16, 0.0  ;;  %v592_v29 = vmul.f32 %v1012_v49, %v580_v17  ;;  %v519_v31 = vmul.f32 %v941_v6, %v488_v20  ;;  %v467_v37 = vrot.slane %v457_v23, 2 }
  0x2e   : > { %v505_v35 = vadd.f32 %v500_v43, %v476_v21  ;;  %v372_v36 = vadd.f32 %v362_v14, %v329_v22  ;;  %v501_v38 = vmul.f32 %v952_v18, %v488_v20  ;;  %v562_v41 = vmul.f32 %v961_v24, %v549_v25  ;;  %v627_v21 = vld [vmem:[%s1033_s25 + $0x8] sm:$0x7] }
  0x2f   : > { %v613_v39 = vpack.c.bf16 %v608_v27, %v608_v27  ;;  %v604_v40 = vadd.f32 %v1020_v59, %v592_v29  ;;  %v280_v42 = vunpack.c.l.bf16 %v275_v26  ;;  %v529_v48 = vrot.slane %v519_v31, 1 }
  0x30   : > { %v538_v46 = vadd.f32 %v528_v57, %v505_v35  ;;  %v401_v47 = vadd.f32 %v396_v9, %v372_v36  ;;  %v340_v33 = vunpack.c.l.bf16 %v335_v32  ;;  %v384_v60 = vunpack.c.l.bf16 %v775_v45 }
  0x31   : > { %v622_v43 = vsel %vm1043_vm2, %v613_v39, %v621_v34  ;;  %v609_v52 = vmax.f32 %v604_v40, 0.0  ;;  %v292_v53 = vmul.f32 %v906_v0, %v280_v42  ;;  %v310_v54 = vmul.f32 %v911_v1, %v280_v42  ;;  %v800_v1 = vld [vmem:[%s921_s28 + $0x18] sm:$0xe] }
  0x32   : > { %623 = vst [vmem:[%s1033_s25] sm:$0x7] %v622_v43  ;;  %v581_v44 = vadd.f32 %v571_v19, %v538_v46  ;;  %v434_v58 = vadd.f32 %v424_v30, %v401_v47  ;;  %v353_v57 = vmul.f32 %v916_v2, %v340_v33  ;;  %v445_v63 = vunpack.c.l.bf16 %v784_v50  ;;  %v633_v46 = vld [vmem:[%s1033_s25 + $0x10] sm:$0x7] }
  0x33   : > { %v614_v61 = vpack.c.bf16 %v609_v52, %v609_v52  ;;  %v320_v62 = vrot.slane %v310_v54, 1  ;;  %v489_v7 = vunpack.c.l.bf16 %v791_v51  ;;  %v397_v0 = vmul.f32 %v926_v3, %v384_v60 }
  0x34   : > { %v593_v55 = vmul.f32 %v1012_v49, %v581_v44  ;;  %v477_v8 = vadd.f32 %v467_v37, %v434_v58  ;;  %v363_v9 = vrot.slane %v353_v57, 2  ;;  %v415_v12 = vmul.f32 %v931_v4, %v384_v60 }
  0x35   : > { %v625_v10 = vsel %vm1043_vm2, %v614_v61, %v624_v56  ;;  %v330_v11 = vadd.f32 %v320_v62, %v292_v53  ;;  %v458_v2 = vmul.f32 %v936_v5, %v445_v63  ;;  %v572_v15 = vrot.slane %v562_v41, 2 }
  0x36   : > { %626 = vst [vmem:[%s1033_s25 + $0x4] sm:$0x7] %v625_v10  ;;  %v605_v13 = vadd.f32 %v1020_v59, %v593_v55  ;;  %v506_v14 = vadd.f32 %v501_v38, %v477_v8  ;;  %v425_v17 = vrot.slane %v415_v12, 1  ;;  %v550_v19 = vunpack.c.l.bf16 %v800_v1  ;;  %v630_v38 = vld [vmem:[%s1033_s25 + $0xc] sm:$0x7] }
  0x37   : > { %v373_v16 = vadd.f32 %v363_v9, %v330_v11  ;;  %v468_v23 = vrot.slane %v458_v2, 2  ;;  %v520_v25 = vmul.f32 %v941_v6, %v489_v7  ;;  %v502_v27 = vmul.f32 %v952_v18, %v489_v7 }
  0x38   : > { %v610_v20 = vmax.f32 %v605_v13, 0.0  ;;  %v539_v3 = vadd.f32 %v529_v48, %v506_v14  ;;  %v563_v29 = vmul.f32 %v961_v24, %v550_v19 }
  0x39   : > { %v402_v22 = vadd.f32 %v397_v0, %v373_v16  ;;  %v530_v34 = vrot.slane %v520_v25, 1 }
  0x3a   : > { %v615_v4 = vpack.c.bf16 %v610_v20, %v610_v20  ;;  %v582_v26 = vadd.f32 %v572_v15, %v539_v3  ;;  %v573_v36 = vrot.slane %v563_v29, 2 }
  0x3b   : > { %v435_v5 = vadd.f32 %v425_v17, %v402_v22 }
  0x3c   : > { %v628_v30 = vsel %vm1043_vm2, %v615_v4, %v627_v21  ;;  %v594_v31 = vmul.f32 %v1012_v49, %v582_v26 }
  0x3d   : > { %629 = vst [vmem:[%s1033_s25 + $0x8] sm:$0x7] %v628_v30  ;;  %v478_v32 = vadd.f32 %v468_v23, %v435_v5 }
  0x3e   : > { %v606_v35 = vadd.f32 %v1020_v59, %v594_v31 }
  0x3f   : > { %v507_v6 = vadd.f32 %v502_v27, %v478_v32 }
  0x40   : > { %v611_v37 = vmax.f32 %v606_v35, 0.0 }
  0x41   : > { %v540_v18 = vadd.f32 %v530_v34, %v507_v6 }
  0x42   : > { %v616_v39 = vpack.c.bf16 %v611_v37, %v611_v37 }
  0x43   : > { %v583_v40 = vadd.f32 %v573_v36, %v540_v18 }
  0x44   : > { %v631_v24 = vsel %vm1043_vm2, %v616_v39, %v630_v38 }
  0x45   : > { %632 = vst [vmem:[%s1033_s25 + $0xc] sm:$0x7] %v631_v24  ;;  %v595_v41 = vmul.f32 %v1012_v49, %v583_v40 }
  0x47   : > { %v607_v42 = vadd.f32 %v1020_v59, %v595_v41 }
  0x49   : > { %v612_v45 = vmax.f32 %v607_v42, 0.0 }
  0x4b   : > { %v617_v47 = vpack.c.bf16 %v612_v45, %v612_v45 }
  0x4d   : > { %v634_v48 = vsel %vm1043_vm2, %v617_v47, %v633_v46 }
  0x4e   : > { %635 = vst [vmem:[%s1033_s25 + $0x10] sm:$0x7] %v634_v48 }
  0x4f PF: > { %s14_s17 = sadd.s32 1, %s855_s17   ;;  %s1105_s15 = smov %s851_s16 }
  0x50   : > { %p11_p5 = scmp.ge.s32.totalorder %s14_s17, 4   ;;  %s1106_s16 = smov %s1108_s18 }
  0x52   :  { %13 = sbr.rel (!%p11_p5) target bundleno = 2 (0x2), region = 85 }

// kernel: _lambda_.13
= control target key start
LH: loop header
LB: loop body
LE: loop exit
PB: predicated region body
PF: predicated region fallthrough
CT: control target
= control target key end

     0   :  { %s1751_s27 = smov 0   ;;  %s1968_s0 = inlined_call_operand.vmem [shape: bf16[2,8,25], index: 0, kind: input, shape index: {}]   ;;  %s1969_s1 = inlined_call_operand.vmem [shape: bf16[2,8,25], index: 1, kind: input, shape index: {}]   ;;  %s1970_s2 = inlined_call_operand.vmem [shape: bf16[2,8,25], index: 2, kind: input, shape index: {}]   ;;  %s1971_s3 = inlined_call_operand.vmem [shape: f32[2,8,25], index: 3, kind: input, shape index: {}, may-alias: {3,13}]   ;;  %s1972_s4 = inlined_call_operand.vmem [shape: bf16[4,2,2], index: 4, kind: input, shape index: {}]   ;;  %s1973_s5 = inlined_call_operand.vmem [shape: bf16[4,2,2], index: 5, kind: input, shape index: {}]   ;;  %s1974_s6 = inlined_call_operand.vmem [shape: f32[4,2,1], index: 6, kind: input, shape index: {}]   ;;  %s1975_s7 = inlined_call_operand.vmem [shape: f32[4,2,1], index: 7, kind: input, shape index: {}]   ;;  %s1976_s8 = inlined_call_operand.vmem [shape: f32[4,1,2], index: 8, kind: input, shape index: {}]   ;;  %s1977_s9 = inlined_call_operand.vmem [shape: f32[4,1,1], index: 9, kind: input, shape index: {}]   ;;  %s1978_s10 = inlined_call_operand.vmem [shape: f32[8,1], index: 10, kind: input, shape index: {}]   ;;  %s1979_s11 = inlined_call_operand.vmem [shape: f32[8,1], index: 11, kind: input, shape index: {}]   ;;  %s1980_s12 = inlined_call_operand.<no memory space> [shape: f32[1,1], index: 12, kind: input, shape index: {}]   ;;  %s1981_s13 = inlined_call_operand.vmem [shape: f32[2,8,25], index: 13, kind: output, shape index: {}, may-alias: {3,13}]  }
   0x1   :  { %v18_v0 = vstv %s1980_s12 }
   0x2   :  { %19 = vst [vmem:[#allocation2] sm:$0x1] %v18_v0 }
   0x3 LB: > { %s1492_s28 = sadd.s32 4294967295, %s1673_s27   ;;  %p1496_p0 = scmp.ge.s32.totalorder %s1673_s27, 1  ;;  %s1673_s27 = sphi %s1751_s27, %s25_s27  }
   0x4   : > { %p415_p1 = scmp.lt.s32.totalorder %s1673_s27, 3 }
   0x6   : > { %p416_p2 = pnand %p1496_p0, %p415_p1 }
   0x7   : > { %p469_p3 = scmp.lt.s32.totalorder (!%p416_p2), %s1492_s28, 1  ;;  %v1675_v1 = vmov (!%p416_p2), 0.0   ;;  %vm1676_vm0 = vmmov (!%p416_p2), 0   ;;  %v588_v2 = vld [vmem:[%s1974_s6] sm:$0x3] (!%p416_p2)  ;;  %v1677_v3 = vmov (!%p416_p2), 0   ;;  %v610_v19 = vlaneseq (!%p416_p2) }
   0x8   : > { %419 = sbr.rel (%p416_p2) target bundleno = 1297 (0x511), region = 72  ;;  %1564 = vmatprep.subr.bf16.mxu0 (!%p416_p2), %v1675_v1  ;;  %1566 = vmatprep.mubr.msk.bf16.mxu0 (!%p416_p2), %vm1676_vm0, %v1675_v1  ;;  %vm498_vm1 = vcmask (!%p416_p2), 1040384   ;;  %v595_v4 = vld [vmem:[%s1975_s7] sm:$0x3] (!%p416_p2)  ;;  %vm494_vm2 = vcmask (!%p416_p2), 15360   ;;  %vm617_vm3 = vcmask (!%p416_p2), 1041408  }
   0x9   : > { %1659 = vset.pattern.permute.xlu0 (!%p416_p2), %v1677_v3  ;;  %1576 = vmatprep.subr.mxu1 (!%p416_p2), %v1675_v1  ;;  %v493_v8 = vld [vmem:[%s1973_s5] sm:$0x1] (!%p416_p2)  ;;  %v1522_v9 = vld [vmem:[%s1974_s6 + $0x4] sm:$0x3] (!%p416_p2)  ;;  %v1532_v11 = vld [vmem:[%s1974_s6 + $0x6] sm:$0x3] (!%p416_p2) }
   0xa   : > { %591 = vperm.xlu0 (!%p416_p2), %1659, %v588_v2   ;;  %1578 = vmatprep.mubr.msk.f32.mxu1 (!%p416_p2), %vm1676_vm0, %v1675_v1  ;;  %v1515_v12 = vld [vmem:[%s1977_s9 + $0x1] sm:$0x1] (!%p416_p2)  ;;  %v492_v13 = vld [vmem:[%s1972_s4] sm:$0x1] (!%p416_p2)  ;;  %v1512_v15 = vld [vmem:[%s1974_s6 + $0x2] sm:$0x3] (!%p416_p2) }
   0xb   : > { %1660 = vset.pattern.permute.xlu1 (!%p416_p2), %v1677_v3  ;;  %v604_v14 = vld [vmem:[%s1977_s9] sm:$0x1] (!%p416_p2)  ;;  %v1513_v16 = vld [vmem:[%s1975_s7 + $0x2] sm:$0x3] (!%p416_p2)  ;;  %v1523_v17 = vld [vmem:[%s1975_s7 + $0x4] sm:$0x3] (!%p416_p2) }
   0xc   : > { %799 = vperm.xlu1 (!%p416_p2), %1660, %v1512_v15   ;;  %v1533_v18 = vld [vmem:[%s1975_s7 + $0x6] sm:$0x3] (!%p416_p2)  ;;  %v1525_v20 = vld [vmem:[%s1977_s9 + $0x2] sm:$0x1] (!%p416_p2)  ;;  %v1833_v21 = vld [vmem:[#allocation2] sm:$0x1] (!%p416_p2) }
   0xd   : > { %v1835_v22 = vshrl.u32 (!%p416_p2), %v610_v19, 7  ;;  %v1372_v23 = vsub.f32 (!%p416_p2), 1.0, %v1833_v21  ;;  %v1535_v24 = vld [vmem:[%s1977_s9 + $0x3] sm:$0x1] (!%p416_p2)  ;;  %v603_v39 = vld [vmem:[%s1976_s8] sm:$0x1] (!%p416_p2) }
   0xe   : > { %598 = vperm.xlu0 (!%p416_p2), %1659, %v595_v4   ;;  %v1507_v42 = vld [vmem:[%s1973_s5 + $0x1] sm:$0x1] (!%p416_p2)  ;;  %v1519_v48 = vld [vmem:[%s1973_s5 + $0x2] sm:$0x1] (!%p416_p2)  ;;  %v1529_v15 = vld [vmem:[%s1973_s5 + $0x3] sm:$0x1] (!%p416_p2) }
   0xf   : > { %s1983_s28 = smov (!%p469_p3, %s1492_s28), 1  ;;  %v1842_v25 = vsub.s32 0, %v1835_v22  ;;  %v1506_v45 = vld [vmem:[%s1972_s4 + $0x1] sm:$0x1]  ;;  %v1518_v50 = vld [vmem:[%s1972_s4 + $0x2] sm:$0x1] }
  0x10   : > { %s1771_s30 = sshll.u32 %s1983_s28, 2  ;;  %807 = vperm.xlu1 %1660, %v1513_v16   ;;  %v1514_v62 = vld [vmem:[%s1976_s8 + $0x1] sm:$0x1]  ;;  %vm1320_vm4 = vcmask 1042432   ;;  %vm1322_vm5 = vcmask 199680   ;;  %vm1351_vm6 = vcmask 1043456  }
  0x11   : > { %s476_s18 = scalar_lea.vmem %s1969_s1, %s1771_s30  ;;  %s472_s21 = scalar_lea.vmem %s1968_s0, %s1771_s30  ;;  %v1377_v26 = vrot.slane %v1372_v23, %v1842_v25  ;;  %vm1353_vm7 = vcmask 1045504   ;;  %vm1401_vm8 = vcmask 203776  }
  0x12   : > { %v1784_v5 = vld [vmem:[%s476_s18] sm:$0xf]  ;;  %1003 = vperm.xlu0 %1659, %v1522_v9   ;;  %s480_s12 = scalar_lea.vmem %s1970_s2, %s1771_s30  ;;  %s1500_s30 = sshll.u32 %s1983_s28, 3 }
  0x13   : > { %v1786_v6 = vld [vmem:[%s472_s21] sm:$0xf]  ;;  %v500_v7 = vsel %vm498_vm1, %v1784_v5, 0  ;;  %v1847_v28 = vcombine.low %v1784_v5, %v1784_v5  ;;  %s484_s15 = scalar_lea.vmem %s1971_s3, %s1500_s30  ;;  %s488_s18 = scalar_lea.vmem %s1981_s13, %s1500_s30 }
  0x14   : > { %1565 = vmatpush3.bf16.msra.mxu0 %v500_v7  ;;  %v546_v10 = vsel %vm498_vm1, %v1786_v6, 0  ;;  %1011 = vperm.xlu1 %1660, %v1523_v17   ;;  %v1851_v32 = vcombine.low %v1786_v6, %v1786_v6  ;;  %v1528_v17 = vld [vmem:[%s1972_s4 + $0x3] sm:$0x1] }
  0x15   : > { %1570 = vmatprep.subr.bf16.mxu0 %v1675_v1  ;;  %v698_v35 = vrot.slane %v1847_v28, 1  ;;  %v905_v44 = vrot.slane %v1847_v28, 2 }
  0x16   : > { %1207 = vperm.xlu0 %1659, %v1532_v11   ;;  %v748_v41 = vrot.slane %v1851_v32, 1  ;;  %v952_v47 = vrot.slane %v1851_v32, 2 }
  0x17   : > { %1567 = vmatmul.mubr.msk.bf16.vlgmr.msra.gmra.mrb[0].mxu0 %vm494_vm2, %v493_v8  ;;  %v703_v40 = vsel %vm498_vm1, %v698_v35, 0  ;;  %v910_v46 = vsel %vm498_vm1, %v905_v44, 0  ;;  %v1109_v8 = vrot.slane %v1847_v28, 3 }
  0x18   : > { %1571 = vmatpush3.bf16.msra.mxu0 %v546_v10  ;;  %1572 = vmatprep.mubr.msk.bf16.mxu0 %vm1676_vm0, %v1675_v1  ;;  %v753_v43 = vsel %vm498_vm1, %v748_v41, 0  ;;  %v957_v49 = vsel %vm498_vm1, %v952_v47, 0 }
  0x19   : > { %1593 = vmatprep.subr.mxu0 %v1675_v1  ;;  %1215 = vperm.xlu1 %1660, %v1533_v18  }
  0x1a   : > { %818 = vperm.xlu0 %1659, %v1515_v12   ;;  %v1524_v12 = vld [vmem:[%s1976_s8 + $0x2] sm:$0x1] }
  0x1d   : > { %1022 = vperm.xlu1 %1660, %v1525_v20  }
  0x1e   : > { %607 = vperm.xlu0 %1659, %v604_v14   ;;  %v1156_v14 = vrot.slane %v1851_v32, 3 }
  0x20   : > { %v1161_v16 = vsel %vm498_vm1, %v1156_v14, 0 }
  0x21   : > { %1226 = vperm.xlu1 %1660, %v1535_v24  }
  0x23   : > { %1573 = vmatmul.mubr.msk.bf16.vlgmr.msra.gmra.mrb[0].mxu0 %vm494_vm2, %v492_v13  ;;  %v1114_v13 = vsel %vm498_vm1, %v1109_v8, 0 }
  0x24   : > { %1595 = vmatprep.mubr.msk.f32.mxu0 %vm1676_vm0, %v1675_v1 }
  0x25   : > { %1379 = vperm.xlu1 %1660, %v1377_v26  }
  0x89   : > { %v592_v27 = vpop.permute.xlu0 %591 }
  0x8b   : > { %v800_v53 = vpop.permute.xlu1 %799 }
  0x8d   : > { %v599_v33 = vpop.permute.xlu0 %598 }
  0x8f   : > { %v808_v57 = vpop.permute.xlu1 %807 }
  0x91   : > { %v1004_v63 = vpop.permute.xlu0 %1003 }
  0x93   : > { %v1012_v4 = vpop.permute.xlu1 %1011 }
  0x95   : > { %v1208_v18 = vpop.permute.xlu0 %1207 }
  0x99   : > { %v819_v19 = vpop.permute.xlu0 %818 }
  0x9a   : > { %v824_v23 = vrot.slane %v819_v19, %v1842_v25 }
  0x9d   : > { %v608_v20 = vpop.permute.xlu0 %607 }
  0x9e   : > { %v613_v26 = vrot.slane %v608_v20, %v1842_v25 }
  0xf6   : > { %v582_v29 = vpop.f32.mrb[0].mxu0 }
  0xf7   : > { %v594_v30 = vmul.f32 %v592_v27, %v582_v29  ;;  %v1574_v31 = vpop.f32.mrb[1].mxu0 }
  0xf8   : > { %v585_v34 = vpop.f32.mrb[2].mxu0  ;;  %v1216_v31 = vpop.permute.xlu1 %1215 }
  0xf9   : > { %v601_v36 = vadd.f32 %v599_v33, %v594_v30  ;;  %v1575_v37 = vpop.f32.mrb[3].mxu0 }
  0xfb   : > { %v602_v38 = vmax.f32 %v601_v36, 0.0 }
  0xfc   : > { %v1023_v32 = vpop.permute.xlu1 %1022 }
  0xfd   : > { %1577 = vmatpush3.msk.msra.mxu1 %vm617_vm3, %v602_v38  ;;  %v1028_v33 = vrot.slane %v1023_v32, %v1842_v25 }
  0xfe   : > { %1579 = vmatmul.mubr.msk.f32.vlgmr.msra.gmra.mrb[0].mxu1 %vm494_vm2, %v603_v39  ;;  %1581 = vmatprep.subr.bf16.mxu1 %v1675_v1 }
  0xff   : > { %1582 = vmatpush3.bf16.msra.mxu1 %v703_v40  ;;  %1583 = vmatprep.mubr.msk.bf16.mxu1 %vm1676_vm0, %v1675_v1 }
 0x100   : > { %1587 = vmatprep.subr.bf16.mxu1 %v1675_v1  ;;  %v1227_v47 = vpop.permute.xlu1 %1226 }
 0x102   : > { %1584 = vmatmul.mubr.msk.bf16.vlgmr.msra.gmra.mrb[4].mxu1 %vm494_vm2, %v1507_v42 }
 0x103   : > { %1588 = vmatpush3.bf16.msra.mxu1 %v753_v43  ;;  %1589 = vmatprep.mubr.msk.bf16.mxu1 %vm1676_vm0, %v1675_v1 }
 0x104   : > { %1598 = vmatprep.subr.bf16.mxu1 %v1675_v1 }
 0x10e   : > { %1590 = vmatmul.mubr.msk.bf16.vlgmr.msra.gmra.mrb[4].mxu1 %vm494_vm2, %v1506_v45 }
 0x10f   : > { %1599 = vmatpush3.bf16.msra.mxu1 %v910_v46  ;;  %1600 = vmatprep.mubr.msk.bf16.mxu1 %vm1676_vm0, %v1675_v1  ;;  %v1534_v46 = vld [vmem:[%s1976_s8 + $0x3] sm:$0x1] }
 0x110   : > { %1604 = vmatprep.subr.bf16.mxu1 %v1675_v1 }
 0x116   : > { %1601 = vmatmul.mubr.msk.bf16.vlgmr.msra.gmra.mrb[8].mxu1 %vm494_vm2, %v1519_v48  ;;  %v1232_v48 = vrot.slane %v1227_v47, %v1842_v25 }
 0x117   : > { %1605 = vmatpush3.bf16.msra.mxu1 %v957_v49  ;;  %1606 = vmatprep.mubr.msk.bf16.mxu1 %vm1676_vm0, %v1675_v1 }
 0x118   : > { %1627 = vmatprep.subr.mxu1 %v1675_v1 }
 0x122   : > { %1607 = vmatmul.mubr.msk.bf16.vlgmr.msra.gmra.mrb[8].mxu1 %vm494_vm2, %v1518_v50 }
 0x123   : > { %1629 = vmatprep.mubr.msk.f32.mxu1 %vm1676_vm0, %v1675_v1 }
 0x1d1   : > { %v687_v51 = vpop.f32.mrb[0].mxu1 }
 0x1d2   : > { %v1580_v52 = vpop.f32.mrb[1].mxu1  ;;  %v688_v29 = vadd.f32 %v687_v51, %v613_v26 }
 0x1e1   : > { %v789_v54 = vpop.f32.mrb[4].mxu1 }
 0x1e2   : > { %v802_v55 = vmul.f32 %v800_v53, %v789_v54  ;;  %v1591_v56 = vpop.f32.mrb[5].mxu1 }
 0x1e3   : > { %v792_v58 = vpop.f32.mrb[6].mxu1  ;;  %v1384_v56 = vld [vmem:[%s1978_s10] sm:$0xff] }
 0x1e4   : > { %v810_v59 = vadd.f32 %v808_v57, %v802_v55  ;;  %v1592_v60 = vpop.f32.mrb[7].mxu1  ;;  %v1366_v55 = vrot.slane %v1833_v21, %v1842_v25  ;;  %v1380_v21 = vpop.permute.xlu1 %1379 }
 0x1e6   : > { %v811_v61 = vmax.f32 %v810_v59, 0.0 }
 0x1e8   : > { %1594 = vmatpush3.msk.msra.mxu0 %vm617_vm3, %v811_v61 }
 0x1e9   : > { %1596 = vmatmul.mubr.msk.f32.vlgmr.msra.gmra.mrb[4].mxu0 %vm494_vm2, %v1514_v62  ;;  %1610 = vmatprep.subr.mxu0 %v1675_v1  ;;  %v1391_v62 = vld [vmem:[%s1979_s11] sm:$0xff] }
 0x1ea   : > { %1612 = vmatprep.mubr.msk.f32.mxu0 %vm1676_vm0, %v1675_v1 }
 0x1f5   : > { %v993_v0 = vpop.f32.mrb[8].mxu1 }
 0x1f6   : > { %v1006_v2 = vmul.f32 %v1004_v63, %v993_v0  ;;  %v1608_v3 = vpop.f32.mrb[9].mxu1  ;;  %v1340_v0 = vsub.s32 1, %v1835_v22 }
 0x1f7   : > { %v996_v7 = vpop.f32.mrb[10].mxu1 }
 0x1f8   : > { %v1014_v9 = vadd.f32 %v1012_v4, %v1006_v2  ;;  %v1609_v10 = vpop.f32.mrb[11].mxu1  ;;  %v1344_v2 = vsub.s32 2, %v1835_v22  ;;  %v1348_v7 = vsub.s32 3, %v1835_v22 }
 0x1fa   : > { %v1015_v11 = vmax.f32 %v1014_v9, 0.0 }
 0x1fc   : > { %1611 = vmatpush3.msk.msra.mxu0 %vm617_vm3, %v1015_v11  ;;  %v1356_v11 = vunpack.c.l.bf16 %v1784_v5 }
 0x1fd   : > { %1613 = vmatmul.mubr.msk.f32.vlgmr.msra.gmra.mrb[6].mxu0 %vm494_vm2, %v1524_v12  ;;  %1615 = vmatprep.subr.bf16.mxu0 %v1675_v1  ;;  %v1360_v12 = vld [vmem:[%s480_s12] sm:$0xf] }
 0x1fe   : > { %1616 = vmatpush3.bf16.msra.mxu0 %v1114_v13  ;;  %1617 = vmatprep.mubr.msk.bf16.mxu0 %vm1676_vm0, %v1675_v1 }
 0x1ff   : > { %1621 = vmatprep.subr.bf16.mxu0 %v1675_v1 }
 0x201   : > { %1618 = vmatmul.mubr.msk.bf16.vlgmr.msra.gmra.mrb[8].mxu0 %vm494_vm2, %v1529_v15  ;;  %v1355_v15 = vunpack.c.l.bf16 %v1786_v6 }
 0x202   : > { %1622 = vmatpush3.bf16.msra.mxu0 %v1161_v16  ;;  %1623 = vmatprep.mubr.msk.bf16.mxu0 %vm1676_vm0, %v1675_v1 }
 0x20d   : > { %1624 = vmatmul.mubr.msk.bf16.vlgmr.msra.gmra.mrb[8].mxu0 %vm494_vm2, %v1528_v17  ;;  %v1361_v17 = vunpack.c.l.bf16 %v1360_v12 }
 0x2bc   : > { %v897_v24 = vpop.f32.mrb[4].mxu0 }
 0x2bd   : > { %v898_v27 = vadd.f32 %v897_v24, %v824_v23  ;;  %v1597_v28 = vpop.f32.mrb[5].mxu0 }
 0x2bf   : > { %v1310_v30 = vrot.slane %v898_v27, 7  ;;  %v1398_v27 = vld [vmem:[%s484_s15] sm:$0xff] }
 0x2c1   : > { %v1318_v1 = vsel %vm498_vm1, %v688_v29, %v1310_v30 }
 0x2d0   : > { %v1101_v34 = vpop.f32.mrb[6].mxu0 }
 0x2d1   : > { %v1102_v35 = vadd.f32 %v1101_v34, %v1028_v33  ;;  %v1614_v36 = vpop.f32.mrb[7].mxu0 }
 0x2d3   : > { %v1313_v37 = vrot.slane %v1102_v35, 6 }
 0x2d5   : > { %v1319_v38 = vsel %vm617_vm3, %v1318_v1, %v1313_v37 }
 0x2e0   : > { %v1197_v39 = vpop.f32.mrb[8].mxu0 }
 0x2e1   : > { %v1210_v40 = vmul.f32 %v1208_v18, %v1197_v39  ;;  %v1625_v41 = vpop.f32.mrb[9].mxu0 }
 0x2e2   : > { %v1200_v42 = vpop.f32.mrb[10].mxu0 }
 0x2e3   : > { %v1218_v43 = vadd.f32 %v1216_v31, %v1210_v40  ;;  %v1626_v44 = vpop.f32.mrb[11].mxu0 }
 0x2e5   : > { %v1219_v45 = vmax.f32 %v1218_v43, 0.0 }
 0x2e7   : > { %1628 = vmatpush3.msk.msra.mxu1 %vm617_vm3, %v1219_v45 }
 0x2e8   : > { %1630 = vmatmul.mubr.msk.f32.vlgmr.msra.gmra.mrb[2].mxu1 %vm494_vm2, %v1534_v46 }
 0x3bb   : > { %v1305_v49 = vpop.f32.mrb[2].mxu1 }
 0x3bc   : > { %v1306_v50 = vadd.f32 %v1305_v49, %v1232_v48  ;;  %v1631_v51 = vpop.f32.mrb[3].mxu1 }
 0x3be   : > { %v1316_v52 = vrot.slane %v1306_v50, 5 }
 0x3c0   : > { %v1321_v53 = vsel %vm1320_vm4, %v1319_v38, %v1316_v52 }
 0x3c1   : > { %v1323_v54 = vsel %vm1322_vm5, %v1321_v53, -inf }
 0x3c2   : > { %1324 = vmax.xlane.f32.xlu0 %v1323_v54 }
 0x3d8   : > { %1368 = vperm.xlu0 %1659, %v1366_v55  }
 0x3dc   : > { %1387 = vperm.xlu0 %1659, %v1384_v56  }
 0x44f   : > { %v1325_v57 = vpop.xlane.xlu0 %1324 }
 0x450   : > { %v1326_v58 = vsub.f32 %v1321_v53, %v1325_v57 }
 0x452   : > { %v1327_v59 = vmul.f32 1.442695, %v1326_v58 }
 0x454   : > { %1663 = vpow2.f32 %v1327_v59 }
 0x457   : > { %v1369_v19 = vpop.permute.xlu0 %1368 }
 0x45b   : > { %v1388_v24 = vpop.permute.xlu0 %1387 }
 0x45e   : > { %v1664_v60 = vpop.eup %1663 }
 0x45f   : > { %v1329_v61 = vsel %vm1322_vm5, %v1664_v60, 0.0 }
 0x460   : > { %1330 = vadd.xlane.f32.xlu1 %v1329_v61 }
 0x471   : > { %1394 = vperm.xlu1 %1660, %v1391_v62  }
 0x4ed   : > { %v1331_v63 = vpop.xlane.xlu1 %1330 }
 0x4ee   : > { %1665 = vrcp.f32 %v1331_v63 }
 0x4f1   : > { %v1395_v28 = vpop.permute.xlu1 %1394 }
 0x4f8   : > { %v1666_v3 = vpop.eup %1665 }
 0x4f9   : > { %v1333_v4 = vmul.f32 %v1666_v3, %v1664_v60 }
 0x4fb   : > { %v1337_v8 = vrot.slane %v1333_v4, %v1842_v25  ;;  %v1341_v9 = vrot.slane %v1333_v4, %v1340_v0  ;;  %v1345_v10 = vrot.slane %v1333_v4, %v1344_v2  ;;  %v1349_v13 = vrot.slane %v1333_v4, %v1348_v7 }
 0x4fc   : > { %v1371_v25 = vmul.f32 %v1369_v19, %v1361_v17 }
 0x4fd   : > { %v1350_v14 = vsel %vm617_vm3, %v1337_v8, %v1341_v9 }
 0x4fe   : > { %v1352_v22 = vsel %vm1351_vm6, %v1350_v14, %v1345_v10 }
 0x4ff   : > { %v1354_v16 = vsel %vm1353_vm7, %v1352_v22, %v1349_v13 }
 0x500   : > { %v1357_v18 = vmul.f32 %v1356_v11, %v1354_v16 }
 0x502   : > { %v1358_v20 = vadd.f32 %v1357_v18, %v1355_v15 }
 0x504   : > { %v1382_v23 = vmul.f32 %v1380_v21, %v1358_v20 }
 0x506   : > { %v1383_v5 = vadd.f32 %v1382_v23, %v1371_v25 }
 0x508   : > { %v1390_v26 = vmul.f32 %v1388_v24, %v1383_v5 }
 0x50a   : > { %v1397_v29 = vadd.f32 %v1395_v28, %v1390_v26 }
 0x50c   : > { %v1399_v6 = vadd.f32 %v1398_v27, %v1397_v29 }
 0x50e   : > { %v1400_v30 = vmax.f32 %v1399_v6, 0.0 }
 0x510   : > { %1402 = vst.msk [vmem:[%s488_s18] sm:$0xff] %vm1401_vm8, %v1400_v30 }
 0x511 PF: > { %s25_s27 = sadd.s32 1, %s1673_s27  }
 0x512   : > { %p22_p4 = scmp.ge.s32.totalorder %s25_s27, 4  }
 0x514   :  { %24 = sbr.rel (!%p22_p4) target bundleno = 3 (0x3), region = 129 }

</bundles_post_ra>
